<compile_context>
chip_gen: v7x
topology: tpu7x:2x2x1
jax: 0.10.0
libtpu: 0.0.40
codegen_flags: <defaults>
</compile_context>

<pallas_src>
import functools

import numpy as np

import jax
import jax.numpy as jnp
from jax.experimental import pallas as pl
from jax.experimental.pallas import tpu as pltpu


# ---------------------------------------------------------------------------
# quad-tree (LSB-first bit-interleaved) spatial ordering
# ---------------------------------------------------------------------------
def _quad_rank(size):
    k = size.bit_length() - 1
    h = np.arange(size)[:, None]
    w = np.arange(size)[None, :]
    r = np.zeros((size, size), dtype=np.int64)
    for j in range(k):
        r += (2 * ((h >> j) & 1) + ((w >> j) & 1)) * (4 ** (k - 1 - j))
    return r


_ORDER16 = np.argsort(_quad_rank(16).reshape(-1))   # layer-0 output grid (16x16)


# ---------------------------------------------------------------------------
# fused kernel: conv0+LReLU -> 3x (conv+BN+LReLU) -> conv4+Sigmoid
# ---------------------------------------------------------------------------
def _fused_kernel(x0_ref, w0_ref,
                  w1_ref, g1_ref, b1_ref,
                  w2_hbm, g2_ref, b2_ref,
                  w3_hbm, g3_ref, b3_ref,
                  w4_ref, o_ref,
                  w2_vmem, w3_vmem, dma_sem, *, n_batch):
    f32 = jnp.float32
    bf16 = jnp.bfloat16

    # Manual prefetch of the two big weights: start the DMAs immediately so
    # they overlap layer-0/1(/2) compute; wait just before each matmul.
    cp2 = pltpu.make_async_copy(w2_hbm, w2_vmem, dma_sem.at[0])
    cp3 = pltpu.make_async_copy(w3_hbm, w3_vmem, dma_sem.at[1])
    cp2.start()
    cp3.start()

    def leaky(v):                       # LeakyReLU(0.2): 2 VPU ops (mul + max)
        return jnp.maximum(v, 0.2 * v)

    def bn_layer(y_bf16, w_bf16, g, b):
        """lane-concat 4 row blocks -> MXU matmul -> BN -> LeakyReLU (f32)."""
        m = y_bf16.shape[0] // 4
        # The 4 contiguous row blocks ARE the 4 (kh, kw) input sub-grids,
        # already ordered for this layer -> lane-concat to the patch matrix
        # (concat happens in bf16, halving the relayout bytes).
        xc = jnp.concatenate(
            [y_bf16[0 * m:1 * m], y_bf16[1 * m:2 * m],
             y_bf16[2 * m:3 * m], y_bf16[3 * m:4 * m]], axis=1)     # (m, 4*Cin)
        z = jnp.dot(xc, w_bf16, preferred_element_type=f32)         # (m, Cout)
        # Training-mode BatchNorm (batch stats, eps=1e-5); affine folded into
        # per-channel scale/shift so the (m, Cout) pass is one mul + one add.
        # TODO(synk): one-pass E[x^2]-E[x]^2 variance; use a shifted/two-pass
        # form if activations grow large in real GAN training.
        inv_m = 1.0 / m
        mean = jnp.sum(z, axis=0, keepdims=True) * inv_m
        ex2 = jnp.sum(z * z, axis=0, keepdims=True) * inv_m
        var = ex2 - mean * mean
        scale = jax.lax.rsqrt(var + 1e-5) * g
        shift = b - mean * scale
        return leaky(z * scale + shift)

    # ---- layer 0: conv(channels -> 64) + LeakyReLU.  K is tiny but the MXU
    # is otherwise idle here, so one padded bf16 matmul (instead of per-lane
    # broadcast MACs) keeps the XLU free for the concat relayouts.
    x0 = x0_ref[...].astype(bf16)                                   # (M0, 4*C)
    y = leaky(jnp.dot(x0, w0_ref[...], preferred_element_type=f32))  # (N*256, 64)

    # ---- layers 1..3: MXU (bf16 operands / f32 accum) + BN + LeakyReLU.
    y = bn_layer(y.astype(bf16), w1_ref[...], g1_ref[...], b1_ref[...])   # (64N, 128)
    cp2.wait()
    y = bn_layer(y.astype(bf16), w2_vmem[...], g2_ref[...], b2_ref[...])  # (16N, 256)
    cp3.wait()
    y3 = bn_layer(y.astype(bf16), w3_vmem[...], g3_ref[...], b3_ref[...])  # (4N, 512) f32

    # ---- layer 4: conv(512 -> 1, 2x2 on the 2x2 grid) + Sigmoid.  O(N) path:
    # elementwise multiply against the q-replicated weight, reduce over lanes,
    # add the four q row-slices, then a lane-dense (N, 128) store.
    rowsum = jnp.sum(y3 * w4_ref[...], axis=-1, keepdims=True)       # (4N, 1)
    nb = n_batch
    s = (rowsum[0 * nb:1 * nb] + rowsum[1 * nb:2 * nb] +
         rowsum[2 * nb:3 * nb] + rowsum[3 * nb:4 * nb])              # (N, 1)
    o_ref[...] = jnp.broadcast_to(jax.nn.sigmoid(s), o_ref.shape)    # lane-dense


# ---------------------------------------------------------------------------
# parameters (torch-shaped weights, pre-arranged once into kernel layout)
# ---------------------------------------------------------------------------
def init_params(channels, key):
    plan = [(channels, 64), (64, 128), (128, 256), (256, 512), (512, 1)]
    mats = []
    for cin, cout in plan:
        key, sub = jax.random.split(key)
        w = 0.05 * jax.random.normal(sub, (cout, cin, 2, 2), jnp.float32)
        # torch (Cout, Cin, 2, 2) -> [K = (kh, kw, cin), Cout]
        mats.append(jnp.transpose(w, (2, 3, 1, 0)).reshape(4 * cin, cout))
    params = {
        "w0": mats[0].astype(jnp.bfloat16),
        "w1": mats[1].astype(jnp.bfloat16),
        "w2": mats[2].astype(jnp.bfloat16),
        "w3": mats[3].astype(jnp.bfloat16),
        "w4q": mats[4].reshape(4, 512),              # [q = 2*kh+kw, cin] f32
        "g1": jnp.ones((1, 128), jnp.float32), "b1": jnp.zeros((1, 128), jnp.float32),
        "g2": jnp.ones((1, 256), jnp.float32), "b2": jnp.zeros((1, 256), jnp.float32),
        "g3": jnp.ones((1, 512), jnp.float32), "b3": jnp.zeros((1, 512), jnp.float32),
    }
    return params


# ---------------------------------------------------------------------------
# forward pass
# ---------------------------------------------------------------------------
def lapgan_discriminator_level3(x_nchw, params):
    """x_nchw: (N, C, 32, 32) float32 -> (N, 1) in (0, 1)."""
    n, c, hh, ww = x_nchw.shape
    assert (hh, ww) == (32, 32), "level-3 discriminator expects 32x32 input"
    ho = hh // 2

    # One-time space-to-depth + quad-tree ordering of the (tiny) input:
    # row = rank16(h', w') * N + n , columns ordered (kh, kw, c).
    xs = x_nchw.reshape(n, c, ho, 2, ho, 2)
    xs = jnp.transpose(xs, (2, 4, 0, 3, 5, 1))        # (h', w', n, kh, kw, c)
    xs = xs.reshape(ho * ho, n, 4 * c)
    xs = xs[_ORDER16]                                 # reorder rows by rank
    p0 = xs.reshape(ho * ho * n, 4 * c)               # (N*256, 4*C)

    # Final-layer weight replicated per batch row: w4rep[q*N + n, cc] = w4q[q, cc]
    # (O(N) memory; replaces the old O(N^2) batch-masked weight + ycat path).
    w4rep = jnp.repeat(params["w4q"], n, axis=0)      # (4*N, 512) f32

    operands = (p0, params["w0"],
                params["w1"], params["g1"], params["b1"],
                params["w2"], params["g2"], params["b2"],
                params["w3"], params["g3"], params["b3"],
                w4rep)

    def _full(a):
        return pl.BlockSpec(a.shape, lambda i: (0, 0))

    in_specs = [_full(p0), _full(params["w0"]),
                _full(params["w1"]), _full(params["g1"]), _full(params["b1"]),
                pl.BlockSpec(memory_space=pl.ANY),            # w2: manual DMA
                _full(params["g2"]), _full(params["b2"]),
                pl.BlockSpec(memory_space=pl.ANY),            # w3: manual DMA
                _full(params["g3"]), _full(params["b3"]),
                _full(w4rep)]

    out = pl.pallas_call(
        functools.partial(_fused_kernel, n_batch=n),
        out_shape=jax.ShapeDtypeStruct((n, 128), jnp.float32),
        grid=(1,),
        in_specs=in_specs,
        out_specs=pl.BlockSpec((n, 128), lambda i: (0, 0)),
        scratch_shapes=[pltpu.VMEM(params["w2"].shape, jnp.bfloat16),
                        pltpu.VMEM(params["w3"].shape, jnp.bfloat16),
                        pltpu.SemaphoreType.DMA((2,))],
        compiler_params=pltpu.CompilerParams(
            dimension_semantics=("arbitrary",)),
    )(*operands)

    return out[:, :1]                                  # matches output.view(-1, 1)


if __name__ == "__main__":
    key = jax.random.PRNGKey(0)
    k_in, k_par = jax.random.split(key)

    channels = 1                                       # MNIST-style level-3 input
    x = jax.random.normal(k_in, (2, channels, 32, 32), jnp.float32)
    params = init_params(channels, k_par)

    fwd = jax.jit(lapgan_discriminator_level3)
    out = jax.block_until_ready(fwd(x, params))

    assert out.shape == (2, 1), out.shape
    assert bool(jnp.all((out >= 0.0) & (out <= 1.0)))  # sigmoid range
    print("KERNEL_OK")
</pallas_src>

<mosaic_0001>
module attributes {stable_mosaic.version = 11 : i64} {
  func.func @_fused_kernel(%arg0: i32, %arg1: memref<512x4xf32, #tpu.memory_space<vmem>>, %arg2: memref<4x64xbf16, #tpu.memory_space<vmem>>, %arg3: memref<256x128xbf16, #tpu.memory_space<vmem>>, %arg4: memref<1x128xf32, #tpu.memory_space<vmem>>, %arg5: memref<1x128xf32, #tpu.memory_space<vmem>>, %arg6: memref<512x256xbf16, #tpu.memory_space<any>>, %arg7: memref<1x256xf32, #tpu.memory_space<vmem>>, %arg8: memref<1x256xf32, #tpu.memory_space<vmem>>, %arg9: memref<1024x512xbf16, #tpu.memory_space<any>>, %arg10: memref<1x512xf32, #tpu.memory_space<vmem>>, %arg11: memref<1x512xf32, #tpu.memory_space<vmem>>, %arg12: memref<8x512xf32, #tpu.memory_space<vmem>>, %arg13: memref<2x128xf32, #tpu.memory_space<vmem>>, %arg14: memref<512x256xbf16, #tpu.memory_space<vmem>>, %arg15: memref<1024x512xbf16, #tpu.memory_space<vmem>>, %arg16: memref<2x!tpu.dma_semaphore, #tpu.memory_space<semaphore_mem>>) attributes {dimension_semantics = [#tpu.dimension_semantics<arbitrary>], iteration_bounds = array<i64: 1>, scalar_prefetch = 0 : i64, scratch_operands = 3 : i64, tpu.core_type = #tpu.core_type<tc>, window_params = [{pipeline_mode = #tpu.pipeline_mode<synchronous>, transform_indices = @transform_0, window_bounds = array<i64: 512, 4>}, {pipeline_mode = #tpu.pipeline_mode<synchronous>, transform_indices = @transform_1, window_bounds = array<i64: 4, 64>}, {pipeline_mode = #tpu.pipeline_mode<synchronous>, transform_indices = @transform_2, window_bounds = array<i64: 256, 128>}, {pipeline_mode = #tpu.pipeline_mode<synchronous>, transform_indices = @transform_3, window_bounds = array<i64: 1, 128>}, {pipeline_mode = #tpu.pipeline_mode<synchronous>, transform_indices = @transform_4, window_bounds = array<i64: 1, 128>}, {}, {pipeline_mode = #tpu.pipeline_mode<synchronous>, transform_indices = @transform_6, window_bounds = array<i64: 1, 256>}, {pipeline_mode = #tpu.pipeline_mode<synchronous>, transform_indices = @transform_7, window_bounds = array<i64: 1, 256>}, {}, {pipeline_mode = #tpu.pipeline_mode<synchronous>, transform_indices = @transform_9, window_bounds = array<i64: 1, 512>}, {pipeline_mode = #tpu.pipeline_mode<synchronous>, transform_indices = @transform_10, window_bounds = array<i64: 1, 512>}, {pipeline_mode = #tpu.pipeline_mode<synchronous>, transform_indices = @transform_11, window_bounds = array<i64: 8, 512>}, {pipeline_mode = #tpu.pipeline_mode<synchronous>, transform_indices = @transform_12, window_bounds = array<i64: 2, 128>}]} {
    %c0_i32 = arith.constant 0 : i32
    %0 = tpu.memref_slice %arg16[%c0_i32] : memref<2x!tpu.dma_semaphore, #tpu.memory_space<semaphore_mem>> -> memref<1x!tpu.dma_semaphore, #tpu.memory_space<semaphore_mem>>
    %1 = tpu.memref_squeeze %0 : memref<1x!tpu.dma_semaphore, #tpu.memory_space<semaphore_mem>> -> memref<!tpu.dma_semaphore, #tpu.memory_space<semaphore_mem>>
    tpu.enqueue_dma source(%arg6 : memref<512x256xbf16, #tpu.memory_space<any>>) target(%arg14 : memref<512x256xbf16, #tpu.memory_space<vmem>>) target_semaphore(%1 : memref<!tpu.dma_semaphore, #tpu.memory_space<semaphore_mem>>)
    %c1_i32 = arith.constant 1 : i32
    %2 = tpu.memref_slice %arg16[%c1_i32] : memref<2x!tpu.dma_semaphore, #tpu.memory_space<semaphore_mem>> -> memref<1x!tpu.dma_semaphore, #tpu.memory_space<semaphore_mem>>
    %3 = tpu.memref_squeeze %2 : memref<1x!tpu.dma_semaphore, #tpu.memory_space<semaphore_mem>> -> memref<!tpu.dma_semaphore, #tpu.memory_space<semaphore_mem>>
    tpu.enqueue_dma source(%arg9 : memref<1024x512xbf16, #tpu.memory_space<any>>) target(%arg15 : memref<1024x512xbf16, #tpu.memory_space<vmem>>) target_semaphore(%3 : memref<!tpu.dma_semaphore, #tpu.memory_space<semaphore_mem>>)
    %c0 = arith.constant 0 : index
    %c0_0 = arith.constant 0 : index
    %4 = vector.load %arg1[%c0, %c0_0] : memref<512x4xf32, #tpu.memory_space<vmem>>, vector<512x4xf32>
    %5 = arith.truncf %4 : vector<512x4xf32> to vector<512x4xbf16>
    %c0_1 = arith.constant 0 : index
    %c0_2 = arith.constant 0 : index
    %6 = vector.load %arg2[%c0_1, %c0_2] : memref<4x64xbf16, #tpu.memory_space<vmem>>, vector<4x64xbf16>
    %cst = arith.constant dense<0.000000e+00> : vector<512x64xf32>
    %7 = tpu.matmul %5, %6, %cst {dimension_numbers = #tpu.dot_dimension_numbers<[1], [0], [0], [1], [0, 0, 1, 1], [], []>} : vector<512x4xbf16>, vector<4x64xbf16>, vector<512x64xf32> -> vector<512x64xf32>
    %cst_3 = arith.constant 2.000000e-01 : f32
    %8 = vector.broadcast %cst_3 : f32 to vector<512x64xf32>
    %9 = arith.mulf %8, %7 : vector<512x64xf32>
    %10 = arith.maximumf %7, %9 : vector<512x64xf32>
    %11 = arith.truncf %10 : vector<512x64xf32> to vector<512x64xbf16>
    %c0_4 = arith.constant 0 : index
    %c0_5 = arith.constant 0 : index
    %12 = vector.load %arg3[%c0_4, %c0_5] : memref<256x128xbf16, #tpu.memory_space<vmem>>, vector<256x128xbf16>
    %c0_6 = arith.constant 0 : index
    %c0_7 = arith.constant 0 : index
    %13 = vector.load %arg4[%c0_6, %c0_7] : memref<1x128xf32, #tpu.memory_space<vmem>>, vector<1x128xf32>
    %c0_8 = arith.constant 0 : index
    %c0_9 = arith.constant 0 : index
    %14 = vector.load %arg5[%c0_8, %c0_9] : memref<1x128xf32, #tpu.memory_space<vmem>>, vector<1x128xf32>
    %15 = vector.extract_strided_slice %11 {offsets = [0, 0], sizes = [128, 64], strides = [1, 1]} : vector<512x64xbf16> to vector<128x64xbf16>
    %16 = vector.extract_strided_slice %11 {offsets = [128, 0], sizes = [128, 64], strides = [1, 1]} : vector<512x64xbf16> to vector<128x64xbf16>
    %17 = vector.extract_strided_slice %11 {offsets = [256, 0], sizes = [128, 64], strides = [1, 1]} : vector<512x64xbf16> to vector<128x64xbf16>
    %18 = vector.extract_strided_slice %11 {offsets = [384, 0], sizes = [128, 64], strides = [1, 1]} : vector<512x64xbf16> to vector<128x64xbf16>
    %19 = tpu.concatenate %15, %16, %17, %18 in 1 : vector<128x64xbf16>, vector<128x64xbf16>, vector<128x64xbf16>, vector<128x64xbf16> -> vector<128x256xbf16>
    %cst_10 = arith.constant dense<0.000000e+00> : vector<128x128xf32>
    %20 = tpu.matmul %19, %12, %cst_10 {dimension_numbers = #tpu.dot_dimension_numbers<[1], [0], [0], [1], [0, 0, 1, 1], [], []>} : vector<128x256xbf16>, vector<256x128xbf16>, vector<128x128xf32> -> vector<128x128xf32>
    %cst_11 = arith.constant dense<0.000000e+00> : vector<128xf32>
    %21 = vector.multi_reduction <add>, %20, %cst_11 [0] : vector<128x128xf32> to vector<128xf32>
    %22 = vector.shape_cast %21 : vector<128xf32> to vector<1x128xf32>
    %cst_12 = arith.constant 7.812500e-03 : f32
    %23 = vector.broadcast %cst_12 : f32 to vector<1x128xf32>
    %24 = arith.mulf %22, %23 : vector<1x128xf32>
    %25 = arith.mulf %20, %20 : vector<128x128xf32>
    %cst_13 = arith.constant dense<0.000000e+00> : vector<128xf32>
    %26 = vector.multi_reduction <add>, %25, %cst_13 [0] : vector<128x128xf32> to vector<128xf32>
    %27 = vector.shape_cast %26 : vector<128xf32> to vector<1x128xf32>
    %cst_14 = arith.constant 7.812500e-03 : f32
    %28 = vector.broadcast %cst_14 : f32 to vector<1x128xf32>
    %29 = arith.mulf %27, %28 : vector<1x128xf32>
    %30 = arith.mulf %24, %24 : vector<1x128xf32>
    %31 = arith.subf %29, %30 : vector<1x128xf32>
    %cst_15 = arith.constant 9.99999974E-6 : f32
    %32 = vector.broadcast %cst_15 : f32 to vector<1x128xf32>
    %33 = arith.addf %31, %32 : vector<1x128xf32>
    %34 = math.rsqrt %33 : vector<1x128xf32>
    %35 = arith.mulf %34, %13 : vector<1x128xf32>
    %36 = arith.mulf %24, %35 : vector<1x128xf32>
    %37 = arith.subf %14, %36 : vector<1x128xf32>
    %38 = vector.broadcast %35 : vector<1x128xf32> to vector<128x128xf32>
    %39 = arith.mulf %20, %38 : vector<128x128xf32>
    %40 = vector.broadcast %37 : vector<1x128xf32> to vector<128x128xf32>
    %41 = arith.addf %39, %40 : vector<128x128xf32>
    %cst_16 = arith.constant 2.000000e-01 : f32
    %42 = vector.broadcast %cst_16 : f32 to vector<128x128xf32>
    %43 = arith.mulf %42, %41 : vector<128x128xf32>
    %44 = arith.maximumf %41, %43 : vector<128x128xf32>
    %c0_i32_17 = arith.constant 0 : i32
    %45 = tpu.memref_slice %arg16[%c0_i32_17] : memref<2x!tpu.dma_semaphore, #tpu.memory_space<semaphore_mem>> -> memref<1x!tpu.dma_semaphore, #tpu.memory_space<semaphore_mem>>
    %46 = tpu.memref_squeeze %45 : memref<1x!tpu.dma_semaphore, #tpu.memory_space<semaphore_mem>> -> memref<!tpu.dma_semaphore, #tpu.memory_space<semaphore_mem>>
    tpu.wait_dma2 semaphore(%46 : memref<!tpu.dma_semaphore, #tpu.memory_space<semaphore_mem>>) src(%arg6 : memref<512x256xbf16, #tpu.memory_space<any>>) dst(%arg14 : memref<512x256xbf16, #tpu.memory_space<vmem>>)
    %47 = arith.truncf %44 : vector<128x128xf32> to vector<128x128xbf16>
    %c0_18 = arith.constant 0 : index
    %c0_19 = arith.constant 0 : index
    %48 = vector.load %arg14[%c0_18, %c0_19] : memref<512x256xbf16, #tpu.memory_space<vmem>>, vector<512x256xbf16>
    %c0_20 = arith.constant 0 : index
    %c0_21 = arith.constant 0 : index
    %49 = vector.load %arg7[%c0_20, %c0_21] : memref<1x256xf32, #tpu.memory_space<vmem>>, vector<1x256xf32>
    %c0_22 = arith.constant 0 : index
    %c0_23 = arith.constant 0 : index
    %50 = vector.load %arg8[%c0_22, %c0_23] : memref<1x256xf32, #tpu.memory_space<vmem>>, vector<1x256xf32>
    %51 = vector.extract_strided_slice %47 {offsets = [0, 0], sizes = [32, 128], strides = [1, 1]} : vector<128x128xbf16> to vector<32x128xbf16>
    %52 = vector.extract_strided_slice %47 {offsets = [32, 0], sizes = [32, 128], strides = [1, 1]} : vector<128x128xbf16> to vector<32x128xbf16>
    %53 = vector.extract_strided_slice %47 {offsets = [64, 0], sizes = [32, 128], strides = [1, 1]} : vector<128x128xbf16> to vector<32x128xbf16>
    %54 = vector.extract_strided_slice %47 {offsets = [96, 0], sizes = [32, 128], strides = [1, 1]} : vector<128x128xbf16> to vector<32x128xbf16>
    %55 = tpu.concatenate %51, %52, %53, %54 in 1 : vector<32x128xbf16>, vector<32x128xbf16>, vector<32x128xbf16>, vector<32x128xbf16> -> vector<32x512xbf16>
    %cst_24 = arith.constant dense<0.000000e+00> : vector<32x256xf32>
    %56 = tpu.matmul %55, %48, %cst_24 {dimension_numbers = #tpu.dot_dimension_numbers<[1], [0], [0], [1], [0, 0, 1, 1], [], []>} : vector<32x512xbf16>, vector<512x256xbf16>, vector<32x256xf32> -> vector<32x256xf32>
    %cst_25 = arith.constant dense<0.000000e+00> : vector<256xf32>
    %57 = vector.multi_reduction <add>, %56, %cst_25 [0] : vector<32x256xf32> to vector<256xf32>
    %58 = vector.shape_cast %57 : vector<256xf32> to vector<1x256xf32>
    %cst_26 = arith.constant 3.125000e-02 : f32
    %59 = vector.broadcast %cst_26 : f32 to vector<1x256xf32>
    %60 = arith.mulf %58, %59 : vector<1x256xf32>
    %61 = arith.mulf %56, %56 : vector<32x256xf32>
    %cst_27 = arith.constant dense<0.000000e+00> : vector<256xf32>
    %62 = vector.multi_reduction <add>, %61, %cst_27 [0] : vector<32x256xf32> to vector<256xf32>
    %63 = vector.shape_cast %62 : vector<256xf32> to vector<1x256xf32>
    %cst_28 = arith.constant 3.125000e-02 : f32
    %64 = vector.broadcast %cst_28 : f32 to vector<1x256xf32>
    %65 = arith.mulf %63, %64 : vector<1x256xf32>
    %66 = arith.mulf %60, %60 : vector<1x256xf32>
    %67 = arith.subf %65, %66 : vector<1x256xf32>
    %cst_29 = arith.constant 9.99999974E-6 : f32
    %68 = vector.broadcast %cst_29 : f32 to vector<1x256xf32>
    %69 = arith.addf %67, %68 : vector<1x256xf32>
    %70 = math.rsqrt %69 : vector<1x256xf32>
    %71 = arith.mulf %70, %49 : vector<1x256xf32>
    %72 = arith.mulf %60, %71 : vector<1x256xf32>
    %73 = arith.subf %50, %72 : vector<1x256xf32>
    %74 = vector.broadcast %71 : vector<1x256xf32> to vector<32x256xf32>
    %75 = arith.mulf %56, %74 : vector<32x256xf32>
    %76 = vector.broadcast %73 : vector<1x256xf32> to vector<32x256xf32>
    %77 = arith.addf %75, %76 : vector<32x256xf32>
    %cst_30 = arith.constant 2.000000e-01 : f32
    %78 = vector.broadcast %cst_30 : f32 to vector<32x256xf32>
    %79 = arith.mulf %78, %77 : vector<32x256xf32>
    %80 = arith.maximumf %77, %79 : vector<32x256xf32>
    %c1_i32_31 = arith.constant 1 : i32
    %81 = tpu.memref_slice %arg16[%c1_i32_31] : memref<2x!tpu.dma_semaphore, #tpu.memory_space<semaphore_mem>> -> memref<1x!tpu.dma_semaphore, #tpu.memory_space<semaphore_mem>>
    %82 = tpu.memref_squeeze %81 : memref<1x!tpu.dma_semaphore, #tpu.memory_space<semaphore_mem>> -> memref<!tpu.dma_semaphore, #tpu.memory_space<semaphore_mem>>
    tpu.wait_dma2 semaphore(%82 : memref<!tpu.dma_semaphore, #tpu.memory_space<semaphore_mem>>) src(%arg9 : memref<1024x512xbf16, #tpu.memory_space<any>>) dst(%arg15 : memref<1024x512xbf16, #tpu.memory_space<vmem>>)
    %83 = arith.truncf %80 : vector<32x256xf32> to vector<32x256xbf16>
    %c0_32 = arith.constant 0 : index
    %c0_33 = arith.constant 0 : index
    %84 = vector.load %arg15[%c0_32, %c0_33] : memref<1024x512xbf16, #tpu.memory_space<vmem>>, vector<1024x512xbf16>
    %c0_34 = arith.constant 0 : index
    %c0_35 = arith.constant 0 : index
    %85 = vector.load %arg10[%c0_34, %c0_35] : memref<1x512xf32, #tpu.memory_space<vmem>>, vector<1x512xf32>
    %c0_36 = arith.constant 0 : index
    %c0_37 = arith.constant 0 : index
    %86 = vector.load %arg11[%c0_36, %c0_37] : memref<1x512xf32, #tpu.memory_space<vmem>>, vector<1x512xf32>
    %87 = vector.extract_strided_slice %83 {offsets = [0, 0], sizes = [8, 256], strides = [1, 1]} : vector<32x256xbf16> to vector<8x256xbf16>
    %88 = vector.extract_strided_slice %83 {offsets = [8, 0], sizes = [8, 256], strides = [1, 1]} : vector<32x256xbf16> to vector<8x256xbf16>
    %89 = vector.extract_strided_slice %83 {offsets = [16, 0], sizes = [8, 256], strides = [1, 1]} : vector<32x256xbf16> to vector<8x256xbf16>
    %90 = vector.extract_strided_slice %83 {offsets = [24, 0], sizes = [8, 256], strides = [1, 1]} : vector<32x256xbf16> to vector<8x256xbf16>
    %91 = tpu.concatenate %87, %88, %89, %90 in 1 : vector<8x256xbf16>, vector<8x256xbf16>, vector<8x256xbf16>, vector<8x256xbf16> -> vector<8x1024xbf16>
    %cst_38 = arith.constant dense<0.000000e+00> : vector<8x512xf32>
    %92 = tpu.matmul %91, %84, %cst_38 {dimension_numbers = #tpu.dot_dimension_numbers<[1], [0], [0], [1], [0, 0, 1, 1], [], []>} : vector<8x1024xbf16>, vector<1024x512xbf16>, vector<8x512xf32> -> vector<8x512xf32>
    %cst_39 = arith.constant dense<0.000000e+00> : vector<512xf32>
    %93 = vector.multi_reduction <add>, %92, %cst_39 [0] : vector<8x512xf32> to vector<512xf32>
    %94 = vector.shape_cast %93 : vector<512xf32> to vector<1x512xf32>
    %cst_40 = arith.constant 1.250000e-01 : f32
    %95 = vector.broadcast %cst_40 : f32 to vector<1x512xf32>
    %96 = arith.mulf %94, %95 : vector<1x512xf32>
    %97 = arith.mulf %92, %92 : vector<8x512xf32>
    %cst_41 = arith.constant dense<0.000000e+00> : vector<512xf32>
    %98 = vector.multi_reduction <add>, %97, %cst_41 [0] : vector<8x512xf32> to vector<512xf32>
    %99 = vector.shape_cast %98 : vector<512xf32> to vector<1x512xf32>
    %cst_42 = arith.constant 1.250000e-01 : f32
    %100 = vector.broadcast %cst_42 : f32 to vector<1x512xf32>
    %101 = arith.mulf %99, %100 : vector<1x512xf32>
    %102 = arith.mulf %96, %96 : vector<1x512xf32>
    %103 = arith.subf %101, %102 : vector<1x512xf32>
    %cst_43 = arith.constant 9.99999974E-6 : f32
    %104 = vector.broadcast %cst_43 : f32 to vector<1x512xf32>
    %105 = arith.addf %103, %104 : vector<1x512xf32>
    %106 = math.rsqrt %105 : vector<1x512xf32>
    %107 = arith.mulf %106, %85 : vector<1x512xf32>
    %108 = arith.mulf %96, %107 : vector<1x512xf32>
    %109 = arith.subf %86, %108 : vector<1x512xf32>
    %110 = vector.broadcast %107 : vector<1x512xf32> to vector<8x512xf32>
    %111 = arith.mulf %92, %110 : vector<8x512xf32>
    %112 = vector.broadcast %109 : vector<1x512xf32> to vector<8x512xf32>
    %113 = arith.addf %111, %112 : vector<8x512xf32>
    %cst_44 = arith.constant 2.000000e-01 : f32
    %114 = vector.broadcast %cst_44 : f32 to vector<8x512xf32>
    %115 = arith.mulf %114, %113 : vector<8x512xf32>
    %116 = arith.maximumf %113, %115 : vector<8x512xf32>
    %c0_45 = arith.constant 0 : index
    %c0_46 = arith.constant 0 : index
    %117 = vector.load %arg12[%c0_45, %c0_46] : memref<8x512xf32, #tpu.memory_space<vmem>>, vector<8x512xf32>
    %118 = arith.mulf %116, %117 : vector<8x512xf32>
    %cst_47 = arith.constant dense<0.000000e+00> : vector<8xf32>
    %119 = vector.multi_reduction <add>, %118, %cst_47 [1] : vector<8x512xf32> to vector<8xf32>
    %120 = vector.shape_cast %119 : vector<8xf32> to vector<8x1xf32>
    %121 = vector.extract_strided_slice %120 {offsets = [0, 0], sizes = [2, 1], strides = [1, 1]} : vector<8x1xf32> to vector<2x1xf32>
    %122 = vector.extract_strided_slice %120 {offsets = [2, 0], sizes = [2, 1], strides = [1, 1]} : vector<8x1xf32> to vector<2x1xf32>
    %123 = arith.addf %121, %122 : vector<2x1xf32>
    %124 = vector.extract_strided_slice %120 {offsets = [4, 0], sizes = [2, 1], strides = [1, 1]} : vector<8x1xf32> to vector<2x1xf32>
    %125 = arith.addf %123, %124 : vector<2x1xf32>
    %126 = vector.extract_strided_slice %120 {offsets = [6, 0], sizes = [2, 1], strides = [1, 1]} : vector<8x1xf32> to vector<2x1xf32>
    %127 = arith.addf %125, %126 : vector<2x1xf32>
    %128 = arith.negf %127 : vector<2x1xf32>
    %129 = math.exp %128 : vector<2x1xf32>
    %cst_48 = arith.constant 1.000000e+00 : f32
    %130 = vector.broadcast %cst_48 : f32 to vector<2x1xf32>
    %131 = arith.addf %130, %129 : vector<2x1xf32>
    %132 = arith.divf %130, %131 : vector<2x1xf32>
    %133 = vector.shape_cast %132 : vector<2x1xf32> to vector<2x1xf32>
    %134 = vector.broadcast %133 : vector<2x1xf32> to vector<2x128xf32>
    %c0_49 = arith.constant 0 : index
    %c0_50 = arith.constant 0 : index
    %135 = vector.load %arg13[%c0_49, %c0_50] : memref<2x128xf32, #tpu.memory_space<vmem>>, vector<2x128xf32>
    tpu.vector_store %arg13[%c0_49, %c0_50], %134 {strides = array<i32>} : memref<2x128xf32, #tpu.memory_space<vmem>>, vector<2x128xf32>,
    return
  }
  func.func @transform_0(%arg0: i32) -> (i32, i32) {
    %c0_i32 = arith.constant 0 : i32
    %c0_i32_0 = arith.constant 0 : i32
    %c0_i32_1 = arith.constant 0 : i32
    return %c0_i32, %c0_i32_0 : i32, i32
  }
  func.func @transform_1(%arg0: i32) -> (i32, i32) {
    %c0_i32 = arith.constant 0 : i32
    %c0_i32_0 = arith.constant 0 : i32
    %c0_i32_1 = arith.constant 0 : i32
    return %c0_i32, %c0_i32_0 : i32, i32
  }
  func.func @transform_2(%arg0: i32) -> (i32, i32) {
    %c0_i32 = arith.constant 0 : i32
    %c0_i32_0 = arith.constant 0 : i32
    %c0_i32_1 = arith.constant 0 : i32
    return %c0_i32, %c0_i32_0 : i32, i32
  }
  func.func @transform_3(%arg0: i32) -> (i32, i32) {
    %c0_i32 = arith.constant 0 : i32
    %c0_i32_0 = arith.constant 0 : i32
    %c0_i32_1 = arith.constant 0 : i32
    return %c0_i32, %c0_i32_0 : i32, i32
  }
  func.func @transform_4(%arg0: i32) -> (i32, i32) {
    %c0_i32 = arith.constant 0 : i32
    %c0_i32_0 = arith.constant 0 : i32
    %c0_i32_1 = arith.constant 0 : i32
    return %c0_i32, %c0_i32_0 : i32, i32
  }
  func.func @transform_6(%arg0: i32) -> (i32, i32) {
    %c0_i32 = arith.constant 0 : i32
    %c0_i32_0 = arith.constant 0 : i32
    %c0_i32_1 = arith.constant 0 : i32
    return %c0_i32, %c0_i32_0 : i32, i32
  }
  func.func @transform_7(%arg0: i32) -> (i32, i32) {
    %c0_i32 = arith.constant 0 : i32
    %c0_i32_0 = arith.constant 0 : i32
    %c0_i32_1 = arith.constant 0 : i32
    return %c0_i32, %c0_i32_0 : i32, i32
  }
  func.func @transform_9(%arg0: i32) -> (i32, i32) {
    %c0_i32 = arith.constant 0 : i32
    %c0_i32_0 = arith.constant 0 : i32
    %c0_i32_1 = arith.constant 0 : i32
    return %c0_i32, %c0_i32_0 : i32, i32
  }
  func.func @transform_10(%arg0: i32) -> (i32, i32) {
    %c0_i32 = arith.constant 0 : i32
    %c0_i32_0 = arith.constant 0 : i32
    %c0_i32_1 = arith.constant 0 : i32
    return %c0_i32, %c0_i32_0 : i32, i32
  }
  func.func @transform_11(%arg0: i32) -> (i32, i32) {
    %c0_i32 = arith.constant 0 : i32
    %c0_i32_0 = arith.constant 0 : i32
    %c0_i32_1 = arith.constant 0 : i32
    return %c0_i32, %c0_i32_0 : i32, i32
  }
  func.func @transform_12(%arg0: i32) -> (i32, i32) {
    %c0_i32 = arith.constant 0 : i32
    %c0_i32_0 = arith.constant 0 : i32
    %c0_i32_1 = arith.constant 0 : i32
    return %c0_i32, %c0_i32_0 : i32, i32
  }
}

</mosaic_0001>

<bundles_post_ra>
// kernel: lapgan_discriminator_level3.1
= control target key start
LH: loop header
LB: loop body
LE: loop exit
PB: predicated region body
PF: predicated region fallthrough
CT: control target
= control target key end

     0   :  { %s9948_s0 = inlined_call_operand.vmem [shape: f32[512,4], index: 0, kind: input, shape index: {}]   ;;  %s9949_s1 = inlined_call_operand.vmem [shape: bf16[4,64], index: 1, kind: input, shape index: {}]   ;;  %s9950_s2 = inlined_call_operand.vmem [shape: bf16[256,128], index: 2, kind: input, shape index: {}]   ;;  %s9951_s3 = inlined_call_operand.vmem [shape: f32[1,128], index: 3, kind: input, shape index: {}]   ;;  %s9952_s4 = inlined_call_operand.vmem [shape: f32[1,128], index: 4, kind: input, shape index: {}]   ;;  %s9953_s5 = inlined_call_operand.vmem [shape: bf16[512,256], index: 5, kind: input, shape index: {}]   ;;  %s9954_s6 = inlined_call_operand.vmem [shape: f32[1,256], index: 6, kind: input, shape index: {}]   ;;  %s9955_s7 = inlined_call_operand.vmem [shape: f32[1,256], index: 7, kind: input, shape index: {}]   ;;  %s9956_s8 = inlined_call_operand.vmem [shape: bf16[1024,512], index: 8, kind: input, shape index: {}]   ;;  %s9957_s9 = inlined_call_operand.vmem [shape: f32[1,512], index: 9, kind: input, shape index: {}]   ;;  %s9958_s10 = inlined_call_operand.vmem [shape: f32[1,512], index: 10, kind: input, shape index: {}]   ;;  %s9959_s11 = inlined_call_operand.vmem [shape: f32[8,512], index: 11, kind: input, shape index: {}]   ;;  %s9960_s12 = inlined_call_operand.vmem [shape: f32[2,128], index: 12, kind: output, shape index: {}]  }
   0x1   :  { %v55_v0 = vld [vmem:[%s9953_s5] sm:$0xf]  ;;  %v57_v1 = vld [vmem:[%s9953_s5 + $0x8] sm:$0xf]  ;;  %v59_v2 = vld [vmem:[%s9953_s5 + $0x4] sm:$0xf] }
   0x2   :  { %56 = vst [vmem:[#allocation2] sm:$0xf] %v55_v0  ;;  %58 = vst [vmem:[#allocation2 + $0x4] sm:$0xf] %v57_v1  ;;  %v61_v3 = vld [vmem:[%s9953_s5 + $0xc] sm:$0xff]   ;;  %v69_v6 = vld [vmem:[%s9953_s5 + $0x1c] sm:$0xff]  }
   0x3   :  { %60 = vst [vmem:[#allocation2 + $0x8] sm:$0xf] %v59_v2  ;;  %v65_v4 = vld [vmem:[%s9953_s5 + $0x18] sm:$0xf]  ;;  %v67_v5 = vld [vmem:[%s9953_s5 + $0x14] sm:$0xf] }
   0x4   :  { %62 = vst [vmem:[#allocation2 + $0xc] sm:$0xff] %v61_v3   ;;  %66 = vst [vmem:[#allocation2 + $0x14] sm:$0xf] %v65_v4  ;;  %v73_v7 = vld [vmem:[%s9953_s5 + $0x28] sm:$0xf]  ;;  %v77_v9 = vld [vmem:[%s9953_s5 + $0x2c] sm:$0xff]  }
   0x5   :  { %68 = vst [vmem:[#allocation2 + $0x18] sm:$0xf] %v67_v5  ;;  %v75_v8 = vld [vmem:[%s9953_s5 + $0x24] sm:$0xf]  ;;  %70 = vst [vmem:[#allocation2 + $0x1c] sm:$0xff] %v69_v6   ;;  %v85_v12 = vld [vmem:[%s9953_s5 + $0x3c] sm:$0xff]  }
   0x6   :  { %74 = vst [vmem:[#allocation2 + $0x24] sm:$0xf] %v73_v7  ;;  %76 = vst [vmem:[#allocation2 + $0x28] sm:$0xf] %v75_v8  ;;  %v81_v10 = vld [vmem:[%s9953_s5 + $0x38] sm:$0xf] }
   0x7   :  { %v83_v11 = vld [vmem:[%s9953_s5 + $0x34] sm:$0xf]  ;;  %78 = vst [vmem:[#allocation2 + $0x2c] sm:$0xff] %v77_v9   ;;  %82 = vst [vmem:[#allocation2 + $0x34] sm:$0xf] %v81_v10  ;;  %v93_v15 = vld [vmem:[%s9953_s5 + $0x4c] sm:$0xff]  }
   0x8   :  { %84 = vst [vmem:[#allocation2 + $0x38] sm:$0xf] %v83_v11  ;;  %v89_v13 = vld [vmem:[%s9953_s5 + $0x48] sm:$0xf]  ;;  %v91_v14 = vld [vmem:[%s9953_s5 + $0x44] sm:$0xf] }
   0x9   :  { %86 = vst [vmem:[#allocation2 + $0x3c] sm:$0xff] %v85_v12   ;;  %90 = vst [vmem:[#allocation2 + $0x44] sm:$0xf] %v89_v13  ;;  %v97_v16 = vld [vmem:[%s9953_s5 + $0x58] sm:$0xf]  ;;  %v101_v18 = vld [vmem:[%s9953_s5 + $0x5c] sm:$0xff]  }
   0xa   :  { %92 = vst [vmem:[#allocation2 + $0x48] sm:$0xf] %v91_v14  ;;  %v99_v17 = vld [vmem:[%s9953_s5 + $0x54] sm:$0xf]  ;;  %94 = vst [vmem:[#allocation2 + $0x4c] sm:$0xff] %v93_v15   ;;  %v109_v21 = vld [vmem:[%s9953_s5 + $0x6c] sm:$0xff]  }
   0xb   :  { %98 = vst [vmem:[#allocation2 + $0x54] sm:$0xf] %v97_v16  ;;  %100 = vst [vmem:[#allocation2 + $0x58] sm:$0xf] %v99_v17  ;;  %v105_v19 = vld [vmem:[%s9953_s5 + $0x68] sm:$0xf] }
   0xc   :  { %v107_v20 = vld [vmem:[%s9953_s5 + $0x64] sm:$0xf]  ;;  %102 = vst [vmem:[#allocation2 + $0x5c] sm:$0xff] %v101_v18   ;;  %106 = vst [vmem:[#allocation2 + $0x64] sm:$0xf] %v105_v19  ;;  %v117_v24 = vld [vmem:[%s9953_s5 + $0x7c] sm:$0xff]  }
   0xd   :  { %108 = vst [vmem:[#allocation2 + $0x68] sm:$0xf] %v107_v20  ;;  %v113_v22 = vld [vmem:[%s9953_s5 + $0x78] sm:$0xf]  ;;  %v115_v23 = vld [vmem:[%s9953_s5 + $0x74] sm:$0xf] }
   0xe   :  { %110 = vst [vmem:[#allocation2 + $0x6c] sm:$0xff] %v109_v21   ;;  %114 = vst [vmem:[#allocation2 + $0x74] sm:$0xf] %v113_v22  ;;  %v121_v25 = vld [vmem:[%s9953_s5 + $0x88] sm:$0xf]  ;;  %v125_v27 = vld [vmem:[%s9953_s5 + $0x8c] sm:$0xff]  }
   0xf   :  { %116 = vst [vmem:[#allocation2 + $0x78] sm:$0xf] %v115_v23  ;;  %v123_v26 = vld [vmem:[%s9953_s5 + $0x84] sm:$0xf]  ;;  %118 = vst [vmem:[#allocation2 + $0x7c] sm:$0xff] %v117_v24   ;;  %v133_v30 = vld [vmem:[%s9953_s5 + $0x9c] sm:$0xff]  }
  0x10   :  { %122 = vst [vmem:[#allocation2 + $0x84] sm:$0xf] %v121_v25  ;;  %124 = vst [vmem:[#allocation2 + $0x88] sm:$0xf] %v123_v26  ;;  %v129_v28 = vld [vmem:[%s9953_s5 + $0x98] sm:$0xf] }
  0x11   :  { %v131_v29 = vld [vmem:[%s9953_s5 + $0x94] sm:$0xf]  ;;  %126 = vst [vmem:[#allocation2 + $0x8c] sm:$0xff] %v125_v27   ;;  %130 = vst [vmem:[#allocation2 + $0x94] sm:$0xf] %v129_v28  ;;  %v141_v33 = vld [vmem:[%s9953_s5 + $0xac] sm:$0xff]  }
  0x12   :  { %132 = vst [vmem:[#allocation2 + $0x98] sm:$0xf] %v131_v29  ;;  %v137_v31 = vld [vmem:[%s9953_s5 + $0xa8] sm:$0xf]  ;;  %v139_v32 = vld [vmem:[%s9953_s5 + $0xa4] sm:$0xf] }
  0x13   :  { %134 = vst [vmem:[#allocation2 + $0x9c] sm:$0xff] %v133_v30   ;;  %138 = vst [vmem:[#allocation2 + $0xa4] sm:$0xf] %v137_v31  ;;  %v145_v34 = vld [vmem:[%s9953_s5 + $0xb8] sm:$0xf]  ;;  %v149_v36 = vld [vmem:[%s9953_s5 + $0xbc] sm:$0xff]  }
  0x14   :  { %140 = vst [vmem:[#allocation2 + $0xa8] sm:$0xf] %v139_v32  ;;  %v147_v35 = vld [vmem:[%s9953_s5 + $0xb4] sm:$0xf]  ;;  %142 = vst [vmem:[#allocation2 + $0xac] sm:$0xff] %v141_v33   ;;  %v157_v39 = vld [vmem:[%s9953_s5 + $0xcc] sm:$0xff]  }
  0x15   :  { %146 = vst [vmem:[#allocation2 + $0xb4] sm:$0xf] %v145_v34  ;;  %148 = vst [vmem:[#allocation2 + $0xb8] sm:$0xf] %v147_v35  ;;  %v153_v37 = vld [vmem:[%s9953_s5 + $0xc8] sm:$0xf] }
  0x16   :  { %v155_v38 = vld [vmem:[%s9953_s5 + $0xc4] sm:$0xf]  ;;  %150 = vst [vmem:[#allocation2 + $0xbc] sm:$0xff] %v149_v36   ;;  %154 = vst [vmem:[#allocation2 + $0xc4] sm:$0xf] %v153_v37  ;;  %v165_v42 = vld [vmem:[%s9953_s5 + $0xdc] sm:$0xff]  }
  0x17   :  { %156 = vst [vmem:[#allocation2 + $0xc8] sm:$0xf] %v155_v38  ;;  %v161_v40 = vld [vmem:[%s9953_s5 + $0xd8] sm:$0xf]  ;;  %v163_v41 = vld [vmem:[%s9953_s5 + $0xd4] sm:$0xf] }
  0x18   :  { %158 = vst [vmem:[#allocation2 + $0xcc] sm:$0xff] %v157_v39   ;;  %162 = vst [vmem:[#allocation2 + $0xd4] sm:$0xf] %v161_v40  ;;  %v169_v43 = vld [vmem:[%s9953_s5 + $0xe8] sm:$0xf]  ;;  %v173_v45 = vld [vmem:[%s9953_s5 + $0xec] sm:$0xff]  }
  0x19   :  { %164 = vst [vmem:[#allocation2 + $0xd8] sm:$0xf] %v163_v41  ;;  %v171_v44 = vld [vmem:[%s9953_s5 + $0xe4] sm:$0xf]  ;;  %166 = vst [vmem:[#allocation2 + $0xdc] sm:$0xff] %v165_v42   ;;  %v181_v48 = vld [vmem:[%s9953_s5 + $0xfc] sm:$0xff]  }
  0x1a   :  { %170 = vst [vmem:[#allocation2 + $0xe4] sm:$0xf] %v169_v43  ;;  %172 = vst [vmem:[#allocation2 + $0xe8] sm:$0xf] %v171_v44  ;;  %v177_v46 = vld [vmem:[%s9953_s5 + $0xf8] sm:$0xf] }
  0x1b   :  { %v179_v47 = vld [vmem:[%s9953_s5 + $0xf4] sm:$0xf]  ;;  %174 = vst [vmem:[#allocation2 + $0xec] sm:$0xff] %v173_v45   ;;  %178 = vst [vmem:[#allocation2 + $0xf4] sm:$0xf] %v177_v46  ;;  %v189_v51 = vld [vmem:[%s9953_s5 + $0x10c] sm:$0xff]  }
  0x1c   :  { %180 = vst [vmem:[#allocation2 + $0xf8] sm:$0xf] %v179_v47  ;;  %v185_v49 = vld [vmem:[%s9953_s5 + $0x108] sm:$0xf]  ;;  %v187_v50 = vld [vmem:[%s9953_s5 + $0x104] sm:$0xf] }
  0x1d   :  { %182 = vst [vmem:[#allocation2 + $0xfc] sm:$0xff] %v181_v48   ;;  %186 = vst [vmem:[#allocation2 + $0x104] sm:$0xf] %v185_v49  ;;  %v193_v52 = vld [vmem:[%s9953_s5 + $0x118] sm:$0xf]  ;;  %v197_v54 = vld [vmem:[%s9953_s5 + $0x11c] sm:$0xff]  }
  0x1e   :  { %188 = vst [vmem:[#allocation2 + $0x108] sm:$0xf] %v187_v50  ;;  %v195_v53 = vld [vmem:[%s9953_s5 + $0x114] sm:$0xf]  ;;  %190 = vst [vmem:[#allocation2 + $0x10c] sm:$0xff] %v189_v51   ;;  %v205_v57 = vld [vmem:[%s9953_s5 + $0x12c] sm:$0xff]  }
  0x1f   :  { %194 = vst [vmem:[#allocation2 + $0x114] sm:$0xf] %v193_v52  ;;  %196 = vst [vmem:[#allocation2 + $0x118] sm:$0xf] %v195_v53  ;;  %v201_v55 = vld [vmem:[%s9953_s5 + $0x128] sm:$0xf] }
  0x20   :  { %v203_v56 = vld [vmem:[%s9953_s5 + $0x124] sm:$0xf]  ;;  %198 = vst [vmem:[#allocation2 + $0x11c] sm:$0xff] %v197_v54   ;;  %202 = vst [vmem:[#allocation2 + $0x124] sm:$0xf] %v201_v55  ;;  %v213_v60 = vld [vmem:[%s9953_s5 + $0x13c] sm:$0xff]  }
  0x21   :  { %204 = vst [vmem:[#allocation2 + $0x128] sm:$0xf] %v203_v56  ;;  %v209_v58 = vld [vmem:[%s9953_s5 + $0x138] sm:$0xf]  ;;  %v211_v59 = vld [vmem:[%s9953_s5 + $0x134] sm:$0xf] }
  0x22   :  { %206 = vst [vmem:[#allocation2 + $0x12c] sm:$0xff] %v205_v57   ;;  %210 = vst [vmem:[#allocation2 + $0x134] sm:$0xf] %v209_v58  ;;  %v217_v61 = vld [vmem:[%s9953_s5 + $0x148] sm:$0xf]  ;;  %v221_v63 = vld [vmem:[%s9953_s5 + $0x14c] sm:$0xff]  }
  0x23   :  { %212 = vst [vmem:[#allocation2 + $0x138] sm:$0xf] %v211_v59  ;;  %v219_v62 = vld [vmem:[%s9953_s5 + $0x144] sm:$0xf]  ;;  %214 = vst [vmem:[#allocation2 + $0x13c] sm:$0xff] %v213_v60   ;;  %v229_v2 = vld [vmem:[%s9953_s5 + $0x15c] sm:$0xff]  }
  0x24   :  { %218 = vst [vmem:[#allocation2 + $0x144] sm:$0xf] %v217_v61  ;;  %220 = vst [vmem:[#allocation2 + $0x148] sm:$0xf] %v219_v62  ;;  %v225_v0 = vld [vmem:[%s9953_s5 + $0x158] sm:$0xf] }
  0x25   :  { %v227_v1 = vld [vmem:[%s9953_s5 + $0x154] sm:$0xf]  ;;  %222 = vst [vmem:[#allocation2 + $0x14c] sm:$0xff] %v221_v63   ;;  %226 = vst [vmem:[#allocation2 + $0x154] sm:$0xf] %v225_v0  ;;  %v237_v5 = vld [vmem:[%s9953_s5 + $0x16c] sm:$0xff]  }
  0x26   :  { %228 = vst [vmem:[#allocation2 + $0x158] sm:$0xf] %v227_v1  ;;  %v233_v3 = vld [vmem:[%s9953_s5 + $0x168] sm:$0xf]  ;;  %v235_v4 = vld [vmem:[%s9953_s5 + $0x164] sm:$0xf] }
  0x27   :  { %230 = vst [vmem:[#allocation2 + $0x15c] sm:$0xff] %v229_v2   ;;  %234 = vst [vmem:[#allocation2 + $0x164] sm:$0xf] %v233_v3  ;;  %v241_v6 = vld [vmem:[%s9953_s5 + $0x178] sm:$0xf]  ;;  %v245_v8 = vld [vmem:[%s9953_s5 + $0x17c] sm:$0xff]  }
  0x28   :  { %236 = vst [vmem:[#allocation2 + $0x168] sm:$0xf] %v235_v4  ;;  %v243_v7 = vld [vmem:[%s9953_s5 + $0x174] sm:$0xf]  ;;  %238 = vst [vmem:[#allocation2 + $0x16c] sm:$0xff] %v237_v5   ;;  %v253_v11 = vld [vmem:[%s9953_s5 + $0x18c] sm:$0xff]  }
  0x29   :  { %242 = vst [vmem:[#allocation2 + $0x174] sm:$0xf] %v241_v6  ;;  %244 = vst [vmem:[#allocation2 + $0x178] sm:$0xf] %v243_v7  ;;  %v249_v9 = vld [vmem:[%s9953_s5 + $0x188] sm:$0xf] }
  0x2a   :  { %v251_v10 = vld [vmem:[%s9953_s5 + $0x184] sm:$0xf]  ;;  %246 = vst [vmem:[#allocation2 + $0x17c] sm:$0xff] %v245_v8   ;;  %250 = vst [vmem:[#allocation2 + $0x184] sm:$0xf] %v249_v9  ;;  %v261_v14 = vld [vmem:[%s9953_s5 + $0x19c] sm:$0xff]  }
  0x2b   :  { %252 = vst [vmem:[#allocation2 + $0x188] sm:$0xf] %v251_v10  ;;  %v257_v12 = vld [vmem:[%s9953_s5 + $0x198] sm:$0xf]  ;;  %v259_v13 = vld [vmem:[%s9953_s5 + $0x194] sm:$0xf] }
  0x2c   :  { %254 = vst [vmem:[#allocation2 + $0x18c] sm:$0xff] %v253_v11   ;;  %258 = vst [vmem:[#allocation2 + $0x194] sm:$0xf] %v257_v12  ;;  %v265_v15 = vld [vmem:[%s9953_s5 + $0x1a8] sm:$0xf]  ;;  %v269_v17 = vld [vmem:[%s9953_s5 + $0x1ac] sm:$0xff]  }
  0x2d   :  { %260 = vst [vmem:[#allocation2 + $0x198] sm:$0xf] %v259_v13  ;;  %v267_v16 = vld [vmem:[%s9953_s5 + $0x1a4] sm:$0xf]  ;;  %262 = vst [vmem:[#allocation2 + $0x19c] sm:$0xff] %v261_v14   ;;  %v277_v20 = vld [vmem:[%s9953_s5 + $0x1bc] sm:$0xff]  }
  0x2e   :  { %266 = vst [vmem:[#allocation2 + $0x1a4] sm:$0xf] %v265_v15  ;;  %268 = vst [vmem:[#allocation2 + $0x1a8] sm:$0xf] %v267_v16  ;;  %v273_v18 = vld [vmem:[%s9953_s5 + $0x1b8] sm:$0xf] }
  0x2f   :  { %v275_v19 = vld [vmem:[%s9953_s5 + $0x1b4] sm:$0xf]  ;;  %270 = vst [vmem:[#allocation2 + $0x1ac] sm:$0xff] %v269_v17   ;;  %274 = vst [vmem:[#allocation2 + $0x1b4] sm:$0xf] %v273_v18  ;;  %v285_v23 = vld [vmem:[%s9953_s5 + $0x1cc] sm:$0xff]  }
  0x30   :  { %276 = vst [vmem:[#allocation2 + $0x1b8] sm:$0xf] %v275_v19  ;;  %v281_v21 = vld [vmem:[%s9953_s5 + $0x1c8] sm:$0xf]  ;;  %v283_v22 = vld [vmem:[%s9953_s5 + $0x1c4] sm:$0xf] }
  0x31   :  { %278 = vst [vmem:[#allocation2 + $0x1bc] sm:$0xff] %v277_v20   ;;  %282 = vst [vmem:[#allocation2 + $0x1c4] sm:$0xf] %v281_v21  ;;  %v289_v24 = vld [vmem:[%s9953_s5 + $0x1d8] sm:$0xf]  ;;  %v293_v26 = vld [vmem:[%s9953_s5 + $0x1dc] sm:$0xff]  }
  0x32   :  { %284 = vst [vmem:[#allocation2 + $0x1c8] sm:$0xf] %v283_v22  ;;  %v291_v25 = vld [vmem:[%s9953_s5 + $0x1d4] sm:$0xf]  ;;  %286 = vst [vmem:[#allocation2 + $0x1cc] sm:$0xff] %v285_v23   ;;  %v301_v29 = vld [vmem:[%s9953_s5 + $0x1ec] sm:$0xff]  }
  0x33   :  { %290 = vst [vmem:[#allocation2 + $0x1d4] sm:$0xf] %v289_v24  ;;  %292 = vst [vmem:[#allocation2 + $0x1d8] sm:$0xf] %v291_v25  ;;  %v297_v27 = vld [vmem:[%s9953_s5 + $0x1e8] sm:$0xf] }
  0x34   :  { %v299_v28 = vld [vmem:[%s9953_s5 + $0x1e4] sm:$0xf]  ;;  %294 = vst [vmem:[#allocation2 + $0x1dc] sm:$0xff] %v293_v26   ;;  %298 = vst [vmem:[#allocation2 + $0x1e4] sm:$0xf] %v297_v27 }
  0x35   :  { %300 = vst [vmem:[#allocation2 + $0x1e8] sm:$0xf] %v299_v28  ;;  %v305_v30 = vld [vmem:[%s9953_s5 + $0x1f8] sm:$0xf]  ;;  %v307_v31 = vld [vmem:[%s9953_s5 + $0x1f4] sm:$0xf] }
  0x36   :  { %302 = vst [vmem:[#allocation2 + $0x1ec] sm:$0xff] %v301_v29   ;;  %306 = vst [vmem:[#allocation2 + $0x1f4] sm:$0xf] %v305_v30  ;;  %v309_v32 = vld [vmem:[%s9953_s5 + $0x1fc] sm:$0xf] }
  0x37   :  { %308 = vst [vmem:[#allocation2 + $0x1f8] sm:$0xf] %v307_v31  ;;  %310 = vst [vmem:[#allocation2 + $0x1fc] sm:$0xf] %v309_v32 }
  0x38   :  { %597 = vsyncadd [#allocation4], 8192  ;;  %v616_v33 = vld [vmem:[%s9956_s8] sm:$0xf]  ;;  %v618_v34 = vld [vmem:[%s9956_s8 + $0x10] sm:$0xf] }
  0x39   :  { %617 = vst [vmem:[#allocation3] sm:$0xf] %v616_v33  ;;  %619 = vst [vmem:[#allocation3 + $0x4] sm:$0xf] %v618_v34  ;;  %v620_v35 = vld [vmem:[%s9956_s8 + $0x4] sm:$0xf] }
  0x3a   :  { %v622_v36 = vld [vmem:[%s9956_s8 + $0x14] sm:$0xf]  ;;  %v624_v37 = vld [vmem:[%s9956_s8 + $0x8] sm:$0xf]  ;;  %621 = vst [vmem:[#allocation3 + $0x8] sm:$0xf] %v620_v35 }
  0x3b   :  { %623 = vst [vmem:[#allocation3 + $0xc] sm:$0xf] %v622_v36  ;;  %625 = vst [vmem:[#allocation3 + $0x10] sm:$0xf] %v624_v37  ;;  %v626_v38 = vld [vmem:[%s9956_s8 + $0x18] sm:$0xf] }
  0x3c   :  { %v628_v39 = vld [vmem:[%s9956_s8 + $0xc] sm:$0xf]  ;;  %v630_v40 = vld [vmem:[%s9956_s8 + $0x1c] sm:$0xff]   ;;  %627 = vst [vmem:[#allocation3 + $0x14] sm:$0xf] %v626_v38 }
  0x3d   :  { %629 = vst [vmem:[#allocation3 + $0x18] sm:$0xf] %v628_v39  ;;  %631 = vst [vmem:[#allocation3 + $0x1c] sm:$0xff] %v630_v40   ;;  %v634_v41 = vld [vmem:[%s9956_s8 + $0x30] sm:$0xf]  ;;  %v646_v47 = vld [vmem:[%s9956_s8 + $0x3c] sm:$0xff]  }
  0x3e   :  { %v636_v42 = vld [vmem:[%s9956_s8 + $0x24] sm:$0xf]  ;;  %v638_v43 = vld [vmem:[%s9956_s8 + $0x34] sm:$0xf]  ;;  %635 = vst [vmem:[#allocation3 + $0x24] sm:$0xf] %v634_v41 }
  0x3f   :  { %637 = vst [vmem:[#allocation3 + $0x28] sm:$0xf] %v636_v42  ;;  %639 = vst [vmem:[#allocation3 + $0x2c] sm:$0xf] %v638_v43  ;;  %v640_v44 = vld [vmem:[%s9956_s8 + $0x28] sm:$0xf] }
  0x40   :  { %v642_v45 = vld [vmem:[%s9956_s8 + $0x38] sm:$0xf]  ;;  %v644_v46 = vld [vmem:[%s9956_s8 + $0x2c] sm:$0xf]  ;;  %641 = vst [vmem:[#allocation3 + $0x30] sm:$0xf] %v640_v44 }
  0x41   :  { %643 = vst [vmem:[#allocation3 + $0x34] sm:$0xf] %v642_v45  ;;  %645 = vst [vmem:[#allocation3 + $0x38] sm:$0xf] %v644_v46  ;;  %v650_v48 = vld [vmem:[%s9956_s8 + $0x50] sm:$0xf] }
  0x42   :  { %v652_v49 = vld [vmem:[%s9956_s8 + $0x44] sm:$0xf]  ;;  %647 = vst [vmem:[#allocation3 + $0x3c] sm:$0xff] %v646_v47   ;;  %651 = vst [vmem:[#allocation3 + $0x44] sm:$0xf] %v650_v48  ;;  %v662_v54 = vld [vmem:[%s9956_s8 + $0x5c] sm:$0xff]  }
  0x43   :  { %653 = vst [vmem:[#allocation3 + $0x48] sm:$0xf] %v652_v49  ;;  %v654_v50 = vld [vmem:[%s9956_s8 + $0x54] sm:$0xf]  ;;  %v656_v51 = vld [vmem:[%s9956_s8 + $0x48] sm:$0xf] }
  0x44   :  { %v658_v52 = vld [vmem:[%s9956_s8 + $0x58] sm:$0xf]  ;;  %655 = vst [vmem:[#allocation3 + $0x4c] sm:$0xf] %v654_v50  ;;  %657 = vst [vmem:[#allocation3 + $0x50] sm:$0xf] %v656_v51 }
  0x45   :  { %659 = vst [vmem:[#allocation3 + $0x54] sm:$0xf] %v658_v52  ;;  %v660_v53 = vld [vmem:[%s9956_s8 + $0x4c] sm:$0xf]  ;;  %v666_v55 = vld [vmem:[%s9956_s8 + $0x70] sm:$0xf] }
  0x46   :  { %661 = vst [vmem:[#allocation3 + $0x58] sm:$0xf] %v660_v53  ;;  %663 = vst [vmem:[#allocation3 + $0x5c] sm:$0xff] %v662_v54   ;;  %v668_v56 = vld [vmem:[%s9956_s8 + $0x64] sm:$0xf]  ;;  %v678_v61 = vld [vmem:[%s9956_s8 + $0x7c] sm:$0xff]  }
  0x47   :  { %667 = vst [vmem:[#allocation3 + $0x64] sm:$0xf] %v666_v55  ;;  %v670_v57 = vld [vmem:[%s9956_s8 + $0x74] sm:$0xf]  ;;  %v672_v58 = vld [vmem:[%s9956_s8 + $0x68] sm:$0xf] }
  0x48   :  { %669 = vst [vmem:[#allocation3 + $0x68] sm:$0xf] %v668_v56  ;;  %671 = vst [vmem:[#allocation3 + $0x6c] sm:$0xf] %v670_v57  ;;  %v674_v59 = vld [vmem:[%s9956_s8 + $0x78] sm:$0xf] }
  0x49   :  { %673 = vst [vmem:[#allocation3 + $0x70] sm:$0xf] %v672_v58  ;;  %v676_v60 = vld [vmem:[%s9956_s8 + $0x6c] sm:$0xf]  ;;  %675 = vst [vmem:[#allocation3 + $0x74] sm:$0xf] %v674_v59 }
  0x4a   :  { %677 = vst [vmem:[#allocation3 + $0x78] sm:$0xf] %v676_v60  ;;  %679 = vst [vmem:[#allocation3 + $0x7c] sm:$0xff] %v678_v61   ;;  %v682_v62 = vld [vmem:[%s9956_s8 + $0x90] sm:$0xf]  ;;  %v694_v4 = vld [vmem:[%s9956_s8 + $0x9c] sm:$0xff]  }
  0x4b   :  { %v684_v63 = vld [vmem:[%s9956_s8 + $0x84] sm:$0xf]  ;;  %v686_v0 = vld [vmem:[%s9956_s8 + $0x94] sm:$0xf]  ;;  %683 = vst [vmem:[#allocation3 + $0x84] sm:$0xf] %v682_v62 }
  0x4c   :  { %685 = vst [vmem:[#allocation3 + $0x88] sm:$0xf] %v684_v63  ;;  %687 = vst [vmem:[#allocation3 + $0x8c] sm:$0xf] %v686_v0  ;;  %v688_v1 = vld [vmem:[%s9956_s8 + $0x88] sm:$0xf] }
  0x4d   :  { %v690_v2 = vld [vmem:[%s9956_s8 + $0x98] sm:$0xf]  ;;  %v692_v3 = vld [vmem:[%s9956_s8 + $0x8c] sm:$0xf]  ;;  %689 = vst [vmem:[#allocation3 + $0x90] sm:$0xf] %v688_v1 }
  0x4e   :  { %691 = vst [vmem:[#allocation3 + $0x94] sm:$0xf] %v690_v2  ;;  %693 = vst [vmem:[#allocation3 + $0x98] sm:$0xf] %v692_v3  ;;  %v698_v5 = vld [vmem:[%s9956_s8 + $0xb0] sm:$0xf] }
  0x4f   :  { %v700_v6 = vld [vmem:[%s9956_s8 + $0xa4] sm:$0xf]  ;;  %695 = vst [vmem:[#allocation3 + $0x9c] sm:$0xff] %v694_v4   ;;  %699 = vst [vmem:[#allocation3 + $0xa4] sm:$0xf] %v698_v5  ;;  %v710_v11 = vld [vmem:[%s9956_s8 + $0xbc] sm:$0xff]  }
  0x50   :  { %701 = vst [vmem:[#allocation3 + $0xa8] sm:$0xf] %v700_v6  ;;  %v702_v7 = vld [vmem:[%s9956_s8 + $0xb4] sm:$0xf]  ;;  %v704_v8 = vld [vmem:[%s9956_s8 + $0xa8] sm:$0xf] }
  0x51   :  { %v706_v9 = vld [vmem:[%s9956_s8 + $0xb8] sm:$0xf]  ;;  %703 = vst [vmem:[#allocation3 + $0xac] sm:$0xf] %v702_v7  ;;  %705 = vst [vmem:[#allocation3 + $0xb0] sm:$0xf] %v704_v8 }
  0x52   :  { %707 = vst [vmem:[#allocation3 + $0xb4] sm:$0xf] %v706_v9  ;;  %v708_v10 = vld [vmem:[%s9956_s8 + $0xac] sm:$0xf]  ;;  %v714_v12 = vld [vmem:[%s9956_s8 + $0xd0] sm:$0xf] }
  0x53   :  { %709 = vst [vmem:[#allocation3 + $0xb8] sm:$0xf] %v708_v10  ;;  %711 = vst [vmem:[#allocation3 + $0xbc] sm:$0xff] %v710_v11   ;;  %v716_v13 = vld [vmem:[%s9956_s8 + $0xc4] sm:$0xf]  ;;  %v726_v18 = vld [vmem:[%s9956_s8 + $0xdc] sm:$0xff]  }
  0x54   :  { %715 = vst [vmem:[#allocation3 + $0xc4] sm:$0xf] %v714_v12  ;;  %v718_v14 = vld [vmem:[%s9956_s8 + $0xd4] sm:$0xf]  ;;  %v720_v15 = vld [vmem:[%s9956_s8 + $0xc8] sm:$0xf] }
  0x55   :  { %717 = vst [vmem:[#allocation3 + $0xc8] sm:$0xf] %v716_v13  ;;  %719 = vst [vmem:[#allocation3 + $0xcc] sm:$0xf] %v718_v14  ;;  %v722_v16 = vld [vmem:[%s9956_s8 + $0xd8] sm:$0xf] }
  0x56   :  { %721 = vst [vmem:[#allocation3 + $0xd0] sm:$0xf] %v720_v15  ;;  %v724_v17 = vld [vmem:[%s9956_s8 + $0xcc] sm:$0xf]  ;;  %723 = vst [vmem:[#allocation3 + $0xd4] sm:$0xf] %v722_v16 }
  0x57   :  { %725 = vst [vmem:[#allocation3 + $0xd8] sm:$0xf] %v724_v17  ;;  %727 = vst [vmem:[#allocation3 + $0xdc] sm:$0xff] %v726_v18   ;;  %v730_v19 = vld [vmem:[%s9956_s8 + $0xf0] sm:$0xf]  ;;  %v742_v25 = vld [vmem:[%s9956_s8 + $0xfc] sm:$0xff]  }
  0x58   :  { %v732_v20 = vld [vmem:[%s9956_s8 + $0xe4] sm:$0xf]  ;;  %v734_v21 = vld [vmem:[%s9956_s8 + $0xf4] sm:$0xf]  ;;  %731 = vst [vmem:[#allocation3 + $0xe4] sm:$0xf] %v730_v19 }
  0x59   :  { %733 = vst [vmem:[#allocation3 + $0xe8] sm:$0xf] %v732_v20  ;;  %735 = vst [vmem:[#allocation3 + $0xec] sm:$0xf] %v734_v21  ;;  %v736_v22 = vld [vmem:[%s9956_s8 + $0xe8] sm:$0xf] }
  0x5a   :  { %v738_v23 = vld [vmem:[%s9956_s8 + $0xf8] sm:$0xf]  ;;  %v740_v24 = vld [vmem:[%s9956_s8 + $0xec] sm:$0xf]  ;;  %737 = vst [vmem:[#allocation3 + $0xf0] sm:$0xf] %v736_v22 }
  0x5b   :  { %739 = vst [vmem:[#allocation3 + $0xf4] sm:$0xf] %v738_v23  ;;  %741 = vst [vmem:[#allocation3 + $0xf8] sm:$0xf] %v740_v24  ;;  %v746_v26 = vld [vmem:[%s9956_s8 + $0x110] sm:$0xf] }
  0x5c   :  { %v748_v27 = vld [vmem:[%s9956_s8 + $0x104] sm:$0xf]  ;;  %743 = vst [vmem:[#allocation3 + $0xfc] sm:$0xff] %v742_v25   ;;  %747 = vst [vmem:[#allocation3 + $0x104] sm:$0xf] %v746_v26  ;;  %v758_v32 = vld [vmem:[%s9956_s8 + $0x11c] sm:$0xff]  }
  0x5d   :  { %749 = vst [vmem:[#allocation3 + $0x108] sm:$0xf] %v748_v27  ;;  %v750_v28 = vld [vmem:[%s9956_s8 + $0x114] sm:$0xf]  ;;  %v752_v29 = vld [vmem:[%s9956_s8 + $0x108] sm:$0xf] }
  0x5e   :  { %v754_v30 = vld [vmem:[%s9956_s8 + $0x118] sm:$0xf]  ;;  %751 = vst [vmem:[#allocation3 + $0x10c] sm:$0xf] %v750_v28  ;;  %753 = vst [vmem:[#allocation3 + $0x110] sm:$0xf] %v752_v29 }
  0x5f   :  { %755 = vst [vmem:[#allocation3 + $0x114] sm:$0xf] %v754_v30  ;;  %v756_v31 = vld [vmem:[%s9956_s8 + $0x10c] sm:$0xf]  ;;  %v762_v33 = vld [vmem:[%s9956_s8 + $0x130] sm:$0xf] }
  0x60   :  { %757 = vst [vmem:[#allocation3 + $0x118] sm:$0xf] %v756_v31  ;;  %759 = vst [vmem:[#allocation3 + $0x11c] sm:$0xff] %v758_v32   ;;  %v764_v34 = vld [vmem:[%s9956_s8 + $0x124] sm:$0xf]  ;;  %v774_v39 = vld [vmem:[%s9956_s8 + $0x13c] sm:$0xff]  }
  0x61   :  { %763 = vst [vmem:[#allocation3 + $0x124] sm:$0xf] %v762_v33  ;;  %v766_v35 = vld [vmem:[%s9956_s8 + $0x134] sm:$0xf]  ;;  %v768_v36 = vld [vmem:[%s9956_s8 + $0x128] sm:$0xf] }
  0x62   :  { %765 = vst [vmem:[#allocation3 + $0x128] sm:$0xf] %v764_v34  ;;  %767 = vst [vmem:[#allocation3 + $0x12c] sm:$0xf] %v766_v35  ;;  %v770_v37 = vld [vmem:[%s9956_s8 + $0x138] sm:$0xf] }
  0x63   :  { %769 = vst [vmem:[#allocation3 + $0x130] sm:$0xf] %v768_v36  ;;  %v772_v38 = vld [vmem:[%s9956_s8 + $0x12c] sm:$0xf]  ;;  %771 = vst [vmem:[#allocation3 + $0x134] sm:$0xf] %v770_v37 }
  0x64   :  { %773 = vst [vmem:[#allocation3 + $0x138] sm:$0xf] %v772_v38  ;;  %775 = vst [vmem:[#allocation3 + $0x13c] sm:$0xff] %v774_v39   ;;  %v778_v40 = vld [vmem:[%s9956_s8 + $0x150] sm:$0xf]  ;;  %v790_v46 = vld [vmem:[%s9956_s8 + $0x15c] sm:$0xff]  }
  0x65   :  { %v780_v41 = vld [vmem:[%s9956_s8 + $0x144] sm:$0xf]  ;;  %v782_v42 = vld [vmem:[%s9956_s8 + $0x154] sm:$0xf]  ;;  %779 = vst [vmem:[#allocation3 + $0x144] sm:$0xf] %v778_v40 }
  0x66   :  { %781 = vst [vmem:[#allocation3 + $0x148] sm:$0xf] %v780_v41  ;;  %783 = vst [vmem:[#allocation3 + $0x14c] sm:$0xf] %v782_v42  ;;  %v784_v43 = vld [vmem:[%s9956_s8 + $0x148] sm:$0xf] }
  0x67   :  { %v786_v44 = vld [vmem:[%s9956_s8 + $0x158] sm:$0xf]  ;;  %v788_v45 = vld [vmem:[%s9956_s8 + $0x14c] sm:$0xf]  ;;  %785 = vst [vmem:[#allocation3 + $0x150] sm:$0xf] %v784_v43 }
  0x68   :  { %787 = vst [vmem:[#allocation3 + $0x154] sm:$0xf] %v786_v44  ;;  %789 = vst [vmem:[#allocation3 + $0x158] sm:$0xf] %v788_v45  ;;  %v794_v47 = vld [vmem:[%s9956_s8 + $0x170] sm:$0xf] }
  0x69   :  { %v796_v48 = vld [vmem:[%s9956_s8 + $0x164] sm:$0xf]  ;;  %791 = vst [vmem:[#allocation3 + $0x15c] sm:$0xff] %v790_v46   ;;  %795 = vst [vmem:[#allocation3 + $0x164] sm:$0xf] %v794_v47  ;;  %v806_v53 = vld [vmem:[%s9956_s8 + $0x17c] sm:$0xff]  }
  0x6a   :  { %797 = vst [vmem:[#allocation3 + $0x168] sm:$0xf] %v796_v48  ;;  %v798_v49 = vld [vmem:[%s9956_s8 + $0x174] sm:$0xf]  ;;  %v800_v50 = vld [vmem:[%s9956_s8 + $0x168] sm:$0xf] }
  0x6b   :  { %v802_v51 = vld [vmem:[%s9956_s8 + $0x178] sm:$0xf]  ;;  %799 = vst [vmem:[#allocation3 + $0x16c] sm:$0xf] %v798_v49  ;;  %801 = vst [vmem:[#allocation3 + $0x170] sm:$0xf] %v800_v50 }
  0x6c   :  { %803 = vst [vmem:[#allocation3 + $0x174] sm:$0xf] %v802_v51  ;;  %v804_v52 = vld [vmem:[%s9956_s8 + $0x16c] sm:$0xf]  ;;  %v810_v54 = vld [vmem:[%s9956_s8 + $0x190] sm:$0xf] }
  0x6d   :  { %805 = vst [vmem:[#allocation3 + $0x178] sm:$0xf] %v804_v52  ;;  %807 = vst [vmem:[#allocation3 + $0x17c] sm:$0xff] %v806_v53   ;;  %v812_v55 = vld [vmem:[%s9956_s8 + $0x184] sm:$0xf]  ;;  %v822_v60 = vld [vmem:[%s9956_s8 + $0x19c] sm:$0xff]  }
  0x6e   :  { %811 = vst [vmem:[#allocation3 + $0x184] sm:$0xf] %v810_v54  ;;  %v814_v56 = vld [vmem:[%s9956_s8 + $0x194] sm:$0xf]  ;;  %v816_v57 = vld [vmem:[%s9956_s8 + $0x188] sm:$0xf] }
  0x6f   :  { %813 = vst [vmem:[#allocation3 + $0x188] sm:$0xf] %v812_v55  ;;  %815 = vst [vmem:[#allocation3 + $0x18c] sm:$0xf] %v814_v56  ;;  %v818_v58 = vld [vmem:[%s9956_s8 + $0x198] sm:$0xf] }
  0x70   :  { %817 = vst [vmem:[#allocation3 + $0x190] sm:$0xf] %v816_v57  ;;  %v820_v59 = vld [vmem:[%s9956_s8 + $0x18c] sm:$0xf]  ;;  %819 = vst [vmem:[#allocation3 + $0x194] sm:$0xf] %v818_v58 }
  0x71   :  { %821 = vst [vmem:[#allocation3 + $0x198] sm:$0xf] %v820_v59  ;;  %823 = vst [vmem:[#allocation3 + $0x19c] sm:$0xff] %v822_v60   ;;  %v826_v61 = vld [vmem:[%s9956_s8 + $0x1b0] sm:$0xf]  ;;  %v838_v3 = vld [vmem:[%s9956_s8 + $0x1bc] sm:$0xff]  }
  0x72   :  { %v828_v62 = vld [vmem:[%s9956_s8 + $0x1a4] sm:$0xf]  ;;  %v830_v63 = vld [vmem:[%s9956_s8 + $0x1b4] sm:$0xf]  ;;  %827 = vst [vmem:[#allocation3 + $0x1a4] sm:$0xf] %v826_v61 }
  0x73   :  { %829 = vst [vmem:[#allocation3 + $0x1a8] sm:$0xf] %v828_v62  ;;  %831 = vst [vmem:[#allocation3 + $0x1ac] sm:$0xf] %v830_v63  ;;  %v832_v0 = vld [vmem:[%s9956_s8 + $0x1a8] sm:$0xf] }
  0x74   :  { %v834_v1 = vld [vmem:[%s9956_s8 + $0x1b8] sm:$0xf]  ;;  %v836_v2 = vld [vmem:[%s9956_s8 + $0x1ac] sm:$0xf]  ;;  %833 = vst [vmem:[#allocation3 + $0x1b0] sm:$0xf] %v832_v0 }
  0x75   :  { %835 = vst [vmem:[#allocation3 + $0x1b4] sm:$0xf] %v834_v1  ;;  %837 = vst [vmem:[#allocation3 + $0x1b8] sm:$0xf] %v836_v2  ;;  %v842_v4 = vld [vmem:[%s9956_s8 + $0x1d0] sm:$0xf] }
  0x76   :  { %v844_v5 = vld [vmem:[%s9956_s8 + $0x1c4] sm:$0xf]  ;;  %839 = vst [vmem:[#allocation3 + $0x1bc] sm:$0xff] %v838_v3   ;;  %843 = vst [vmem:[#allocation3 + $0x1c4] sm:$0xf] %v842_v4  ;;  %v854_v10 = vld [vmem:[%s9956_s8 + $0x1dc] sm:$0xff]  }
  0x77   :  { %845 = vst [vmem:[#allocation3 + $0x1c8] sm:$0xf] %v844_v5  ;;  %v846_v6 = vld [vmem:[%s9956_s8 + $0x1d4] sm:$0xf]  ;;  %v848_v7 = vld [vmem:[%s9956_s8 + $0x1c8] sm:$0xf] }
  0x78   :  { %v850_v8 = vld [vmem:[%s9956_s8 + $0x1d8] sm:$0xf]  ;;  %847 = vst [vmem:[#allocation3 + $0x1cc] sm:$0xf] %v846_v6  ;;  %849 = vst [vmem:[#allocation3 + $0x1d0] sm:$0xf] %v848_v7 }
  0x79   :  { %851 = vst [vmem:[#allocation3 + $0x1d4] sm:$0xf] %v850_v8  ;;  %v852_v9 = vld [vmem:[%s9956_s8 + $0x1cc] sm:$0xf]  ;;  %v858_v11 = vld [vmem:[%s9956_s8 + $0x1f0] sm:$0xf] }
  0x7a   :  { %853 = vst [vmem:[#allocation3 + $0x1d8] sm:$0xf] %v852_v9  ;;  %855 = vst [vmem:[#allocation3 + $0x1dc] sm:$0xff] %v854_v10   ;;  %v860_v12 = vld [vmem:[%s9956_s8 + $0x1e4] sm:$0xf]  ;;  %v870_v17 = vld [vmem:[%s9956_s8 + $0x1fc] sm:$0xff]  }
  0x7b   :  { %859 = vst [vmem:[#allocation3 + $0x1e4] sm:$0xf] %v858_v11  ;;  %v862_v13 = vld [vmem:[%s9956_s8 + $0x1f4] sm:$0xf]  ;;  %v864_v14 = vld [vmem:[%s9956_s8 + $0x1e8] sm:$0xf] }
  0x7c   :  { %861 = vst [vmem:[#allocation3 + $0x1e8] sm:$0xf] %v860_v12  ;;  %863 = vst [vmem:[#allocation3 + $0x1ec] sm:$0xf] %v862_v13  ;;  %v866_v15 = vld [vmem:[%s9956_s8 + $0x1f8] sm:$0xf] }
  0x7d   :  { %865 = vst [vmem:[#allocation3 + $0x1f0] sm:$0xf] %v864_v14  ;;  %v868_v16 = vld [vmem:[%s9956_s8 + $0x1ec] sm:$0xf]  ;;  %867 = vst [vmem:[#allocation3 + $0x1f4] sm:$0xf] %v866_v15 }
  0x7e   :  { %869 = vst [vmem:[#allocation3 + $0x1f8] sm:$0xf] %v868_v16  ;;  %871 = vst [vmem:[#allocation3 + $0x1fc] sm:$0xff] %v870_v17   ;;  %v874_v18 = vld [vmem:[%s9956_s8 + $0x210] sm:$0xf]  ;;  %v886_v24 = vld [vmem:[%s9956_s8 + $0x21c] sm:$0xff]  }
  0x7f   :  { %v876_v19 = vld [vmem:[%s9956_s8 + $0x204] sm:$0xf]  ;;  %v878_v20 = vld [vmem:[%s9956_s8 + $0x214] sm:$0xf]  ;;  %875 = vst [vmem:[#allocation3 + $0x204] sm:$0xf] %v874_v18 }
  0x80   :  { %877 = vst [vmem:[#allocation3 + $0x208] sm:$0xf] %v876_v19  ;;  %879 = vst [vmem:[#allocation3 + $0x20c] sm:$0xf] %v878_v20  ;;  %v880_v21 = vld [vmem:[%s9956_s8 + $0x208] sm:$0xf] }
  0x81   :  { %v882_v22 = vld [vmem:[%s9956_s8 + $0x218] sm:$0xf]  ;;  %v884_v23 = vld [vmem:[%s9956_s8 + $0x20c] sm:$0xf]  ;;  %881 = vst [vmem:[#allocation3 + $0x210] sm:$0xf] %v880_v21 }
  0x82   :  { %883 = vst [vmem:[#allocation3 + $0x214] sm:$0xf] %v882_v22  ;;  %885 = vst [vmem:[#allocation3 + $0x218] sm:$0xf] %v884_v23  ;;  %v890_v25 = vld [vmem:[%s9956_s8 + $0x230] sm:$0xf] }
  0x83   :  { %v892_v26 = vld [vmem:[%s9956_s8 + $0x224] sm:$0xf]  ;;  %887 = vst [vmem:[#allocation3 + $0x21c] sm:$0xff] %v886_v24   ;;  %891 = vst [vmem:[#allocation3 + $0x224] sm:$0xf] %v890_v25  ;;  %v902_v31 = vld [vmem:[%s9956_s8 + $0x23c] sm:$0xff]  }
  0x84   :  { %893 = vst [vmem:[#allocation3 + $0x228] sm:$0xf] %v892_v26  ;;  %v894_v27 = vld [vmem:[%s9956_s8 + $0x234] sm:$0xf]  ;;  %v896_v28 = vld [vmem:[%s9956_s8 + $0x228] sm:$0xf] }
  0x85   :  { %v898_v29 = vld [vmem:[%s9956_s8 + $0x238] sm:$0xf]  ;;  %895 = vst [vmem:[#allocation3 + $0x22c] sm:$0xf] %v894_v27  ;;  %897 = vst [vmem:[#allocation3 + $0x230] sm:$0xf] %v896_v28 }
  0x86   :  { %899 = vst [vmem:[#allocation3 + $0x234] sm:$0xf] %v898_v29  ;;  %v900_v30 = vld [vmem:[%s9956_s8 + $0x22c] sm:$0xf]  ;;  %v906_v32 = vld [vmem:[%s9956_s8 + $0x250] sm:$0xf] }
  0x87   :  { %901 = vst [vmem:[#allocation3 + $0x238] sm:$0xf] %v900_v30  ;;  %903 = vst [vmem:[#allocation3 + $0x23c] sm:$0xff] %v902_v31   ;;  %v908_v33 = vld [vmem:[%s9956_s8 + $0x244] sm:$0xf]  ;;  %v918_v38 = vld [vmem:[%s9956_s8 + $0x25c] sm:$0xff]  }
  0x88   :  { %907 = vst [vmem:[#allocation3 + $0x244] sm:$0xf] %v906_v32  ;;  %v910_v34 = vld [vmem:[%s9956_s8 + $0x254] sm:$0xf]  ;;  %v912_v35 = vld [vmem:[%s9956_s8 + $0x248] sm:$0xf] }
  0x89   :  { %909 = vst [vmem:[#allocation3 + $0x248] sm:$0xf] %v908_v33  ;;  %911 = vst [vmem:[#allocation3 + $0x24c] sm:$0xf] %v910_v34  ;;  %v914_v36 = vld [vmem:[%s9956_s8 + $0x258] sm:$0xf] }
  0x8a   :  { %913 = vst [vmem:[#allocation3 + $0x250] sm:$0xf] %v912_v35  ;;  %v916_v37 = vld [vmem:[%s9956_s8 + $0x24c] sm:$0xf]  ;;  %915 = vst [vmem:[#allocation3 + $0x254] sm:$0xf] %v914_v36 }
  0x8b   :  { %917 = vst [vmem:[#allocation3 + $0x258] sm:$0xf] %v916_v37  ;;  %919 = vst [vmem:[#allocation3 + $0x25c] sm:$0xff] %v918_v38   ;;  %v922_v39 = vld [vmem:[%s9956_s8 + $0x270] sm:$0xf]  ;;  %v934_v45 = vld [vmem:[%s9956_s8 + $0x27c] sm:$0xff]  }
  0x8c   :  { %v924_v40 = vld [vmem:[%s9956_s8 + $0x264] sm:$0xf]  ;;  %v926_v41 = vld [vmem:[%s9956_s8 + $0x274] sm:$0xf]  ;;  %923 = vst [vmem:[#allocation3 + $0x264] sm:$0xf] %v922_v39 }
  0x8d   :  { %925 = vst [vmem:[#allocation3 + $0x268] sm:$0xf] %v924_v40  ;;  %927 = vst [vmem:[#allocation3 + $0x26c] sm:$0xf] %v926_v41  ;;  %v928_v42 = vld [vmem:[%s9956_s8 + $0x268] sm:$0xf] }
  0x8e   :  { %v930_v43 = vld [vmem:[%s9956_s8 + $0x278] sm:$0xf]  ;;  %v932_v44 = vld [vmem:[%s9956_s8 + $0x26c] sm:$0xf]  ;;  %929 = vst [vmem:[#allocation3 + $0x270] sm:$0xf] %v928_v42 }
  0x8f   :  { %931 = vst [vmem:[#allocation3 + $0x274] sm:$0xf] %v930_v43  ;;  %933 = vst [vmem:[#allocation3 + $0x278] sm:$0xf] %v932_v44  ;;  %v938_v46 = vld [vmem:[%s9956_s8 + $0x290] sm:$0xf] }
  0x90   :  { %v940_v47 = vld [vmem:[%s9956_s8 + $0x284] sm:$0xf]  ;;  %935 = vst [vmem:[#allocation3 + $0x27c] sm:$0xff] %v934_v45   ;;  %939 = vst [vmem:[#allocation3 + $0x284] sm:$0xf] %v938_v46  ;;  %v950_v52 = vld [vmem:[%s9956_s8 + $0x29c] sm:$0xff]  }
  0x91   :  { %941 = vst [vmem:[#allocation3 + $0x288] sm:$0xf] %v940_v47  ;;  %v942_v48 = vld [vmem:[%s9956_s8 + $0x294] sm:$0xf]  ;;  %v944_v49 = vld [vmem:[%s9956_s8 + $0x288] sm:$0xf] }
  0x92   :  { %v946_v50 = vld [vmem:[%s9956_s8 + $0x298] sm:$0xf]  ;;  %943 = vst [vmem:[#allocation3 + $0x28c] sm:$0xf] %v942_v48  ;;  %945 = vst [vmem:[#allocation3 + $0x290] sm:$0xf] %v944_v49 }
  0x93   :  { %947 = vst [vmem:[#allocation3 + $0x294] sm:$0xf] %v946_v50  ;;  %v948_v51 = vld [vmem:[%s9956_s8 + $0x28c] sm:$0xf]  ;;  %v954_v53 = vld [vmem:[%s9956_s8 + $0x2b0] sm:$0xf] }
  0x94   :  { %949 = vst [vmem:[#allocation3 + $0x298] sm:$0xf] %v948_v51  ;;  %951 = vst [vmem:[#allocation3 + $0x29c] sm:$0xff] %v950_v52   ;;  %v956_v54 = vld [vmem:[%s9956_s8 + $0x2a4] sm:$0xf]  ;;  %v966_v59 = vld [vmem:[%s9956_s8 + $0x2bc] sm:$0xff]  }
  0x95   :  { %955 = vst [vmem:[#allocation3 + $0x2a4] sm:$0xf] %v954_v53  ;;  %v958_v55 = vld [vmem:[%s9956_s8 + $0x2b4] sm:$0xf]  ;;  %v960_v56 = vld [vmem:[%s9956_s8 + $0x2a8] sm:$0xf] }
  0x96   :  { %957 = vst [vmem:[#allocation3 + $0x2a8] sm:$0xf] %v956_v54  ;;  %959 = vst [vmem:[#allocation3 + $0x2ac] sm:$0xf] %v958_v55  ;;  %v962_v57 = vld [vmem:[%s9956_s8 + $0x2b8] sm:$0xf] }
  0x97   :  { %961 = vst [vmem:[#allocation3 + $0x2b0] sm:$0xf] %v960_v56  ;;  %v964_v58 = vld [vmem:[%s9956_s8 + $0x2ac] sm:$0xf]  ;;  %963 = vst [vmem:[#allocation3 + $0x2b4] sm:$0xf] %v962_v57 }
  0x98   :  { %965 = vst [vmem:[#allocation3 + $0x2b8] sm:$0xf] %v964_v58  ;;  %967 = vst [vmem:[#allocation3 + $0x2bc] sm:$0xff] %v966_v59   ;;  %v970_v60 = vld [vmem:[%s9956_s8 + $0x2d0] sm:$0xf]  ;;  %v982_v2 = vld [vmem:[%s9956_s8 + $0x2dc] sm:$0xff]  }
  0x99   :  { %v972_v61 = vld [vmem:[%s9956_s8 + $0x2c4] sm:$0xf]  ;;  %v974_v62 = vld [vmem:[%s9956_s8 + $0x2d4] sm:$0xf]  ;;  %971 = vst [vmem:[#allocation3 + $0x2c4] sm:$0xf] %v970_v60 }
  0x9a   :  { %973 = vst [vmem:[#allocation3 + $0x2c8] sm:$0xf] %v972_v61  ;;  %975 = vst [vmem:[#allocation3 + $0x2cc] sm:$0xf] %v974_v62  ;;  %v976_v63 = vld [vmem:[%s9956_s8 + $0x2c8] sm:$0xf] }
  0x9b   :  { %v978_v0 = vld [vmem:[%s9956_s8 + $0x2d8] sm:$0xf]  ;;  %v980_v1 = vld [vmem:[%s9956_s8 + $0x2cc] sm:$0xf]  ;;  %977 = vst [vmem:[#allocation3 + $0x2d0] sm:$0xf] %v976_v63 }
  0x9c   :  { %979 = vst [vmem:[#allocation3 + $0x2d4] sm:$0xf] %v978_v0  ;;  %981 = vst [vmem:[#allocation3 + $0x2d8] sm:$0xf] %v980_v1  ;;  %v986_v3 = vld [vmem:[%s9956_s8 + $0x2f0] sm:$0xf] }
  0x9d   :  { %v988_v4 = vld [vmem:[%s9956_s8 + $0x2e4] sm:$0xf]  ;;  %983 = vst [vmem:[#allocation3 + $0x2dc] sm:$0xff] %v982_v2   ;;  %987 = vst [vmem:[#allocation3 + $0x2e4] sm:$0xf] %v986_v3  ;;  %v998_v9 = vld [vmem:[%s9956_s8 + $0x2fc] sm:$0xff]  }
  0x9e   :  { %989 = vst [vmem:[#allocation3 + $0x2e8] sm:$0xf] %v988_v4  ;;  %v990_v5 = vld [vmem:[%s9956_s8 + $0x2f4] sm:$0xf]  ;;  %v992_v6 = vld [vmem:[%s9956_s8 + $0x2e8] sm:$0xf] }
  0x9f   :  { %v994_v7 = vld [vmem:[%s9956_s8 + $0x2f8] sm:$0xf]  ;;  %991 = vst [vmem:[#allocation3 + $0x2ec] sm:$0xf] %v990_v5  ;;  %993 = vst [vmem:[#allocation3 + $0x2f0] sm:$0xf] %v992_v6 }
  0xa0   :  { %995 = vst [vmem:[#allocation3 + $0x2f4] sm:$0xf] %v994_v7  ;;  %v996_v8 = vld [vmem:[%s9956_s8 + $0x2ec] sm:$0xf]  ;;  %v1002_v10 = vld [vmem:[%s9956_s8 + $0x310] sm:$0xf] }
  0xa1   :  { %997 = vst [vmem:[#allocation3 + $0x2f8] sm:$0xf] %v996_v8  ;;  %999 = vst [vmem:[#allocation3 + $0x2fc] sm:$0xff] %v998_v9   ;;  %v1004_v11 = vld [vmem:[%s9956_s8 + $0x304] sm:$0xf]  ;;  %v1014_v16 = vld [vmem:[%s9956_s8 + $0x31c] sm:$0xff]  }
  0xa2   :  { %1003 = vst [vmem:[#allocation3 + $0x304] sm:$0xf] %v1002_v10  ;;  %v1006_v12 = vld [vmem:[%s9956_s8 + $0x314] sm:$0xf]  ;;  %v1008_v13 = vld [vmem:[%s9956_s8 + $0x308] sm:$0xf] }
  0xa3   :  { %1005 = vst [vmem:[#allocation3 + $0x308] sm:$0xf] %v1004_v11  ;;  %1007 = vst [vmem:[#allocation3 + $0x30c] sm:$0xf] %v1006_v12  ;;  %v1010_v14 = vld [vmem:[%s9956_s8 + $0x318] sm:$0xf] }
  0xa4   :  { %1009 = vst [vmem:[#allocation3 + $0x310] sm:$0xf] %v1008_v13  ;;  %v1012_v15 = vld [vmem:[%s9956_s8 + $0x30c] sm:$0xf]  ;;  %1011 = vst [vmem:[#allocation3 + $0x314] sm:$0xf] %v1010_v14 }
  0xa5   :  { %1013 = vst [vmem:[#allocation3 + $0x318] sm:$0xf] %v1012_v15  ;;  %1015 = vst [vmem:[#allocation3 + $0x31c] sm:$0xff] %v1014_v16   ;;  %v1018_v17 = vld [vmem:[%s9956_s8 + $0x330] sm:$0xf]  ;;  %v1030_v23 = vld [vmem:[%s9956_s8 + $0x33c] sm:$0xff]  }
  0xa6   :  { %v1020_v18 = vld [vmem:[%s9956_s8 + $0x324] sm:$0xf]  ;;  %v1022_v19 = vld [vmem:[%s9956_s8 + $0x334] sm:$0xf]  ;;  %1019 = vst [vmem:[#allocation3 + $0x324] sm:$0xf] %v1018_v17 }
  0xa7   :  { %1021 = vst [vmem:[#allocation3 + $0x328] sm:$0xf] %v1020_v18  ;;  %1023 = vst [vmem:[#allocation3 + $0x32c] sm:$0xf] %v1022_v19  ;;  %v1024_v20 = vld [vmem:[%s9956_s8 + $0x328] sm:$0xf] }
  0xa8   :  { %v1026_v21 = vld [vmem:[%s9956_s8 + $0x338] sm:$0xf]  ;;  %v1028_v22 = vld [vmem:[%s9956_s8 + $0x32c] sm:$0xf]  ;;  %1025 = vst [vmem:[#allocation3 + $0x330] sm:$0xf] %v1024_v20 }
  0xa9   :  { %1027 = vst [vmem:[#allocation3 + $0x334] sm:$0xf] %v1026_v21  ;;  %1029 = vst [vmem:[#allocation3 + $0x338] sm:$0xf] %v1028_v22  ;;  %v1034_v24 = vld [vmem:[%s9956_s8 + $0x350] sm:$0xf] }
  0xaa   :  { %v1036_v25 = vld [vmem:[%s9956_s8 + $0x344] sm:$0xf]  ;;  %1031 = vst [vmem:[#allocation3 + $0x33c] sm:$0xff] %v1030_v23   ;;  %1035 = vst [vmem:[#allocation3 + $0x344] sm:$0xf] %v1034_v24  ;;  %v1046_v30 = vld [vmem:[%s9956_s8 + $0x35c] sm:$0xff]  }
  0xab   :  { %1037 = vst [vmem:[#allocation3 + $0x348] sm:$0xf] %v1036_v25  ;;  %v1038_v26 = vld [vmem:[%s9956_s8 + $0x354] sm:$0xf]  ;;  %v1040_v27 = vld [vmem:[%s9956_s8 + $0x348] sm:$0xf] }
  0xac   :  { %v1042_v28 = vld [vmem:[%s9956_s8 + $0x358] sm:$0xf]  ;;  %1039 = vst [vmem:[#allocation3 + $0x34c] sm:$0xf] %v1038_v26  ;;  %1041 = vst [vmem:[#allocation3 + $0x350] sm:$0xf] %v1040_v27 }
  0xad   :  { %1043 = vst [vmem:[#allocation3 + $0x354] sm:$0xf] %v1042_v28  ;;  %v1044_v29 = vld [vmem:[%s9956_s8 + $0x34c] sm:$0xf]  ;;  %v1050_v31 = vld [vmem:[%s9956_s8 + $0x370] sm:$0xf] }
  0xae   :  { %1045 = vst [vmem:[#allocation3 + $0x358] sm:$0xf] %v1044_v29  ;;  %1047 = vst [vmem:[#allocation3 + $0x35c] sm:$0xff] %v1046_v30   ;;  %v1052_v32 = vld [vmem:[%s9956_s8 + $0x364] sm:$0xf]  ;;  %v1062_v37 = vld [vmem:[%s9956_s8 + $0x37c] sm:$0xff]  }
  0xaf   :  { %1051 = vst [vmem:[#allocation3 + $0x364] sm:$0xf] %v1050_v31  ;;  %v1054_v33 = vld [vmem:[%s9956_s8 + $0x374] sm:$0xf]  ;;  %v1056_v34 = vld [vmem:[%s9956_s8 + $0x368] sm:$0xf] }
  0xb0   :  { %1053 = vst [vmem:[#allocation3 + $0x368] sm:$0xf] %v1052_v32  ;;  %1055 = vst [vmem:[#allocation3 + $0x36c] sm:$0xf] %v1054_v33  ;;  %v1058_v35 = vld [vmem:[%s9956_s8 + $0x378] sm:$0xf] }
  0xb1   :  { %1057 = vst [vmem:[#allocation3 + $0x370] sm:$0xf] %v1056_v34  ;;  %v1060_v36 = vld [vmem:[%s9956_s8 + $0x36c] sm:$0xf]  ;;  %1059 = vst [vmem:[#allocation3 + $0x374] sm:$0xf] %v1058_v35 }
  0xb2   :  { %1061 = vst [vmem:[#allocation3 + $0x378] sm:$0xf] %v1060_v36  ;;  %1063 = vst [vmem:[#allocation3 + $0x37c] sm:$0xff] %v1062_v37   ;;  %v1066_v38 = vld [vmem:[%s9956_s8 + $0x390] sm:$0xf]  ;;  %v1078_v44 = vld [vmem:[%s9956_s8 + $0x39c] sm:$0xff]  }
  0xb3   :  { %v1068_v39 = vld [vmem:[%s9956_s8 + $0x384] sm:$0xf]  ;;  %v1070_v40 = vld [vmem:[%s9956_s8 + $0x394] sm:$0xf]  ;;  %1067 = vst [vmem:[#allocation3 + $0x384] sm:$0xf] %v1066_v38 }
  0xb4   :  { %1069 = vst [vmem:[#allocation3 + $0x388] sm:$0xf] %v1068_v39  ;;  %1071 = vst [vmem:[#allocation3 + $0x38c] sm:$0xf] %v1070_v40  ;;  %v1072_v41 = vld [vmem:[%s9956_s8 + $0x388] sm:$0xf] }
  0xb5   :  { %v1074_v42 = vld [vmem:[%s9956_s8 + $0x398] sm:$0xf]  ;;  %v1076_v43 = vld [vmem:[%s9956_s8 + $0x38c] sm:$0xf]  ;;  %1073 = vst [vmem:[#allocation3 + $0x390] sm:$0xf] %v1072_v41 }
  0xb6   :  { %1075 = vst [vmem:[#allocation3 + $0x394] sm:$0xf] %v1074_v42  ;;  %1077 = vst [vmem:[#allocation3 + $0x398] sm:$0xf] %v1076_v43  ;;  %v1082_v45 = vld [vmem:[%s9956_s8 + $0x3b0] sm:$0xf] }
  0xb7   :  { %v1084_v46 = vld [vmem:[%s9956_s8 + $0x3a4] sm:$0xf]  ;;  %1079 = vst [vmem:[#allocation3 + $0x39c] sm:$0xff] %v1078_v44   ;;  %1083 = vst [vmem:[#allocation3 + $0x3a4] sm:$0xf] %v1082_v45  ;;  %v1094_v51 = vld [vmem:[%s9956_s8 + $0x3bc] sm:$0xff]  }
  0xb8   :  { %1085 = vst [vmem:[#allocation3 + $0x3a8] sm:$0xf] %v1084_v46  ;;  %v1086_v47 = vld [vmem:[%s9956_s8 + $0x3b4] sm:$0xf]  ;;  %v1088_v48 = vld [vmem:[%s9956_s8 + $0x3a8] sm:$0xf] }
  0xb9   :  { %v1090_v49 = vld [vmem:[%s9956_s8 + $0x3b8] sm:$0xf]  ;;  %1087 = vst [vmem:[#allocation3 + $0x3ac] sm:$0xf] %v1086_v47  ;;  %1089 = vst [vmem:[#allocation3 + $0x3b0] sm:$0xf] %v1088_v48 }
  0xba   :  { %1091 = vst [vmem:[#allocation3 + $0x3b4] sm:$0xf] %v1090_v49  ;;  %v1092_v50 = vld [vmem:[%s9956_s8 + $0x3ac] sm:$0xf]  ;;  %v1098_v52 = vld [vmem:[%s9956_s8 + $0x3d0] sm:$0xf] }
  0xbb   :  { %1093 = vst [vmem:[#allocation3 + $0x3b8] sm:$0xf] %v1092_v50  ;;  %1095 = vst [vmem:[#allocation3 + $0x3bc] sm:$0xff] %v1094_v51   ;;  %v1100_v53 = vld [vmem:[%s9956_s8 + $0x3c4] sm:$0xf]  ;;  %v1110_v58 = vld [vmem:[%s9956_s8 + $0x3dc] sm:$0xff]  }
  0xbc   :  { %1099 = vst [vmem:[#allocation3 + $0x3c4] sm:$0xf] %v1098_v52  ;;  %v1102_v54 = vld [vmem:[%s9956_s8 + $0x3d4] sm:$0xf]  ;;  %v1104_v55 = vld [vmem:[%s9956_s8 + $0x3c8] sm:$0xf] }
  0xbd   :  { %1101 = vst [vmem:[#allocation3 + $0x3c8] sm:$0xf] %v1100_v53  ;;  %1103 = vst [vmem:[#allocation3 + $0x3cc] sm:$0xf] %v1102_v54  ;;  %v1106_v56 = vld [vmem:[%s9956_s8 + $0x3d8] sm:$0xf] }
  0xbe   :  { %1105 = vst [vmem:[#allocation3 + $0x3d0] sm:$0xf] %v1104_v55  ;;  %v1108_v57 = vld [vmem:[%s9956_s8 + $0x3cc] sm:$0xf]  ;;  %1107 = vst [vmem:[#allocation3 + $0x3d4] sm:$0xf] %v1106_v56 }
  0xbf   :  { %1109 = vst [vmem:[#allocation3 + $0x3d8] sm:$0xf] %v1108_v57  ;;  %1111 = vst [vmem:[#allocation3 + $0x3dc] sm:$0xff] %v1110_v58   ;;  %v1114_v59 = vld [vmem:[%s9956_s8 + $0x3f0] sm:$0xf]  ;;  %v1126_v1 = vld [vmem:[%s9956_s8 + $0x3fc] sm:$0xff]  }
  0xc0   :  { %v1116_v60 = vld [vmem:[%s9956_s8 + $0x3e4] sm:$0xf]  ;;  %v1118_v61 = vld [vmem:[%s9956_s8 + $0x3f4] sm:$0xf]  ;;  %1115 = vst [vmem:[#allocation3 + $0x3e4] sm:$0xf] %v1114_v59 }
  0xc1   :  { %1117 = vst [vmem:[#allocation3 + $0x3e8] sm:$0xf] %v1116_v60  ;;  %1119 = vst [vmem:[#allocation3 + $0x3ec] sm:$0xf] %v1118_v61  ;;  %v1120_v62 = vld [vmem:[%s9956_s8 + $0x3e8] sm:$0xf] }
  0xc2   :  { %v1122_v63 = vld [vmem:[%s9956_s8 + $0x3f8] sm:$0xf]  ;;  %v1124_v0 = vld [vmem:[%s9956_s8 + $0x3ec] sm:$0xf]  ;;  %1121 = vst [vmem:[#allocation3 + $0x3f0] sm:$0xf] %v1120_v62 }
  0xc3   :  { %1123 = vst [vmem:[#allocation3 + $0x3f4] sm:$0xf] %v1122_v63  ;;  %1125 = vst [vmem:[#allocation3 + $0x3f8] sm:$0xf] %v1124_v0  ;;  %v1130_v2 = vld [vmem:[%s9956_s8 + $0x410] sm:$0xf] }
  0xc4   :  { %v1132_v3 = vld [vmem:[%s9956_s8 + $0x404] sm:$0xf]  ;;  %1127 = vst [vmem:[#allocation3 + $0x3fc] sm:$0xff] %v1126_v1   ;;  %1131 = vst [vmem:[#allocation3 + $0x404] sm:$0xf] %v1130_v2  ;;  %v1142_v8 = vld [vmem:[%s9956_s8 + $0x41c] sm:$0xff]  }
  0xc5   :  { %1133 = vst [vmem:[#allocation3 + $0x408] sm:$0xf] %v1132_v3  ;;  %v1134_v4 = vld [vmem:[%s9956_s8 + $0x414] sm:$0xf]  ;;  %v1136_v5 = vld [vmem:[%s9956_s8 + $0x408] sm:$0xf] }
  0xc6   :  { %v1138_v6 = vld [vmem:[%s9956_s8 + $0x418] sm:$0xf]  ;;  %1135 = vst [vmem:[#allocation3 + $0x40c] sm:$0xf] %v1134_v4  ;;  %1137 = vst [vmem:[#allocation3 + $0x410] sm:$0xf] %v1136_v5 }
  0xc7   :  { %1139 = vst [vmem:[#allocation3 + $0x414] sm:$0xf] %v1138_v6  ;;  %v1140_v7 = vld [vmem:[%s9956_s8 + $0x40c] sm:$0xf]  ;;  %v1146_v9 = vld [vmem:[%s9956_s8 + $0x430] sm:$0xf] }
  0xc8   :  { %1141 = vst [vmem:[#allocation3 + $0x418] sm:$0xf] %v1140_v7  ;;  %1143 = vst [vmem:[#allocation3 + $0x41c] sm:$0xff] %v1142_v8   ;;  %v1148_v10 = vld [vmem:[%s9956_s8 + $0x424] sm:$0xf]  ;;  %v1158_v15 = vld [vmem:[%s9956_s8 + $0x43c] sm:$0xff]  }
  0xc9   :  { %1147 = vst [vmem:[#allocation3 + $0x424] sm:$0xf] %v1146_v9  ;;  %v1150_v11 = vld [vmem:[%s9956_s8 + $0x434] sm:$0xf]  ;;  %v1152_v12 = vld [vmem:[%s9956_s8 + $0x428] sm:$0xf] }
  0xca   :  { %1149 = vst [vmem:[#allocation3 + $0x428] sm:$0xf] %v1148_v10  ;;  %1151 = vst [vmem:[#allocation3 + $0x42c] sm:$0xf] %v1150_v11  ;;  %v1154_v13 = vld [vmem:[%s9956_s8 + $0x438] sm:$0xf] }
  0xcb   :  { %1153 = vst [vmem:[#allocation3 + $0x430] sm:$0xf] %v1152_v12  ;;  %v1156_v14 = vld [vmem:[%s9956_s8 + $0x42c] sm:$0xf]  ;;  %1155 = vst [vmem:[#allocation3 + $0x434] sm:$0xf] %v1154_v13 }
  0xcc   :  { %1157 = vst [vmem:[#allocation3 + $0x438] sm:$0xf] %v1156_v14  ;;  %1159 = vst [vmem:[#allocation3 + $0x43c] sm:$0xff] %v1158_v15   ;;  %v1162_v16 = vld [vmem:[%s9956_s8 + $0x450] sm:$0xf]  ;;  %v1174_v22 = vld [vmem:[%s9956_s8 + $0x45c] sm:$0xff]  }
  0xcd   :  { %v1164_v17 = vld [vmem:[%s9956_s8 + $0x444] sm:$0xf]  ;;  %v1166_v18 = vld [vmem:[%s9956_s8 + $0x454] sm:$0xf]  ;;  %1163 = vst [vmem:[#allocation3 + $0x444] sm:$0xf] %v1162_v16 }
  0xce   :  { %1165 = vst [vmem:[#allocation3 + $0x448] sm:$0xf] %v1164_v17  ;;  %1167 = vst [vmem:[#allocation3 + $0x44c] sm:$0xf] %v1166_v18  ;;  %v1168_v19 = vld [vmem:[%s9956_s8 + $0x448] sm:$0xf] }
  0xcf   :  { %v1170_v20 = vld [vmem:[%s9956_s8 + $0x458] sm:$0xf]  ;;  %v1172_v21 = vld [vmem:[%s9956_s8 + $0x44c] sm:$0xf]  ;;  %1169 = vst [vmem:[#allocation3 + $0x450] sm:$0xf] %v1168_v19 }
  0xd0   :  { %1171 = vst [vmem:[#allocation3 + $0x454] sm:$0xf] %v1170_v20  ;;  %1173 = vst [vmem:[#allocation3 + $0x458] sm:$0xf] %v1172_v21  ;;  %v1178_v23 = vld [vmem:[%s9956_s8 + $0x470] sm:$0xf] }
  0xd1   :  { %v1180_v24 = vld [vmem:[%s9956_s8 + $0x464] sm:$0xf]  ;;  %1175 = vst [vmem:[#allocation3 + $0x45c] sm:$0xff] %v1174_v22   ;;  %1179 = vst [vmem:[#allocation3 + $0x464] sm:$0xf] %v1178_v23  ;;  %v1190_v29 = vld [vmem:[%s9956_s8 + $0x47c] sm:$0xff]  }
  0xd2   :  { %1181 = vst [vmem:[#allocation3 + $0x468] sm:$0xf] %v1180_v24  ;;  %v1182_v25 = vld [vmem:[%s9956_s8 + $0x474] sm:$0xf]  ;;  %v1184_v26 = vld [vmem:[%s9956_s8 + $0x468] sm:$0xf] }
  0xd3   :  { %v1186_v27 = vld [vmem:[%s9956_s8 + $0x478] sm:$0xf]  ;;  %1183 = vst [vmem:[#allocation3 + $0x46c] sm:$0xf] %v1182_v25  ;;  %1185 = vst [vmem:[#allocation3 + $0x470] sm:$0xf] %v1184_v26 }
  0xd4   :  { %1187 = vst [vmem:[#allocation3 + $0x474] sm:$0xf] %v1186_v27  ;;  %v1188_v28 = vld [vmem:[%s9956_s8 + $0x46c] sm:$0xf]  ;;  %v1194_v30 = vld [vmem:[%s9956_s8 + $0x490] sm:$0xf] }
  0xd5   :  { %1189 = vst [vmem:[#allocation3 + $0x478] sm:$0xf] %v1188_v28  ;;  %1191 = vst [vmem:[#allocation3 + $0x47c] sm:$0xff] %v1190_v29   ;;  %v1196_v31 = vld [vmem:[%s9956_s8 + $0x484] sm:$0xf]  ;;  %v1206_v36 = vld [vmem:[%s9956_s8 + $0x49c] sm:$0xff]  }
  0xd6   :  { %1195 = vst [vmem:[#allocation3 + $0x484] sm:$0xf] %v1194_v30  ;;  %v1198_v32 = vld [vmem:[%s9956_s8 + $0x494] sm:$0xf]  ;;  %v1200_v33 = vld [vmem:[%s9956_s8 + $0x488] sm:$0xf] }
  0xd7   :  { %1197 = vst [vmem:[#allocation3 + $0x488] sm:$0xf] %v1196_v31  ;;  %1199 = vst [vmem:[#allocation3 + $0x48c] sm:$0xf] %v1198_v32  ;;  %v1202_v34 = vld [vmem:[%s9956_s8 + $0x498] sm:$0xf] }
  0xd8   :  { %1201 = vst [vmem:[#allocation3 + $0x490] sm:$0xf] %v1200_v33  ;;  %v1204_v35 = vld [vmem:[%s9956_s8 + $0x48c] sm:$0xf]  ;;  %1203 = vst [vmem:[#allocation3 + $0x494] sm:$0xf] %v1202_v34 }
  0xd9   :  { %1205 = vst [vmem:[#allocation3 + $0x498] sm:$0xf] %v1204_v35  ;;  %1207 = vst [vmem:[#allocation3 + $0x49c] sm:$0xff] %v1206_v36   ;;  %v1210_v37 = vld [vmem:[%s9956_s8 + $0x4b0] sm:$0xf]  ;;  %v1222_v43 = vld [vmem:[%s9956_s8 + $0x4bc] sm:$0xff]  }
  0xda   :  { %v1212_v38 = vld [vmem:[%s9956_s8 + $0x4a4] sm:$0xf]  ;;  %v1214_v39 = vld [vmem:[%s9956_s8 + $0x4b4] sm:$0xf]  ;;  %1211 = vst [vmem:[#allocation3 + $0x4a4] sm:$0xf] %v1210_v37 }
  0xdb   :  { %1213 = vst [vmem:[#allocation3 + $0x4a8] sm:$0xf] %v1212_v38  ;;  %1215 = vst [vmem:[#allocation3 + $0x4ac] sm:$0xf] %v1214_v39  ;;  %v1216_v40 = vld [vmem:[%s9956_s8 + $0x4a8] sm:$0xf] }
  0xdc   :  { %v1218_v41 = vld [vmem:[%s9956_s8 + $0x4b8] sm:$0xf]  ;;  %v1220_v42 = vld [vmem:[%s9956_s8 + $0x4ac] sm:$0xf]  ;;  %1217 = vst [vmem:[#allocation3 + $0x4b0] sm:$0xf] %v1216_v40 }
  0xdd   :  { %1219 = vst [vmem:[#allocation3 + $0x4b4] sm:$0xf] %v1218_v41  ;;  %1221 = vst [vmem:[#allocation3 + $0x4b8] sm:$0xf] %v1220_v42  ;;  %v1226_v44 = vld [vmem:[%s9956_s8 + $0x4d0] sm:$0xf] }
  0xde   :  { %v1228_v45 = vld [vmem:[%s9956_s8 + $0x4c4] sm:$0xf]  ;;  %1223 = vst [vmem:[#allocation3 + $0x4bc] sm:$0xff] %v1222_v43   ;;  %1227 = vst [vmem:[#allocation3 + $0x4c4] sm:$0xf] %v1226_v44  ;;  %v1238_v50 = vld [vmem:[%s9956_s8 + $0x4dc] sm:$0xff]  }
  0xdf   :  { %1229 = vst [vmem:[#allocation3 + $0x4c8] sm:$0xf] %v1228_v45  ;;  %v1230_v46 = vld [vmem:[%s9956_s8 + $0x4d4] sm:$0xf]  ;;  %v1232_v47 = vld [vmem:[%s9956_s8 + $0x4c8] sm:$0xf] }
  0xe0   :  { %v1234_v48 = vld [vmem:[%s9956_s8 + $0x4d8] sm:$0xf]  ;;  %1231 = vst [vmem:[#allocation3 + $0x4cc] sm:$0xf] %v1230_v46  ;;  %1233 = vst [vmem:[#allocation3 + $0x4d0] sm:$0xf] %v1232_v47 }
  0xe1   :  { %1235 = vst [vmem:[#allocation3 + $0x4d4] sm:$0xf] %v1234_v48  ;;  %v1236_v49 = vld [vmem:[%s9956_s8 + $0x4cc] sm:$0xf]  ;;  %v1242_v51 = vld [vmem:[%s9956_s8 + $0x4f0] sm:$0xf] }
  0xe2   :  { %1237 = vst [vmem:[#allocation3 + $0x4d8] sm:$0xf] %v1236_v49  ;;  %1239 = vst [vmem:[#allocation3 + $0x4dc] sm:$0xff] %v1238_v50   ;;  %v1244_v52 = vld [vmem:[%s9956_s8 + $0x4e4] sm:$0xf]  ;;  %v1254_v57 = vld [vmem:[%s9956_s8 + $0x4fc] sm:$0xff]  }
  0xe3   :  { %1243 = vst [vmem:[#allocation3 + $0x4e4] sm:$0xf] %v1242_v51  ;;  %v1246_v53 = vld [vmem:[%s9956_s8 + $0x4f4] sm:$0xf]  ;;  %v1248_v54 = vld [vmem:[%s9956_s8 + $0x4e8] sm:$0xf] }
  0xe4   :  { %1245 = vst [vmem:[#allocation3 + $0x4e8] sm:$0xf] %v1244_v52  ;;  %1247 = vst [vmem:[#allocation3 + $0x4ec] sm:$0xf] %v1246_v53  ;;  %v1250_v55 = vld [vmem:[%s9956_s8 + $0x4f8] sm:$0xf] }
  0xe5   :  { %1249 = vst [vmem:[#allocation3 + $0x4f0] sm:$0xf] %v1248_v54  ;;  %v1252_v56 = vld [vmem:[%s9956_s8 + $0x4ec] sm:$0xf]  ;;  %1251 = vst [vmem:[#allocation3 + $0x4f4] sm:$0xf] %v1250_v55 }
  0xe6   :  { %1253 = vst [vmem:[#allocation3 + $0x4f8] sm:$0xf] %v1252_v56  ;;  %1255 = vst [vmem:[#allocation3 + $0x4fc] sm:$0xff] %v1254_v57   ;;  %v1258_v58 = vld [vmem:[%s9956_s8 + $0x510] sm:$0xf]  ;;  %v1270_v0 = vld [vmem:[%s9956_s8 + $0x51c] sm:$0xff]  }
  0xe7   :  { %v1260_v59 = vld [vmem:[%s9956_s8 + $0x504] sm:$0xf]  ;;  %v1262_v60 = vld [vmem:[%s9956_s8 + $0x514] sm:$0xf]  ;;  %1259 = vst [vmem:[#allocation3 + $0x504] sm:$0xf] %v1258_v58 }
  0xe8   :  { %1261 = vst [vmem:[#allocation3 + $0x508] sm:$0xf] %v1260_v59  ;;  %1263 = vst [vmem:[#allocation3 + $0x50c] sm:$0xf] %v1262_v60  ;;  %v1264_v61 = vld [vmem:[%s9956_s8 + $0x508] sm:$0xf] }
  0xe9   :  { %v1266_v62 = vld [vmem:[%s9956_s8 + $0x518] sm:$0xf]  ;;  %v1268_v63 = vld [vmem:[%s9956_s8 + $0x50c] sm:$0xf]  ;;  %1265 = vst [vmem:[#allocation3 + $0x510] sm:$0xf] %v1264_v61 }
  0xea   :  { %1267 = vst [vmem:[#allocation3 + $0x514] sm:$0xf] %v1266_v62  ;;  %1269 = vst [vmem:[#allocation3 + $0x518] sm:$0xf] %v1268_v63  ;;  %v1274_v1 = vld [vmem:[%s9956_s8 + $0x530] sm:$0xf] }
  0xeb   :  { %v1276_v2 = vld [vmem:[%s9956_s8 + $0x524] sm:$0xf]  ;;  %1271 = vst [vmem:[#allocation3 + $0x51c] sm:$0xff] %v1270_v0   ;;  %1275 = vst [vmem:[#allocation3 + $0x524] sm:$0xf] %v1274_v1  ;;  %v1286_v7 = vld [vmem:[%s9956_s8 + $0x53c] sm:$0xff]  }
  0xec   :  { %1277 = vst [vmem:[#allocation3 + $0x528] sm:$0xf] %v1276_v2  ;;  %v1278_v3 = vld [vmem:[%s9956_s8 + $0x534] sm:$0xf]  ;;  %v1280_v4 = vld [vmem:[%s9956_s8 + $0x528] sm:$0xf] }
  0xed   :  { %v1282_v5 = vld [vmem:[%s9956_s8 + $0x538] sm:$0xf]  ;;  %1279 = vst [vmem:[#allocation3 + $0x52c] sm:$0xf] %v1278_v3  ;;  %1281 = vst [vmem:[#allocation3 + $0x530] sm:$0xf] %v1280_v4 }
  0xee   :  { %1283 = vst [vmem:[#allocation3 + $0x534] sm:$0xf] %v1282_v5  ;;  %v1284_v6 = vld [vmem:[%s9956_s8 + $0x52c] sm:$0xf]  ;;  %v1290_v8 = vld [vmem:[%s9956_s8 + $0x550] sm:$0xf] }
  0xef   :  { %1285 = vst [vmem:[#allocation3 + $0x538] sm:$0xf] %v1284_v6  ;;  %1287 = vst [vmem:[#allocation3 + $0x53c] sm:$0xff] %v1286_v7   ;;  %v1292_v9 = vld [vmem:[%s9956_s8 + $0x544] sm:$0xf]  ;;  %v1302_v14 = vld [vmem:[%s9956_s8 + $0x55c] sm:$0xff]  }
  0xf0   :  { %1291 = vst [vmem:[#allocation3 + $0x544] sm:$0xf] %v1290_v8  ;;  %v1294_v10 = vld [vmem:[%s9956_s8 + $0x554] sm:$0xf]  ;;  %v1296_v11 = vld [vmem:[%s9956_s8 + $0x548] sm:$0xf] }
  0xf1   :  { %1293 = vst [vmem:[#allocation3 + $0x548] sm:$0xf] %v1292_v9  ;;  %1295 = vst [vmem:[#allocation3 + $0x54c] sm:$0xf] %v1294_v10  ;;  %v1298_v12 = vld [vmem:[%s9956_s8 + $0x558] sm:$0xf] }
  0xf2   :  { %1297 = vst [vmem:[#allocation3 + $0x550] sm:$0xf] %v1296_v11  ;;  %v1300_v13 = vld [vmem:[%s9956_s8 + $0x54c] sm:$0xf]  ;;  %1299 = vst [vmem:[#allocation3 + $0x554] sm:$0xf] %v1298_v12 }
  0xf3   :  { %1301 = vst [vmem:[#allocation3 + $0x558] sm:$0xf] %v1300_v13  ;;  %1303 = vst [vmem:[#allocation3 + $0x55c] sm:$0xff] %v1302_v14   ;;  %v1306_v15 = vld [vmem:[%s9956_s8 + $0x570] sm:$0xf]  ;;  %v1318_v21 = vld [vmem:[%s9956_s8 + $0x57c] sm:$0xff]  }
  0xf4   :  { %v1308_v16 = vld [vmem:[%s9956_s8 + $0x564] sm:$0xf]  ;;  %v1310_v17 = vld [vmem:[%s9956_s8 + $0x574] sm:$0xf]  ;;  %1307 = vst [vmem:[#allocation3 + $0x564] sm:$0xf] %v1306_v15 }
  0xf5   :  { %1309 = vst [vmem:[#allocation3 + $0x568] sm:$0xf] %v1308_v16  ;;  %1311 = vst [vmem:[#allocation3 + $0x56c] sm:$0xf] %v1310_v17  ;;  %v1312_v18 = vld [vmem:[%s9956_s8 + $0x568] sm:$0xf] }
  0xf6   :  { %v1314_v19 = vld [vmem:[%s9956_s8 + $0x578] sm:$0xf]  ;;  %v1316_v20 = vld [vmem:[%s9956_s8 + $0x56c] sm:$0xf]  ;;  %1313 = vst [vmem:[#allocation3 + $0x570] sm:$0xf] %v1312_v18 }
  0xf7   :  { %1315 = vst [vmem:[#allocation3 + $0x574] sm:$0xf] %v1314_v19  ;;  %1317 = vst [vmem:[#allocation3 + $0x578] sm:$0xf] %v1316_v20  ;;  %v1322_v22 = vld [vmem:[%s9956_s8 + $0x590] sm:$0xf] }
  0xf8   :  { %v1324_v23 = vld [vmem:[%s9956_s8 + $0x584] sm:$0xf]  ;;  %1319 = vst [vmem:[#allocation3 + $0x57c] sm:$0xff] %v1318_v21   ;;  %1323 = vst [vmem:[#allocation3 + $0x584] sm:$0xf] %v1322_v22  ;;  %v1334_v28 = vld [vmem:[%s9956_s8 + $0x59c] sm:$0xff]  }
  0xf9   :  { %1325 = vst [vmem:[#allocation3 + $0x588] sm:$0xf] %v1324_v23  ;;  %v1326_v24 = vld [vmem:[%s9956_s8 + $0x594] sm:$0xf]  ;;  %v1328_v25 = vld [vmem:[%s9956_s8 + $0x588] sm:$0xf] }
  0xfa   :  { %v1330_v26 = vld [vmem:[%s9956_s8 + $0x598] sm:$0xf]  ;;  %1327 = vst [vmem:[#allocation3 + $0x58c] sm:$0xf] %v1326_v24  ;;  %1329 = vst [vmem:[#allocation3 + $0x590] sm:$0xf] %v1328_v25 }
  0xfb   :  { %1331 = vst [vmem:[#allocation3 + $0x594] sm:$0xf] %v1330_v26  ;;  %v1332_v27 = vld [vmem:[%s9956_s8 + $0x58c] sm:$0xf]  ;;  %v1338_v29 = vld [vmem:[%s9956_s8 + $0x5b0] sm:$0xf] }
  0xfc   :  { %1333 = vst [vmem:[#allocation3 + $0x598] sm:$0xf] %v1332_v27  ;;  %1335 = vst [vmem:[#allocation3 + $0x59c] sm:$0xff] %v1334_v28   ;;  %v1340_v30 = vld [vmem:[%s9956_s8 + $0x5a4] sm:$0xf]  ;;  %v1350_v35 = vld [vmem:[%s9956_s8 + $0x5bc] sm:$0xff]  }
  0xfd   :  { %1339 = vst [vmem:[#allocation3 + $0x5a4] sm:$0xf] %v1338_v29  ;;  %v1342_v31 = vld [vmem:[%s9956_s8 + $0x5b4] sm:$0xf]  ;;  %v1344_v32 = vld [vmem:[%s9956_s8 + $0x5a8] sm:$0xf] }
  0xfe   :  { %1341 = vst [vmem:[#allocation3 + $0x5a8] sm:$0xf] %v1340_v30  ;;  %1343 = vst [vmem:[#allocation3 + $0x5ac] sm:$0xf] %v1342_v31  ;;  %v1346_v33 = vld [vmem:[%s9956_s8 + $0x5b8] sm:$0xf] }
  0xff   :  { %1345 = vst [vmem:[#allocation3 + $0x5b0] sm:$0xf] %v1344_v32  ;;  %v1348_v34 = vld [vmem:[%s9956_s8 + $0x5ac] sm:$0xf]  ;;  %1347 = vst [vmem:[#allocation3 + $0x5b4] sm:$0xf] %v1346_v33 }
 0x100   :  { %1349 = vst [vmem:[#allocation3 + $0x5b8] sm:$0xf] %v1348_v34  ;;  %1351 = vst [vmem:[#allocation3 + $0x5bc] sm:$0xff] %v1350_v35   ;;  %v1354_v36 = vld [vmem:[%s9956_s8 + $0x5d0] sm:$0xf]  ;;  %v1366_v42 = vld [vmem:[%s9956_s8 + $0x5dc] sm:$0xff]  }
 0x101   :  { %v1356_v37 = vld [vmem:[%s9956_s8 + $0x5c4] sm:$0xf]  ;;  %v1358_v38 = vld [vmem:[%s9956_s8 + $0x5d4] sm:$0xf]  ;;  %1355 = vst [vmem:[#allocation3 + $0x5c4] sm:$0xf] %v1354_v36 }
 0x102   :  { %1357 = vst [vmem:[#allocation3 + $0x5c8] sm:$0xf] %v1356_v37  ;;  %1359 = vst [vmem:[#allocation3 + $0x5cc] sm:$0xf] %v1358_v38  ;;  %v1360_v39 = vld [vmem:[%s9956_s8 + $0x5c8] sm:$0xf] }
 0x103   :  { %v1362_v40 = vld [vmem:[%s9956_s8 + $0x5d8] sm:$0xf]  ;;  %v1364_v41 = vld [vmem:[%s9956_s8 + $0x5cc] sm:$0xf]  ;;  %1361 = vst [vmem:[#allocation3 + $0x5d0] sm:$0xf] %v1360_v39 }
 0x104   :  { %1363 = vst [vmem:[#allocation3 + $0x5d4] sm:$0xf] %v1362_v40  ;;  %1365 = vst [vmem:[#allocation3 + $0x5d8] sm:$0xf] %v1364_v41  ;;  %v1370_v43 = vld [vmem:[%s9956_s8 + $0x5f0] sm:$0xf] }
 0x105   :  { %v1372_v44 = vld [vmem:[%s9956_s8 + $0x5e4] sm:$0xf]  ;;  %1367 = vst [vmem:[#allocation3 + $0x5dc] sm:$0xff] %v1366_v42   ;;  %1371 = vst [vmem:[#allocation3 + $0x5e4] sm:$0xf] %v1370_v43  ;;  %v1382_v49 = vld [vmem:[%s9956_s8 + $0x5fc] sm:$0xff]  }
 0x106   :  { %1373 = vst [vmem:[#allocation3 + $0x5e8] sm:$0xf] %v1372_v44  ;;  %v1374_v45 = vld [vmem:[%s9956_s8 + $0x5f4] sm:$0xf]  ;;  %v1376_v46 = vld [vmem:[%s9956_s8 + $0x5e8] sm:$0xf] }
 0x107   :  { %v1378_v47 = vld [vmem:[%s9956_s8 + $0x5f8] sm:$0xf]  ;;  %1375 = vst [vmem:[#allocation3 + $0x5ec] sm:$0xf] %v1374_v45  ;;  %1377 = vst [vmem:[#allocation3 + $0x5f0] sm:$0xf] %v1376_v46 }
 0x108   :  { %1379 = vst [vmem:[#allocation3 + $0x5f4] sm:$0xf] %v1378_v47  ;;  %v1380_v48 = vld [vmem:[%s9956_s8 + $0x5ec] sm:$0xf]  ;;  %v1386_v50 = vld [vmem:[%s9956_s8 + $0x610] sm:$0xf] }
 0x109   :  { %1381 = vst [vmem:[#allocation3 + $0x5f8] sm:$0xf] %v1380_v48  ;;  %1383 = vst [vmem:[#allocation3 + $0x5fc] sm:$0xff] %v1382_v49   ;;  %v1388_v51 = vld [vmem:[%s9956_s8 + $0x604] sm:$0xf]  ;;  %v1398_v56 = vld [vmem:[%s9956_s8 + $0x61c] sm:$0xff]  }
 0x10a   :  { %1387 = vst [vmem:[#allocation3 + $0x604] sm:$0xf] %v1386_v50  ;;  %v1390_v52 = vld [vmem:[%s9956_s8 + $0x614] sm:$0xf]  ;;  %v1392_v53 = vld [vmem:[%s9956_s8 + $0x608] sm:$0xf] }
 0x10b   :  { %1389 = vst [vmem:[#allocation3 + $0x608] sm:$0xf] %v1388_v51  ;;  %1391 = vst [vmem:[#allocation3 + $0x60c] sm:$0xf] %v1390_v52  ;;  %v1394_v54 = vld [vmem:[%s9956_s8 + $0x618] sm:$0xf] }
 0x10c   :  { %1393 = vst [vmem:[#allocation3 + $0x610] sm:$0xf] %v1392_v53  ;;  %v1396_v55 = vld [vmem:[%s9956_s8 + $0x60c] sm:$0xf]  ;;  %1395 = vst [vmem:[#allocation3 + $0x614] sm:$0xf] %v1394_v54 }
 0x10d   :  { %1397 = vst [vmem:[#allocation3 + $0x618] sm:$0xf] %v1396_v55  ;;  %1399 = vst [vmem:[#allocation3 + $0x61c] sm:$0xff] %v1398_v56   ;;  %v1402_v57 = vld [vmem:[%s9956_s8 + $0x630] sm:$0xf]  ;;  %v1414_v63 = vld [vmem:[%s9956_s8 + $0x63c] sm:$0xff]  }
 0x10e   :  { %v1404_v58 = vld [vmem:[%s9956_s8 + $0x624] sm:$0xf]  ;;  %v1406_v59 = vld [vmem:[%s9956_s8 + $0x634] sm:$0xf]  ;;  %1403 = vst [vmem:[#allocation3 + $0x624] sm:$0xf] %v1402_v57 }
 0x10f   :  { %1405 = vst [vmem:[#allocation3 + $0x628] sm:$0xf] %v1404_v58  ;;  %1407 = vst [vmem:[#allocation3 + $0x62c] sm:$0xf] %v1406_v59  ;;  %v1408_v60 = vld [vmem:[%s9956_s8 + $0x628] sm:$0xf] }
 0x110   :  { %v1410_v61 = vld [vmem:[%s9956_s8 + $0x638] sm:$0xf]  ;;  %v1412_v62 = vld [vmem:[%s9956_s8 + $0x62c] sm:$0xf]  ;;  %1409 = vst [vmem:[#allocation3 + $0x630] sm:$0xf] %v1408_v60 }
 0x111   :  { %1411 = vst [vmem:[#allocation3 + $0x634] sm:$0xf] %v1410_v61  ;;  %1413 = vst [vmem:[#allocation3 + $0x638] sm:$0xf] %v1412_v62  ;;  %v1418_v0 = vld [vmem:[%s9956_s8 + $0x650] sm:$0xf] }
 0x112   :  { %v1420_v1 = vld [vmem:[%s9956_s8 + $0x644] sm:$0xf]  ;;  %1415 = vst [vmem:[#allocation3 + $0x63c] sm:$0xff] %v1414_v63   ;;  %1419 = vst [vmem:[#allocation3 + $0x644] sm:$0xf] %v1418_v0  ;;  %v1430_v6 = vld [vmem:[%s9956_s8 + $0x65c] sm:$0xff]  }
 0x113   :  { %1421 = vst [vmem:[#allocation3 + $0x648] sm:$0xf] %v1420_v1  ;;  %v1422_v2 = vld [vmem:[%s9956_s8 + $0x654] sm:$0xf]  ;;  %v1424_v3 = vld [vmem:[%s9956_s8 + $0x648] sm:$0xf] }
 0x114   :  { %v1426_v4 = vld [vmem:[%s9956_s8 + $0x658] sm:$0xf]  ;;  %1423 = vst [vmem:[#allocation3 + $0x64c] sm:$0xf] %v1422_v2  ;;  %1425 = vst [vmem:[#allocation3 + $0x650] sm:$0xf] %v1424_v3 }
 0x115   :  { %1427 = vst [vmem:[#allocation3 + $0x654] sm:$0xf] %v1426_v4  ;;  %v1428_v5 = vld [vmem:[%s9956_s8 + $0x64c] sm:$0xf]  ;;  %v1434_v7 = vld [vmem:[%s9956_s8 + $0x670] sm:$0xf] }
 0x116   :  { %1429 = vst [vmem:[#allocation3 + $0x658] sm:$0xf] %v1428_v5  ;;  %1431 = vst [vmem:[#allocation3 + $0x65c] sm:$0xff] %v1430_v6   ;;  %v1436_v8 = vld [vmem:[%s9956_s8 + $0x664] sm:$0xf]  ;;  %v1446_v13 = vld [vmem:[%s9956_s8 + $0x67c] sm:$0xff]  }
 0x117   :  { %1435 = vst [vmem:[#allocation3 + $0x664] sm:$0xf] %v1434_v7  ;;  %v1438_v9 = vld [vmem:[%s9956_s8 + $0x674] sm:$0xf]  ;;  %v1440_v10 = vld [vmem:[%s9956_s8 + $0x668] sm:$0xf] }
 0x118   :  { %1437 = vst [vmem:[#allocation3 + $0x668] sm:$0xf] %v1436_v8  ;;  %1439 = vst [vmem:[#allocation3 + $0x66c] sm:$0xf] %v1438_v9  ;;  %v1442_v11 = vld [vmem:[%s9956_s8 + $0x678] sm:$0xf] }
 0x119   :  { %1441 = vst [vmem:[#allocation3 + $0x670] sm:$0xf] %v1440_v10  ;;  %v1444_v12 = vld [vmem:[%s9956_s8 + $0x66c] sm:$0xf]  ;;  %1443 = vst [vmem:[#allocation3 + $0x674] sm:$0xf] %v1442_v11 }
 0x11a   :  { %1445 = vst [vmem:[#allocation3 + $0x678] sm:$0xf] %v1444_v12  ;;  %1447 = vst [vmem:[#allocation3 + $0x67c] sm:$0xff] %v1446_v13   ;;  %v1450_v14 = vld [vmem:[%s9956_s8 + $0x690] sm:$0xf]  ;;  %v1462_v20 = vld [vmem:[%s9956_s8 + $0x69c] sm:$0xff]  }
 0x11b   :  { %v1452_v15 = vld [vmem:[%s9956_s8 + $0x684] sm:$0xf]  ;;  %v1454_v16 = vld [vmem:[%s9956_s8 + $0x694] sm:$0xf]  ;;  %1451 = vst [vmem:[#allocation3 + $0x684] sm:$0xf] %v1450_v14 }
 0x11c   :  { %1453 = vst [vmem:[#allocation3 + $0x688] sm:$0xf] %v1452_v15  ;;  %1455 = vst [vmem:[#allocation3 + $0x68c] sm:$0xf] %v1454_v16  ;;  %v1456_v17 = vld [vmem:[%s9956_s8 + $0x688] sm:$0xf] }
 0x11d   :  { %v1458_v18 = vld [vmem:[%s9956_s8 + $0x698] sm:$0xf]  ;;  %v1460_v19 = vld [vmem:[%s9956_s8 + $0x68c] sm:$0xf]  ;;  %1457 = vst [vmem:[#allocation3 + $0x690] sm:$0xf] %v1456_v17 }
 0x11e   :  { %1459 = vst [vmem:[#allocation3 + $0x694] sm:$0xf] %v1458_v18  ;;  %1461 = vst [vmem:[#allocation3 + $0x698] sm:$0xf] %v1460_v19  ;;  %v1466_v21 = vld [vmem:[%s9956_s8 + $0x6b0] sm:$0xf] }
 0x11f   :  { %v1468_v22 = vld [vmem:[%s9956_s8 + $0x6a4] sm:$0xf]  ;;  %1463 = vst [vmem:[#allocation3 + $0x69c] sm:$0xff] %v1462_v20   ;;  %1467 = vst [vmem:[#allocation3 + $0x6a4] sm:$0xf] %v1466_v21  ;;  %v1478_v27 = vld [vmem:[%s9956_s8 + $0x6bc] sm:$0xff]  }
 0x120   :  { %1469 = vst [vmem:[#allocation3 + $0x6a8] sm:$0xf] %v1468_v22  ;;  %v1470_v23 = vld [vmem:[%s9956_s8 + $0x6b4] sm:$0xf]  ;;  %v1472_v24 = vld [vmem:[%s9956_s8 + $0x6a8] sm:$0xf] }
 0x121   :  { %v1474_v25 = vld [vmem:[%s9956_s8 + $0x6b8] sm:$0xf]  ;;  %1471 = vst [vmem:[#allocation3 + $0x6ac] sm:$0xf] %v1470_v23  ;;  %1473 = vst [vmem:[#allocation3 + $0x6b0] sm:$0xf] %v1472_v24 }
 0x122   :  { %1475 = vst [vmem:[#allocation3 + $0x6b4] sm:$0xf] %v1474_v25  ;;  %v1476_v26 = vld [vmem:[%s9956_s8 + $0x6ac] sm:$0xf]  ;;  %v1482_v28 = vld [vmem:[%s9956_s8 + $0x6d0] sm:$0xf] }
 0x123   :  { %1477 = vst [vmem:[#allocation3 + $0x6b8] sm:$0xf] %v1476_v26  ;;  %1479 = vst [vmem:[#allocation3 + $0x6bc] sm:$0xff] %v1478_v27   ;;  %v1484_v29 = vld [vmem:[%s9956_s8 + $0x6c4] sm:$0xf]  ;;  %v1494_v34 = vld [vmem:[%s9956_s8 + $0x6dc] sm:$0xff]  }
 0x124   :  { %1483 = vst [vmem:[#allocation3 + $0x6c4] sm:$0xf] %v1482_v28  ;;  %v1486_v30 = vld [vmem:[%s9956_s8 + $0x6d4] sm:$0xf]  ;;  %v1488_v31 = vld [vmem:[%s9956_s8 + $0x6c8] sm:$0xf] }
 0x125   :  { %1485 = vst [vmem:[#allocation3 + $0x6c8] sm:$0xf] %v1484_v29  ;;  %1487 = vst [vmem:[#allocation3 + $0x6cc] sm:$0xf] %v1486_v30  ;;  %v1490_v32 = vld [vmem:[%s9956_s8 + $0x6d8] sm:$0xf] }
 0x126   :  { %1489 = vst [vmem:[#allocation3 + $0x6d0] sm:$0xf] %v1488_v31  ;;  %v1492_v33 = vld [vmem:[%s9956_s8 + $0x6cc] sm:$0xf]  ;;  %1491 = vst [vmem:[#allocation3 + $0x6d4] sm:$0xf] %v1490_v32 }
 0x127   :  { %1493 = vst [vmem:[#allocation3 + $0x6d8] sm:$0xf] %v1492_v33  ;;  %1495 = vst [vmem:[#allocation3 + $0x6dc] sm:$0xff] %v1494_v34   ;;  %v1498_v35 = vld [vmem:[%s9956_s8 + $0x6f0] sm:$0xf]  ;;  %v1510_v41 = vld [vmem:[%s9956_s8 + $0x6fc] sm:$0xff]  }
 0x128   :  { %v1500_v36 = vld [vmem:[%s9956_s8 + $0x6e4] sm:$0xf]  ;;  %v1502_v37 = vld [vmem:[%s9956_s8 + $0x6f4] sm:$0xf]  ;;  %1499 = vst [vmem:[#allocation3 + $0x6e4] sm:$0xf] %v1498_v35 }
 0x129   :  { %1501 = vst [vmem:[#allocation3 + $0x6e8] sm:$0xf] %v1500_v36  ;;  %1503 = vst [vmem:[#allocation3 + $0x6ec] sm:$0xf] %v1502_v37  ;;  %v1504_v38 = vld [vmem:[%s9956_s8 + $0x6e8] sm:$0xf] }
 0x12a   :  { %v1506_v39 = vld [vmem:[%s9956_s8 + $0x6f8] sm:$0xf]  ;;  %v1508_v40 = vld [vmem:[%s9956_s8 + $0x6ec] sm:$0xf]  ;;  %1505 = vst [vmem:[#allocation3 + $0x6f0] sm:$0xf] %v1504_v38 }
 0x12b   :  { %1507 = vst [vmem:[#allocation3 + $0x6f4] sm:$0xf] %v1506_v39  ;;  %1509 = vst [vmem:[#allocation3 + $0x6f8] sm:$0xf] %v1508_v40  ;;  %v1514_v42 = vld [vmem:[%s9956_s8 + $0x710] sm:$0xf] }
 0x12c   :  { %v1516_v43 = vld [vmem:[%s9956_s8 + $0x704] sm:$0xf]  ;;  %1511 = vst [vmem:[#allocation3 + $0x6fc] sm:$0xff] %v1510_v41   ;;  %1515 = vst [vmem:[#allocation3 + $0x704] sm:$0xf] %v1514_v42  ;;  %v1526_v48 = vld [vmem:[%s9956_s8 + $0x71c] sm:$0xff]  }
 0x12d   :  { %1517 = vst [vmem:[#allocation3 + $0x708] sm:$0xf] %v1516_v43  ;;  %v1518_v44 = vld [vmem:[%s9956_s8 + $0x714] sm:$0xf]  ;;  %v1520_v45 = vld [vmem:[%s9956_s8 + $0x708] sm:$0xf] }
 0x12e   :  { %v1522_v46 = vld [vmem:[%s9956_s8 + $0x718] sm:$0xf]  ;;  %1519 = vst [vmem:[#allocation3 + $0x70c] sm:$0xf] %v1518_v44  ;;  %1521 = vst [vmem:[#allocation3 + $0x710] sm:$0xf] %v1520_v45 }
 0x12f   :  { %1523 = vst [vmem:[#allocation3 + $0x714] sm:$0xf] %v1522_v46  ;;  %v1524_v47 = vld [vmem:[%s9956_s8 + $0x70c] sm:$0xf]  ;;  %v1530_v49 = vld [vmem:[%s9956_s8 + $0x730] sm:$0xf] }
 0x130   :  { %1525 = vst [vmem:[#allocation3 + $0x718] sm:$0xf] %v1524_v47  ;;  %1527 = vst [vmem:[#allocation3 + $0x71c] sm:$0xff] %v1526_v48   ;;  %v1532_v50 = vld [vmem:[%s9956_s8 + $0x724] sm:$0xf]  ;;  %v1542_v55 = vld [vmem:[%s9956_s8 + $0x73c] sm:$0xff]  }
 0x131   :  { %1531 = vst [vmem:[#allocation3 + $0x724] sm:$0xf] %v1530_v49  ;;  %v1534_v51 = vld [vmem:[%s9956_s8 + $0x734] sm:$0xf]  ;;  %v1536_v52 = vld [vmem:[%s9956_s8 + $0x728] sm:$0xf] }
 0x132   :  { %1533 = vst [vmem:[#allocation3 + $0x728] sm:$0xf] %v1532_v50  ;;  %1535 = vst [vmem:[#allocation3 + $0x72c] sm:$0xf] %v1534_v51  ;;  %v1538_v53 = vld [vmem:[%s9956_s8 + $0x738] sm:$0xf] }
 0x133   :  { %1537 = vst [vmem:[#allocation3 + $0x730] sm:$0xf] %v1536_v52  ;;  %v1540_v54 = vld [vmem:[%s9956_s8 + $0x72c] sm:$0xf]  ;;  %1539 = vst [vmem:[#allocation3 + $0x734] sm:$0xf] %v1538_v53 }
 0x134   :  { %1541 = vst [vmem:[#allocation3 + $0x738] sm:$0xf] %v1540_v54  ;;  %1543 = vst [vmem:[#allocation3 + $0x73c] sm:$0xff] %v1542_v55   ;;  %v1546_v56 = vld [vmem:[%s9956_s8 + $0x750] sm:$0xf]  ;;  %v1558_v62 = vld [vmem:[%s9956_s8 + $0x75c] sm:$0xff]  }
 0x135   :  { %v1548_v57 = vld [vmem:[%s9956_s8 + $0x744] sm:$0xf]  ;;  %v1550_v58 = vld [vmem:[%s9956_s8 + $0x754] sm:$0xf]  ;;  %1547 = vst [vmem:[#allocation3 + $0x744] sm:$0xf] %v1546_v56 }
 0x136   :  { %1549 = vst [vmem:[#allocation3 + $0x748] sm:$0xf] %v1548_v57  ;;  %1551 = vst [vmem:[#allocation3 + $0x74c] sm:$0xf] %v1550_v58  ;;  %v1552_v59 = vld [vmem:[%s9956_s8 + $0x748] sm:$0xf] }
 0x137   :  { %v1554_v60 = vld [vmem:[%s9956_s8 + $0x758] sm:$0xf]  ;;  %v1556_v61 = vld [vmem:[%s9956_s8 + $0x74c] sm:$0xf]  ;;  %1553 = vst [vmem:[#allocation3 + $0x750] sm:$0xf] %v1552_v59 }
 0x138   :  { %1555 = vst [vmem:[#allocation3 + $0x754] sm:$0xf] %v1554_v60  ;;  %1557 = vst [vmem:[#allocation3 + $0x758] sm:$0xf] %v1556_v61  ;;  %v1562_v63 = vld [vmem:[%s9956_s8 + $0x770] sm:$0xf] }
 0x139   :  { %v1564_v0 = vld [vmem:[%s9956_s8 + $0x764] sm:$0xf]  ;;  %1559 = vst [vmem:[#allocation3 + $0x75c] sm:$0xff] %v1558_v62   ;;  %1563 = vst [vmem:[#allocation3 + $0x764] sm:$0xf] %v1562_v63  ;;  %v1574_v5 = vld [vmem:[%s9956_s8 + $0x77c] sm:$0xff]  }
 0x13a   :  { %1565 = vst [vmem:[#allocation3 + $0x768] sm:$0xf] %v1564_v0  ;;  %v1566_v1 = vld [vmem:[%s9956_s8 + $0x774] sm:$0xf]  ;;  %v1568_v2 = vld [vmem:[%s9956_s8 + $0x768] sm:$0xf] }
 0x13b   :  { %v1570_v3 = vld [vmem:[%s9956_s8 + $0x778] sm:$0xf]  ;;  %1567 = vst [vmem:[#allocation3 + $0x76c] sm:$0xf] %v1566_v1  ;;  %1569 = vst [vmem:[#allocation3 + $0x770] sm:$0xf] %v1568_v2 }
 0x13c   :  { %1571 = vst [vmem:[#allocation3 + $0x774] sm:$0xf] %v1570_v3  ;;  %v1572_v4 = vld [vmem:[%s9956_s8 + $0x76c] sm:$0xf]  ;;  %v1578_v6 = vld [vmem:[%s9956_s8 + $0x790] sm:$0xf] }
 0x13d   :  { %1573 = vst [vmem:[#allocation3 + $0x778] sm:$0xf] %v1572_v4  ;;  %1575 = vst [vmem:[#allocation3 + $0x77c] sm:$0xff] %v1574_v5   ;;  %v1580_v7 = vld [vmem:[%s9956_s8 + $0x784] sm:$0xf]  ;;  %v1590_v12 = vld [vmem:[%s9956_s8 + $0x79c] sm:$0xff]  }
 0x13e   :  { %1579 = vst [vmem:[#allocation3 + $0x784] sm:$0xf] %v1578_v6  ;;  %v1582_v8 = vld [vmem:[%s9956_s8 + $0x794] sm:$0xf]  ;;  %v1584_v9 = vld [vmem:[%s9956_s8 + $0x788] sm:$0xf] }
 0x13f   :  { %1581 = vst [vmem:[#allocation3 + $0x788] sm:$0xf] %v1580_v7  ;;  %1583 = vst [vmem:[#allocation3 + $0x78c] sm:$0xf] %v1582_v8  ;;  %v1586_v10 = vld [vmem:[%s9956_s8 + $0x798] sm:$0xf] }
 0x140   :  { %1585 = vst [vmem:[#allocation3 + $0x790] sm:$0xf] %v1584_v9  ;;  %v1588_v11 = vld [vmem:[%s9956_s8 + $0x78c] sm:$0xf]  ;;  %1587 = vst [vmem:[#allocation3 + $0x794] sm:$0xf] %v1586_v10 }
 0x141   :  { %1589 = vst [vmem:[#allocation3 + $0x798] sm:$0xf] %v1588_v11  ;;  %1591 = vst [vmem:[#allocation3 + $0x79c] sm:$0xff] %v1590_v12   ;;  %v1594_v13 = vld [vmem:[%s9956_s8 + $0x7b0] sm:$0xf]  ;;  %v1606_v19 = vld [vmem:[%s9956_s8 + $0x7bc] sm:$0xff]  }
 0x142   :  { %v1596_v14 = vld [vmem:[%s9956_s8 + $0x7a4] sm:$0xf]  ;;  %v1598_v15 = vld [vmem:[%s9956_s8 + $0x7b4] sm:$0xf]  ;;  %1595 = vst [vmem:[#allocation3 + $0x7a4] sm:$0xf] %v1594_v13 }
 0x143   :  { %1597 = vst [vmem:[#allocation3 + $0x7a8] sm:$0xf] %v1596_v14  ;;  %1599 = vst [vmem:[#allocation3 + $0x7ac] sm:$0xf] %v1598_v15  ;;  %v1600_v16 = vld [vmem:[%s9956_s8 + $0x7a8] sm:$0xf] }
 0x144   :  { %v1602_v17 = vld [vmem:[%s9956_s8 + $0x7b8] sm:$0xf]  ;;  %v1604_v18 = vld [vmem:[%s9956_s8 + $0x7ac] sm:$0xf]  ;;  %1601 = vst [vmem:[#allocation3 + $0x7b0] sm:$0xf] %v1600_v16 }
 0x145   :  { %1603 = vst [vmem:[#allocation3 + $0x7b4] sm:$0xf] %v1602_v17  ;;  %1605 = vst [vmem:[#allocation3 + $0x7b8] sm:$0xf] %v1604_v18  ;;  %v1610_v20 = vld [vmem:[%s9956_s8 + $0x7d0] sm:$0xf] }
 0x146   :  { %v1612_v21 = vld [vmem:[%s9956_s8 + $0x7c4] sm:$0xf]  ;;  %1607 = vst [vmem:[#allocation3 + $0x7bc] sm:$0xff] %v1606_v19   ;;  %1611 = vst [vmem:[#allocation3 + $0x7c4] sm:$0xf] %v1610_v20  ;;  %v1622_v26 = vld [vmem:[%s9956_s8 + $0x7dc] sm:$0xff]  }
 0x147   :  { %1613 = vst [vmem:[#allocation3 + $0x7c8] sm:$0xf] %v1612_v21  ;;  %v1614_v22 = vld [vmem:[%s9956_s8 + $0x7d4] sm:$0xf]  ;;  %v1616_v23 = vld [vmem:[%s9956_s8 + $0x7c8] sm:$0xf] }
 0x148   :  { %v1618_v24 = vld [vmem:[%s9956_s8 + $0x7d8] sm:$0xf]  ;;  %1615 = vst [vmem:[#allocation3 + $0x7cc] sm:$0xf] %v1614_v22  ;;  %1617 = vst [vmem:[#allocation3 + $0x7d0] sm:$0xf] %v1616_v23 }
 0x149   :  { %1619 = vst [vmem:[#allocation3 + $0x7d4] sm:$0xf] %v1618_v24  ;;  %v1620_v25 = vld [vmem:[%s9956_s8 + $0x7cc] sm:$0xf]  ;;  %v1626_v27 = vld [vmem:[%s9956_s8 + $0x7f0] sm:$0xf] }
 0x14a   :  { %1621 = vst [vmem:[#allocation3 + $0x7d8] sm:$0xf] %v1620_v25  ;;  %1623 = vst [vmem:[#allocation3 + $0x7dc] sm:$0xff] %v1622_v26   ;;  %v1628_v28 = vld [vmem:[%s9956_s8 + $0x7e4] sm:$0xf] }
 0x14b   :  { %1627 = vst [vmem:[#allocation3 + $0x7e4] sm:$0xf] %v1626_v27  ;;  %v1630_v29 = vld [vmem:[%s9956_s8 + $0x7f4] sm:$0xf]  ;;  %v1632_v30 = vld [vmem:[%s9956_s8 + $0x7e8] sm:$0xf] }
 0x14c   :  { %1629 = vst [vmem:[#allocation3 + $0x7e8] sm:$0xf] %v1628_v28  ;;  %1631 = vst [vmem:[#allocation3 + $0x7ec] sm:$0xf] %v1630_v29  ;;  %v1634_v31 = vld [vmem:[%s9956_s8 + $0x7f8] sm:$0xf] }
 0x14d   :  { %1633 = vst [vmem:[#allocation3 + $0x7f0] sm:$0xf] %v1632_v30  ;;  %v1636_v32 = vld [vmem:[%s9956_s8 + $0x7ec] sm:$0xf]  ;;  %v1638_v33 = vld [vmem:[%s9956_s8 + $0x7fc] sm:$0xf] }
 0x14e   :  { %1635 = vst [vmem:[#allocation3 + $0x7f4] sm:$0xf] %v1634_v31  ;;  %1637 = vst [vmem:[#allocation3 + $0x7f8] sm:$0xf] %v1636_v32 }
 0x14f   :  { %1639 = vst [vmem:[#allocation3 + $0x7fc] sm:$0xf] %v1638_v33 }
 0x150   :  { %4775 = vsyncadd [#allocation4 + $0x1], 32768  ;;  %v4872_v34 = vld [vmem:[%s9949_s1] sm:$0x3]  ;;  %vm4970_vm0 = vcmask 1041408   ;;  %v4777_v37 = vld [vmem:[%s9948_s0 + $0x8] sm:$0xff] }
 0x151   :  { %v4776_v35 = vld [vmem:[%s9948_s0] sm:$0xff]  ;;  %7385 = vmatprep.subr.msk.bf16.mxu0 %vm4970_vm0, %v4872_v34  ;;  %v4972_v36 = vsel %vm4970_vm0, %v4872_v34, 0  ;;  %vm4873_vm1 = vcmask 31744   ;;  %v4778_v38 = vld [vmem:[%s9948_s0 + $0x10] sm:$0xff]  ;;  %v4779_v39 = vld [vmem:[%s9948_s0 + $0x18] sm:$0xff]  ;;  %vm5505_vm2 = vcmask 523264  }
 0x152   :  { %7288 = vmatpush3.bf16.msra.mxu0 %v4972_v36  ;;  %v4840_v40 = vpack.c.bf16 %v4777_v37, %v4776_v35  ;;  %v4841_v41 = vpack.c.bf16 %v4779_v39, %v4778_v38  ;;  %v4780_v42 = vld [vmem:[%s9948_s0 + $0x20] sm:$0xff]  ;;  %v4781_v43 = vld [vmem:[%s9948_s0 + $0x28] sm:$0xff]  ;;  %v4782_v45 = vld [vmem:[%s9948_s0 + $0x30] sm:$0xff] }
 0x153   :  { %v4842_v44 = vpack.c.bf16 %v4781_v43, %v4780_v42  ;;  %v4783_v46 = vld [vmem:[%s9948_s0 + $0x38] sm:$0xff]  ;;  %v4784_v47 = vld [vmem:[%s9948_s0 + $0x40] sm:$0xff]  ;;  %v4785_v48 = vld [vmem:[%s9948_s0 + $0x48] sm:$0xff] }
 0x154   :  { %7289 = vmatprep.mubr.msk.bf16.mxu0 %vm4873_vm1, %v4840_v40  ;;  %v4843_v49 = vpack.c.bf16 %v4783_v46, %v4782_v45  ;;  %v4844_v50 = vpack.c.bf16 %v4785_v48, %v4784_v47  ;;  %v4786_v51 = vld [vmem:[%s9948_s0 + $0x50] sm:$0xff]  ;;  %v4787_v52 = vld [vmem:[%s9948_s0 + $0x58] sm:$0xff]  ;;  %v4788_v53 = vld [vmem:[%s9948_s0 + $0x60] sm:$0xff] }
 0x155   :  { %7290 = vmatmul.mubr.msk.bf16.vlgmr.msra.gmra.mrb[0].mxu0 %vm4873_vm1, %v4841_v41  ;;  %v4789_v54 = vld [vmem:[%s9948_s0 + $0x68] sm:$0xff]  ;;  %v4845_v55 = vpack.c.bf16 %v4787_v52, %v4786_v51  ;;  %v4790_v57 = vld [vmem:[%s9948_s0 + $0x70] sm:$0xff]  ;;  %v4791_v58 = vld [vmem:[%s9948_s0 + $0x78] sm:$0xff] }
 0x156   :  { %7293 = vmatprep.mubr.msk.bf16.mxu0 %vm4873_vm1, %v4842_v44  ;;  %v4846_v56 = vpack.c.bf16 %v4789_v54, %v4788_v53  ;;  %v4792_v59 = vld [vmem:[%s9948_s0 + $0x80] sm:$0xff]  ;;  %v4793_v60 = vld [vmem:[%s9948_s0 + $0x88] sm:$0xff]  ;;  %v4847_v61 = vpack.c.bf16 %v4791_v58, %v4790_v57  ;;  %v4794_v63 = vld [vmem:[%s9948_s0 + $0x90] sm:$0xff] }
 0x157   :  { %v4848_v62 = vpack.c.bf16 %v4793_v60, %v4792_v59  ;;  %v4795_v0 = vld [vmem:[%s9948_s0 + $0x98] sm:$0xff]  ;;  %v4796_v1 = vld [vmem:[%s9948_s0 + $0xa0] sm:$0xff]  ;;  %v4797_v2 = vld [vmem:[%s9948_s0 + $0xa8] sm:$0xff] }
 0x158   :  { %v4849_v3 = vpack.c.bf16 %v4795_v0, %v4794_v63  ;;  %v4850_v4 = vpack.c.bf16 %v4797_v2, %v4796_v1  ;;  %v4798_v5 = vld [vmem:[%s9948_s0 + $0xb0] sm:$0xff]  ;;  %v4799_v6 = vld [vmem:[%s9948_s0 + $0xb8] sm:$0xff]  ;;  %v4800_v7 = vld [vmem:[%s9948_s0 + $0xc0] sm:$0xff] }
 0x159   :  { %v4801_v8 = vld [vmem:[%s9948_s0 + $0xc8] sm:$0xff]  ;;  %v4851_v9 = vpack.c.bf16 %v4799_v6, %v4798_v5  ;;  %v4802_v11 = vld [vmem:[%s9948_s0 + $0xd0] sm:$0xff]  ;;  %v4803_v12 = vld [vmem:[%s9948_s0 + $0xd8] sm:$0xff] }
 0x15a   :  { %v4852_v10 = vpack.c.bf16 %v4801_v8, %v4800_v7  ;;  %v4804_v13 = vld [vmem:[%s9948_s0 + $0xe0] sm:$0xff]  ;;  %v4805_v14 = vld [vmem:[%s9948_s0 + $0xe8] sm:$0xff]  ;;  %v4853_v15 = vpack.c.bf16 %v4803_v12, %v4802_v11  ;;  %v4806_v17 = vld [vmem:[%s9948_s0 + $0xf0] sm:$0xff] }
 0x15b   :  { %v4854_v16 = vpack.c.bf16 %v4805_v14, %v4804_v13  ;;  %v4807_v18 = vld [vmem:[%s9948_s0 + $0xf8] sm:$0xff]  ;;  %v4808_v19 = vld [vmem:[%s9948_s0 + $0x100] sm:$0xff]  ;;  %v4809_v20 = vld [vmem:[%s9948_s0 + $0x108] sm:$0xff] }
 0x15c   :  { %v4855_v21 = vpack.c.bf16 %v4807_v18, %v4806_v17  ;;  %v4856_v22 = vpack.c.bf16 %v4809_v20, %v4808_v19  ;;  %v4810_v23 = vld [vmem:[%s9948_s0 + $0x110] sm:$0xff]  ;;  %v4811_v24 = vld [vmem:[%s9948_s0 + $0x118] sm:$0xff]  ;;  %v4812_v25 = vld [vmem:[%s9948_s0 + $0x120] sm:$0xff] }
 0x15d   :  { %7294 = vmatmul.mubr.msk.bf16.gmra.mrb[4].mxu0 %vm4873_vm1, %v4843_v49  ;;  %v4813_v26 = vld [vmem:[%s9948_s0 + $0x128] sm:$0xff]  ;;  %v4857_v27 = vpack.c.bf16 %v4811_v24, %v4810_v23  ;;  %v4814_v29 = vld [vmem:[%s9948_s0 + $0x130] sm:$0xff]  ;;  %v4815_v30 = vld [vmem:[%s9948_s0 + $0x138] sm:$0xff] }
 0x15e   :  { %7297 = vmatprep.mubr.msk.bf16.mxu0 %vm4873_vm1, %v4844_v50  ;;  %v4858_v28 = vpack.c.bf16 %v4813_v26, %v4812_v25  ;;  %v4816_v31 = vld [vmem:[%s9948_s0 + $0x140] sm:$0xff]  ;;  %v4817_v32 = vld [vmem:[%s9948_s0 + $0x148] sm:$0xff]  ;;  %v4859_v33 = vpack.c.bf16 %v4815_v30, %v4814_v29  ;;  %v4818_v35 = vld [vmem:[%s9948_s0 + $0x150] sm:$0xff] }
 0x15f   :  { %v4860_v34 = vpack.c.bf16 %v4817_v32, %v4816_v31  ;;  %v4819_v36 = vld [vmem:[%s9948_s0 + $0x158] sm:$0xff]  ;;  %v4820_v37 = vld [vmem:[%s9948_s0 + $0x160] sm:$0xff]  ;;  %v4821_v38 = vld [vmem:[%s9948_s0 + $0x168] sm:$0xff] }
 0x160   :  { %v4861_v39 = vpack.c.bf16 %v4819_v36, %v4818_v35  ;;  %v4862_v40 = vpack.c.bf16 %v4821_v38, %v4820_v37  ;;  %v4822_v41 = vld [vmem:[%s9948_s0 + $0x170] sm:$0xff]  ;;  %v4823_v42 = vld [vmem:[%s9948_s0 + $0x178] sm:$0xff]  ;;  %v4824_v43 = vld [vmem:[%s9948_s0 + $0x180] sm:$0xff] }
 0x161   :  { %v4825_v44 = vld [vmem:[%s9948_s0 + $0x188] sm:$0xff]  ;;  %v4863_v45 = vpack.c.bf16 %v4823_v42, %v4822_v41  ;;  %v4826_v47 = vld [vmem:[%s9948_s0 + $0x190] sm:$0xff]  ;;  %v4827_v48 = vld [vmem:[%s9948_s0 + $0x198] sm:$0xff] }
 0x162   :  { %v4864_v46 = vpack.c.bf16 %v4825_v44, %v4824_v43  ;;  %v4828_v49 = vld [vmem:[%s9948_s0 + $0x1a0] sm:$0xff]  ;;  %v4829_v50 = vld [vmem:[%s9948_s0 + $0x1a8] sm:$0xff]  ;;  %v4865_v51 = vpack.c.bf16 %v4827_v48, %v4826_v47  ;;  %v4830_v53 = vld [vmem:[%s9948_s0 + $0x1b0] sm:$0xff] }
 0x163   :  { %v4866_v52 = vpack.c.bf16 %v4829_v50, %v4828_v49  ;;  %v4831_v54 = vld [vmem:[%s9948_s0 + $0x1b8] sm:$0xff]  ;;  %v4834_v59 = vld [vmem:[%s9948_s0 + $0x1d0] sm:$0xff]  ;;  %v7390_v5 = vld [vmem:[%s9950_s2] sm:$0xff]  }
 0x164   :  { %v4867_v57 = vpack.c.bf16 %v4831_v54, %v4830_v53  ;;  %v4835_v60 = vld [vmem:[%s9948_s0 + $0x1d8] sm:$0xff]  ;;  %v4838_v1 = vld [vmem:[%s9948_s0 + $0x1f0] sm:$0xff]  ;;  %v7391_v6 = vld [vmem:[%s9950_s2 + $0x48] sm:$0xff]  }
 0x165   :  { %7298 = vmatmul.mubr.msk.bf16.gmra.mrb[8].mxu0 %vm4873_vm1, %v4845_v55  ;;  %v4832_v55 = vld [vmem:[%s9948_s0 + $0x1c0] sm:$0xff]  ;;  %v4869_v63 = vpack.c.bf16 %v4835_v60, %v4834_v59  ;;  %v4839_v2 = vld [vmem:[%s9948_s0 + $0x1f8] sm:$0xff]  ;;  %v7392_v7 = vld [vmem:[%s9950_s2 + $0x8] sm:$0xff]  }
 0x166   :  { %7301 = vmatprep.mubr.msk.bf16.mxu0 %vm4873_vm1, %v4846_v56  ;;  %v4833_v56 = vld [vmem:[%s9948_s0 + $0x1c8] sm:$0xff]  ;;  %v7394_v12 = vld [vmem:[%s9950_s2 + $0x10] sm:$0xff]   ;;  %v7396_v23 = vld [vmem:[%s9950_s2 + $0x18] sm:$0xff]  }
 0x167   :  { %v4868_v58 = vpack.c.bf16 %v4833_v56, %v4832_v55  ;;  %v7397_v24 = vld [vmem:[%s9950_s2 + $0x60] sm:$0xff]   ;;  %v7401_v42 = vld [vmem:[%s9950_s2 + $0x70] sm:$0xff]  }
 0x168   :  { %v7398_v30 = vld [vmem:[%s9950_s2 + $0x20] sm:$0xff]   ;;  %v7402_v48 = vld [vmem:[%s9950_s2 + $0x30] sm:$0xff]  }
 0x16d   :  { %7302 = vmatmul.mubr.msk.bf16.gmra.mrb[12].mxu0 %vm4873_vm1, %v4847_v61  ;;  %v4836_v61 = vld [vmem:[%s9948_s0 + $0x1e0] sm:$0xff] }
 0x16e   :  { %7305 = vmatprep.mubr.msk.bf16.mxu0 %vm4873_vm1, %v4848_v62  ;;  %v4837_v62 = vld [vmem:[%s9948_s0 + $0x1e8] sm:$0xff] }
 0x16f   :  { %v4870_v0 = vpack.c.bf16 %v4837_v62, %v4836_v61 }
 0x175   :  { %7306 = vmatmul.mubr.msk.bf16.gmra.mrb[16].mxu0 %vm4873_vm1, %v4849_v3  ;;  %v4871_v3 = vpack.c.bf16 %v4839_v2, %v4838_v1 }
 0x176   :  { %7309 = vmatprep.mubr.msk.bf16.mxu0 %vm4873_vm1, %v4850_v4  ;;  %v7389_v4 = vld [vmem:[%s9950_s2 + $0x40] sm:$0xff]  }
 0x177   :  { %7223 = vmatprep.subr.bf16.mxu0 %v7389_v4 }
 0x178   :  { %7224 = vmatpush3.bf16.msra.mxu0 %v7390_v5 }
 0x179   :  { %7225 = vmatprep.subr.bf16.mxu0 %v7391_v6 }
 0x17c   :  { %7226 = vmatpush3.bf16.msra.mxu0 %v7392_v7 }
 0x17d   :  { %7310 = vmatmul.mubr.msk.bf16.gmra.mrb[20].mxu0 %vm4873_vm1, %v4851_v9  ;;  %v7393_v9 = vld [vmem:[%s9950_s2 + $0x50] sm:$0xff]  }
 0x17e   :  { %7313 = vmatprep.mubr.msk.bf16.mxu0 %vm4873_vm1, %v4852_v10  ;;  %7227 = vmatprep.subr.bf16.mxu0 %v7393_v9 }
 0x180   :  { %7228 = vmatpush3.bf16.msra.mxu0 %v7394_v12 }
 0x185   :  { %7314 = vmatmul.mubr.msk.bf16.gmra.mrb[24].mxu0 %vm4873_vm1, %v4853_v15 }
 0x186   :  { %7317 = vmatprep.mubr.msk.bf16.mxu0 %vm4873_vm1, %v4854_v16 }
 0x18d   :  { %7318 = vmatmul.mubr.msk.bf16.gmra.mrb[28].mxu0 %vm4873_vm1, %v4855_v21 }
 0x18e   :  { %7321 = vmatprep.mubr.msk.bf16.mxu0 %vm4873_vm1, %v4856_v22  ;;  %v7395_v22 = vld [vmem:[%s9950_s2 + $0x58] sm:$0xff]  }
 0x18f   :  { %7229 = vmatprep.subr.bf16.mxu0 %v7395_v22 }
 0x190   :  { %7230 = vmatpush3.bf16.msra.mxu0 %v7396_v23 }
 0x191   :  { %7231 = vmatprep.subr.bf16.mxu0 %v7397_v24 }
 0x194   :  { %7232 = vmatpush3.bf16.msra.mxu0 %v7398_v30 }
 0x195   :  { %7322 = vmatmul.mubr.msk.bf16.gmra.mrb[32].mxu0 %vm4873_vm1, %v4857_v27 }
 0x196   :  { %7325 = vmatprep.mubr.msk.bf16.mxu0 %vm4873_vm1, %v4858_v28 }
 0x19d   :  { %7326 = vmatmul.mubr.msk.bf16.gmra.mrb[36].mxu0 %vm4873_vm1, %v4859_v33  ;;  %v7399_v33 = vld [vmem:[%s9950_s2 + $0x68] sm:$0xff]  }
 0x19e   :  { %7329 = vmatprep.mubr.msk.bf16.mxu0 %vm4873_vm1, %v4860_v34  ;;  %7233 = vmatprep.subr.bf16.mxu0 %v7399_v33 }
 0x1a5   :  { %7330 = vmatmul.mubr.msk.bf16.gmra.mrb[40].mxu0 %vm4873_vm1, %v4861_v39  ;;  %v7400_v39 = vld [vmem:[%s9950_s2 + $0x28] sm:$0xff]  }
 0x1a6   :  { %7333 = vmatprep.mubr.msk.bf16.mxu0 %vm4873_vm1, %v4862_v40  ;;  %7234 = vmatpush3.bf16.msra.mxu0 %v7400_v39 }
 0x1a7   :  { %7235 = vmatprep.subr.bf16.mxu0 %v7401_v42 }
 0x1aa   :  { %7236 = vmatpush3.bf16.msra.mxu0 %v7402_v48 }
 0x1ad   :  { %7334 = vmatmul.mubr.msk.bf16.gmra.mrb[44].mxu0 %vm4873_vm1, %v4863_v45 }
 0x1ae   :  { %7337 = vmatprep.mubr.msk.bf16.mxu0 %vm4873_vm1, %v4864_v46 }
 0x1b5   :  { %7338 = vmatmul.mubr.msk.bf16.gmra.mrb[48].mxu0 %vm4873_vm1, %v4865_v51  ;;  %v7403_v51 = vld [vmem:[%s9950_s2 + $0x78] sm:$0xff]  }
 0x1b6   :  { %7341 = vmatprep.mubr.msk.bf16.mxu0 %vm4873_vm1, %v4866_v52  ;;  %7237 = vmatprep.subr.bf16.mxu0 %v7403_v51 }
 0x1bd   :  { %7342 = vmatmul.mubr.msk.bf16.gmra.mrb[52].mxu0 %vm4873_vm1, %v4867_v57  ;;  %v7404_v57 = vld [vmem:[%s9950_s2 + $0x38] sm:$0xff]   ;;  %s7428_s2 = smov 64  }
 0x1be   :  { %7345 = vmatprep.mubr.msk.bf16.mxu0 %vm4873_vm1, %v4868_v58  ;;  %7238 = vmatpush3.bf16.msra.mxu0 %v7404_v57 }
 0x1c5   :  { %7346 = vmatmul.mubr.msk.bf16.gmra.mrb[56].mxu0 %vm4873_vm1, %v4869_v63 }
 0x1c6   :  { %7349 = vmatprep.mubr.msk.bf16.mxu0 %vm4873_vm1, %v4870_v0 }
 0x1cd   :  { %7350 = vmatmul.mubr.msk.bf16.gmra.mrb[60].mxu0 %vm4873_vm1, %v4871_v3 }
 0x228   :  { %v7291_v8 = vpop.f32.mrb[0].mxu0 }
 0x229   :  { %v5265_v10 = vmul.f32 0.2, %v7291_v8  ;;  %v5008_v11 = vpop.f32.mrb[1].mxu0 }
 0x22a   :  { %v5263_v13 = vmul.f32 0.2, %v5008_v11  ;;  %v7292_v14 = vpop.f32.mrb[2].mxu0 }
 0x22b   :  { %v5266_v15 = vmul.f32 0.2, %v7292_v14  ;;  %v5011_v16 = vpop.f32.mrb[3].mxu0  ;;  %v5329_v18 = vmax.f32 %v7291_v8, %v5265_v10 }
 0x22c   :  { %v5264_v17 = vmul.f32 0.2, %v5011_v16  ;;  %v5327_v20 = vmax.f32 %v5008_v11, %v5263_v13 }
 0x22d   :  { %v5330_v19 = vmax.f32 %v7292_v14, %v5266_v15 }
 0x22e   :  { %v5328_v21 = vmax.f32 %v5011_v16, %v5264_v17 }
 0x22f   :  { %v9388_v25 = vpack.c.bf16 %v5330_v19, %v5329_v18 }
 0x230   :  { %v9390_v26 = vpack.c.bf16 %v5328_v21, %v5327_v20  ;;  %v7295_v27 = vpop.f32.mrb[4].mxu0 }
 0x231   :  { %v5269_v28 = vmul.f32 0.2, %v7295_v27  ;;  %v5024_v29 = vpop.f32.mrb[5].mxu0 }
 0x232   :  { %v5267_v31 = vmul.f32 0.2, %v5024_v29  ;;  %v7296_v32 = vpop.f32.mrb[6].mxu0 }
 0x233   :  { %v5270_v34 = vmul.f32 0.2, %v7296_v32  ;;  %v5027_v35 = vpop.f32.mrb[7].mxu0  ;;  %v5333_v37 = vmax.f32 %v7295_v27, %v5269_v28 }
 0x234   :  { %v5268_v36 = vmul.f32 0.2, %v5027_v35  ;;  %v5331_v40 = vmax.f32 %v5024_v29, %v5267_v31 }
 0x235   :  { %v5334_v38 = vmax.f32 %v7296_v32, %v5270_v34 }
 0x236   :  { %v5332_v41 = vmax.f32 %v5027_v35, %v5268_v36 }
 0x237   :  { %v9404_v43 = vpack.c.bf16 %v5334_v38, %v5333_v37 }
 0x238   :  { %v9406_v44 = vpack.c.bf16 %v5332_v41, %v5331_v40  ;;  %v7299_v45 = vpop.f32.mrb[8].mxu0 }
 0x239   :  { %v5273_v46 = vmul.f32 0.2, %v7299_v45  ;;  %v5040_v47 = vpop.f32.mrb[9].mxu0 }
 0x23a   :  { %v5271_v49 = vmul.f32 0.2, %v5040_v47  ;;  %v7300_v50 = vpop.f32.mrb[10].mxu0 }
 0x23b   :  { %v5274_v52 = vmul.f32 0.2, %v7300_v50  ;;  %v5043_v53 = vpop.f32.mrb[11].mxu0  ;;  %v5337_v55 = vmax.f32 %v7299_v45, %v5273_v46 }
 0x23c   :  { %v5272_v54 = vmul.f32 0.2, %v5043_v53  ;;  %v5335_v58 = vmax.f32 %v5040_v47, %v5271_v49 }
 0x23d   :  { %v5338_v56 = vmax.f32 %v7300_v50, %v5274_v52 }
 0x23e   :  { %v5336_v59 = vmax.f32 %v5043_v53, %v5272_v54 }
 0x23f   :  { %v9417_v60 = vpack.c.bf16 %v5338_v56, %v5337_v55 }
 0x240   :  { %v9419_v61 = vpack.c.bf16 %v5336_v59, %v5335_v58  ;;  %v7303_v62 = vpop.f32.mrb[12].mxu0 }
 0x241   :  { %v5277_v63 = vmul.f32 0.2, %v7303_v62  ;;  %v5056_v0 = vpop.f32.mrb[13].mxu0 }
 0x242   :  { %v5275_v1 = vmul.f32 0.2, %v5056_v0  ;;  %v7304_v2 = vpop.f32.mrb[14].mxu0 }
 0x243   :  { %v5278_v3 = vmul.f32 0.2, %v7304_v2  ;;  %v5059_v4 = vpop.f32.mrb[15].mxu0  ;;  %v5341_v6 = vmax.f32 %v7303_v62, %v5277_v63 }
 0x244   :  { %v5276_v5 = vmul.f32 0.2, %v5059_v4  ;;  %v5339_v8 = vmax.f32 %v5056_v0, %v5275_v1 }
 0x245   :  { %v5342_v7 = vmax.f32 %v7304_v2, %v5278_v3 }
 0x246   :  { %v5340_v9 = vmax.f32 %v5059_v4, %v5276_v5 }
 0x247   :  { %v9421_v10 = vpack.c.bf16 %v5342_v7, %v5341_v6 }
 0x248   :  { %v9423_v11 = vpack.c.bf16 %v5340_v9, %v5339_v8  ;;  %v7307_v12 = vpop.f32.mrb[16].mxu0 }
 0x249   :  { %v5281_v13 = vmul.f32 0.2, %v7307_v12  ;;  %v5072_v14 = vpop.f32.mrb[17].mxu0 }
 0x24a   :  { %v5279_v15 = vmul.f32 0.2, %v5072_v14  ;;  %v7308_v16 = vpop.f32.mrb[18].mxu0 }
 0x24b   :  { %v5282_v17 = vmul.f32 0.2, %v7308_v16  ;;  %v5075_v18 = vpop.f32.mrb[19].mxu0  ;;  %v5345_v20 = vmax.f32 %v7307_v12, %v5281_v13 }
 0x24c   :  { %v5280_v19 = vmul.f32 0.2, %v5075_v18  ;;  %v5343_v22 = vmax.f32 %v5072_v14, %v5279_v15 }
 0x24d   :  { %v5346_v21 = vmax.f32 %v7308_v16, %v5282_v17 }
 0x24e   :  { %v5344_v23 = vmax.f32 %v5075_v18, %v5280_v19 }
 0x24f   :  { %v9425_v24 = vpack.c.bf16 %v5346_v21, %v5345_v20 }
 0x250   :  { %v9427_v27 = vpack.c.bf16 %v5344_v23, %v5343_v22  ;;  %v7311_v28 = vpop.f32.mrb[20].mxu0 }
 0x251   :  { %v5285_v29 = vmul.f32 0.2, %v7311_v28  ;;  %v5088_v30 = vpop.f32.mrb[21].mxu0 }
 0x252   :  { %v5283_v31 = vmul.f32 0.2, %v5088_v30  ;;  %v7312_v32 = vpop.f32.mrb[22].mxu0 }
 0x253   :  { %v5286_v33 = vmul.f32 0.2, %v7312_v32  ;;  %v5091_v34 = vpop.f32.mrb[23].mxu0  ;;  %v5349_v36 = vmax.f32 %v7311_v28, %v5285_v29 }
 0x254   :  { %v5284_v35 = vmul.f32 0.2, %v5091_v34  ;;  %v5347_v38 = vmax.f32 %v5088_v30, %v5283_v31 }
 0x255   :  { %v5350_v37 = vmax.f32 %v7312_v32, %v5286_v33 }
 0x256   :  { %v5348_v39 = vmax.f32 %v5091_v34, %v5284_v35 }
 0x257   :  { %v9429_v40 = vpack.c.bf16 %v5350_v37, %v5349_v36 }
 0x258   :  { %v9431_v41 = vpack.c.bf16 %v5348_v39, %v5347_v38  ;;  %v7315_v42 = vpop.f32.mrb[24].mxu0 }
 0x259   :  { %v5289_v45 = vmul.f32 0.2, %v7315_v42  ;;  %v5104_v46 = vpop.f32.mrb[25].mxu0 }
 0x25a   :  { %v5287_v47 = vmul.f32 0.2, %v5104_v46  ;;  %v7316_v48 = vpop.f32.mrb[26].mxu0 }
 0x25b   :  { %v5290_v49 = vmul.f32 0.2, %v7316_v48  ;;  %v5107_v50 = vpop.f32.mrb[27].mxu0  ;;  %v5353_v52 = vmax.f32 %v7315_v42, %v5289_v45 }
 0x25c   :  { %v5288_v51 = vmul.f32 0.2, %v5107_v50  ;;  %v5351_v54 = vmax.f32 %v5104_v46, %v5287_v47 }
 0x25d   :  { %v5354_v53 = vmax.f32 %v7316_v48, %v5290_v49 }
 0x25e   :  { %v5352_v55 = vmax.f32 %v5107_v50, %v5288_v51 }
 0x25f   :  { %v9433_v56 = vpack.c.bf16 %v5354_v53, %v5353_v52 }
 0x260   :  { %v9435_v57 = vpack.c.bf16 %v5352_v55, %v5351_v54  ;;  %v7319_v58 = vpop.f32.mrb[28].mxu0 }
 0x261   :  { %v5293_v59 = vmul.f32 0.2, %v7319_v58  ;;  %v5120_v62 = vpop.f32.mrb[29].mxu0 }
 0x262   :  { %v5291_v63 = vmul.f32 0.2, %v5120_v62  ;;  %v7320_v0 = vpop.f32.mrb[30].mxu0 }
 0x263   :  { %v5294_v1 = vmul.f32 0.2, %v7320_v0  ;;  %v5123_v2 = vpop.f32.mrb[31].mxu0  ;;  %v5357_v4 = vmax.f32 %v7319_v58, %v5293_v59 }
 0x264   :  { %v5292_v3 = vmul.f32 0.2, %v5123_v2  ;;  %v5355_v6 = vmax.f32 %v5120_v62, %v5291_v63 }
 0x265   :  { %v5358_v5 = vmax.f32 %v7320_v0, %v5294_v1 }
 0x266   :  { %v5356_v7 = vmax.f32 %v5123_v2, %v5292_v3 }
 0x267   :  { %v9437_v8 = vpack.c.bf16 %v5358_v5, %v5357_v4 }
 0x268   :  { %v9439_v9 = vpack.c.bf16 %v5356_v7, %v5355_v6  ;;  %v7323_v12 = vpop.f32.mrb[32].mxu0 }
 0x269   :  { %v5297_v13 = vmul.f32 0.2, %v7323_v12  ;;  %v5136_v14 = vpop.f32.mrb[33].mxu0 }
 0x26a   :  { %v5295_v15 = vmul.f32 0.2, %v5136_v14  ;;  %v7324_v16 = vpop.f32.mrb[34].mxu0 }
 0x26b   :  { %v5298_v17 = vmul.f32 0.2, %v7324_v16  ;;  %v5139_v18 = vpop.f32.mrb[35].mxu0  ;;  %v5361_v20 = vmax.f32 %v7323_v12, %v5297_v13 }
 0x26c   :  { %v5296_v19 = vmul.f32 0.2, %v5139_v18  ;;  %v5359_v22 = vmax.f32 %v5136_v14, %v5295_v15 }
 0x26d   :  { %v5362_v21 = vmax.f32 %v7324_v16, %v5298_v17 }
 0x26e   :  { %v5360_v23 = vmax.f32 %v5139_v18, %v5296_v19 }
 0x26f   :  { %v9441_v28 = vpack.c.bf16 %v5362_v21, %v5361_v20 }
 0x270   :  { %v9443_v29 = vpack.c.bf16 %v5360_v23, %v5359_v22  ;;  %v7327_v30 = vpop.f32.mrb[36].mxu0 }
 0x271   :  { %v5301_v31 = vmul.f32 0.2, %v7327_v30  ;;  %v5152_v32 = vpop.f32.mrb[37].mxu0 }
 0x272   :  { %v5299_v33 = vmul.f32 0.2, %v5152_v32  ;;  %v7328_v34 = vpop.f32.mrb[38].mxu0 }
 0x273   :  { %v5302_v35 = vmul.f32 0.2, %v7328_v34  ;;  %v5155_v36 = vpop.f32.mrb[39].mxu0  ;;  %v5365_v38 = vmax.f32 %v7327_v30, %v5301_v31 }
 0x274   :  { %v5300_v37 = vmul.f32 0.2, %v5155_v36  ;;  %v5363_v42 = vmax.f32 %v5152_v32, %v5299_v33 }
 0x275   :  { %v5366_v39 = vmax.f32 %v7328_v34, %v5302_v35 }
 0x276   :  { %v5364_v45 = vmax.f32 %v5155_v36, %v5300_v37 }
 0x277   :  { %v9445_v46 = vpack.c.bf16 %v5366_v39, %v5365_v38 }
 0x278   :  { %v9447_v47 = vpack.c.bf16 %v5364_v45, %v5363_v42  ;;  %v7331_v48 = vpop.f32.mrb[40].mxu0 }
 0x279   :  { %v5305_v49 = vmul.f32 0.2, %v7331_v48  ;;  %v5168_v50 = vpop.f32.mrb[41].mxu0 }
 0x27a   :  { %v5303_v51 = vmul.f32 0.2, %v5168_v50  ;;  %v7332_v52 = vpop.f32.mrb[42].mxu0 }
 0x27b   :  { %v5306_v53 = vmul.f32 0.2, %v7332_v52  ;;  %v5171_v54 = vpop.f32.mrb[43].mxu0  ;;  %v5369_v58 = vmax.f32 %v7331_v48, %v5305_v49 }
 0x27c   :  { %v5304_v55 = vmul.f32 0.2, %v5171_v54  ;;  %v5367_v62 = vmax.f32 %v5168_v50, %v5303_v51 }
 0x27d   :  { %v5370_v59 = vmax.f32 %v7332_v52, %v5306_v53 }
 0x27e   :  { %v5368_v63 = vmax.f32 %v5171_v54, %v5304_v55 }
 0x27f   :  { %v9449_v0 = vpack.c.bf16 %v5370_v59, %v5369_v58 }
 0x280   :  { %v9451_v1 = vpack.c.bf16 %v5368_v63, %v5367_v62  ;;  %v7335_v2 = vpop.f32.mrb[44].mxu0 }
 0x281   :  { %v5309_v3 = vmul.f32 0.2, %v7335_v2  ;;  %v5184_v4 = vpop.f32.mrb[45].mxu0 }
 0x282   :  { %v5307_v5 = vmul.f32 0.2, %v5184_v4  ;;  %v7336_v6 = vpop.f32.mrb[46].mxu0 }
 0x283   :  { %v5310_v7 = vmul.f32 0.2, %v7336_v6  ;;  %v5187_v12 = vpop.f32.mrb[47].mxu0  ;;  %v5373_v14 = vmax.f32 %v7335_v2, %v5309_v3 }
 0x284   :  { %v5308_v13 = vmul.f32 0.2, %v5187_v12  ;;  %v5371_v16 = vmax.f32 %v5184_v4, %v5307_v5 }
 0x285   :  { %v5374_v15 = vmax.f32 %v7336_v6, %v5310_v7 }
 0x286   :  { %v5372_v17 = vmax.f32 %v5187_v12, %v5308_v13 }
 0x287   :  { %v9453_v18 = vpack.c.bf16 %v5374_v15, %v5373_v14 }
 0x288   :  { %v9455_v19 = vpack.c.bf16 %v5372_v17, %v5371_v16  ;;  %v7339_v20 = vpop.f32.mrb[48].mxu0 }
 0x289   :  { %v5313_v21 = vmul.f32 0.2, %v7339_v20  ;;  %v5200_v22 = vpop.f32.mrb[49].mxu0 }
 0x28a   :  { %v5311_v23 = vmul.f32 0.2, %v5200_v22  ;;  %v7340_v30 = vpop.f32.mrb[50].mxu0 }
 0x28b   :  { %v5314_v31 = vmul.f32 0.2, %v7340_v30  ;;  %v5203_v32 = vpop.f32.mrb[51].mxu0  ;;  %v5377_v34 = vmax.f32 %v7339_v20, %v5313_v21 }
 0x28c   :  { %v5312_v33 = vmul.f32 0.2, %v5203_v32  ;;  %v5375_v36 = vmax.f32 %v5200_v22, %v5311_v23 }
 0x28d   :  { %v5378_v35 = vmax.f32 %v7340_v30, %v5314_v31 }
 0x28e   :  { %v5376_v37 = vmax.f32 %v5203_v32, %v5312_v33 }
 0x28f   :  { %v5416_v38 = vpack.c.bf16 %v5378_v35, %v5377_v34 }
 0x290   :  { %v7343_v39 = vpop.f32.mrb[52].mxu0  ;;  %v5415_v42 = vpack.c.bf16 %v5376_v37, %v5375_v36 }
 0x291   :  { %v5317_v45 = vmul.f32 0.2, %v7343_v39  ;;  %5491 = vrot.lane.b32.xlu1 %v5416_v38, %s7428_s2  ;;  %v5216_v48 = vpop.f32.mrb[53].mxu0 }
 0x292   :  { %v5315_v49 = vmul.f32 0.2, %v5216_v48  ;;  %5489 = vrot.lane.b32.xlu0 %v5415_v42, %s7428_s2  ;;  %v7344_v50 = vpop.f32.mrb[54].mxu0 }
 0x293   :  { %v5381_v51 = vmax.f32 %v7343_v39, %v5317_v45  ;;  %v5318_v52 = vmul.f32 0.2, %v7344_v50  ;;  %v5219_v53 = vpop.f32.mrb[55].mxu0 }
 0x294   :  { %v5379_v54 = vmax.f32 %v5216_v48, %v5315_v49  ;;  %v5316_v55 = vmul.f32 0.2, %v5219_v53 }
 0x295   :  { %v5382_v58 = vmax.f32 %v7344_v50, %v5318_v52  ;;  %5467 = vrot.lane.b32.xlu1 %v9425_v24, %s7428_s2 }
 0x296   :  { %v5380_v59 = vmax.f32 %v5219_v53, %v5316_v55  ;;  %5465 = vrot.lane.b32.xlu0 %v9427_v27, %s7428_s2 }
 0x297   :  { %v5418_v62 = vpack.c.bf16 %v5382_v58, %v5381_v51 }
 0x298   :  { %v5417_v63 = vpack.c.bf16 %v5380_v59, %v5379_v54  ;;  %v7347_v2 = vpop.f32.mrb[56].mxu0 }
 0x299   :  { %v5321_v3 = vmul.f32 0.2, %v7347_v2  ;;  %5469 = vrot.lane.b32.xlu1 %v9431_v41, %s7428_s2  ;;  %v5232_v4 = vpop.f32.mrb[57].mxu0 }
 0x29a   :  { %v5319_v5 = vmul.f32 0.2, %v5232_v4  ;;  %5493 = vrot.lane.b32.xlu0 %v5417_v63, %s7428_s2  ;;  %v7348_v6 = vpop.f32.mrb[58].mxu0 }
 0x29b   :  { %v5385_v7 = vmax.f32 %v7347_v2, %v5321_v3  ;;  %v5322_v12 = vmul.f32 0.2, %v7348_v6  ;;  %v5235_v13 = vpop.f32.mrb[59].mxu0 }
 0x29c   :  { %v5383_v24 = vmax.f32 %v5232_v4, %v5319_v5  ;;  %v5320_v14 = vmul.f32 0.2, %v5235_v13 }
 0x29d   :  { %v5386_v15 = vmax.f32 %v7348_v6, %v5322_v12  ;;  %5471 = vrot.lane.b32.xlu1 %v9429_v40, %s7428_s2 }
 0x29e   :  { %v5384_v27 = vmax.f32 %v5235_v13, %v5320_v14  ;;  %5495 = vrot.lane.b32.xlu0 %v5418_v62, %s7428_s2 }
 0x29f   :  { %v5420_v16 = vpack.c.bf16 %v5386_v15, %v5385_v7 }
 0x2a0   :  { %v5419_v17 = vpack.c.bf16 %v5384_v27, %v5383_v24  ;;  %v7351_v41 = vpop.f32.mrb[60].mxu0 }
 0x2a1   :  { %v5325_v20 = vmul.f32 0.2, %v7351_v41  ;;  %5473 = vrot.lane.b32.xlu1 %v9435_v57, %s7428_s2  ;;  %v5248_v21 = vpop.f32.mrb[61].mxu0 }
 0x2a2   :  { %v5323_v22 = vmul.f32 0.2, %v5248_v21  ;;  %5497 = vrot.lane.b32.xlu0 %v5419_v17, %s7428_s2  ;;  %v7352_v23 = vpop.f32.mrb[62].mxu0 }
 0x2a3   :  { %v5389_v30 = vmax.f32 %v7351_v41, %v5325_v20  ;;  %v5326_v31 = vmul.f32 0.2, %v7352_v23  ;;  %v5251_v32 = vpop.f32.mrb[63].mxu0 }
 0x2a4   :  { %v5387_v33 = vmax.f32 %v5248_v21, %v5323_v22  ;;  %v5324_v40 = vmul.f32 0.2, %v5251_v32 }
 0x2a5   :  { %v5390_v34 = vmax.f32 %v7352_v23, %v5326_v31  ;;  %5475 = vrot.lane.b32.xlu1 %v9433_v56, %s7428_s2 }
 0x2a6   :  { %v5388_v35 = vmax.f32 %v5251_v32, %v5324_v40  ;;  %5499 = vrot.lane.b32.xlu0 %v5420_v16, %s7428_s2 }
 0x2a7   :  { %v5422_v36 = vpack.c.bf16 %v5390_v34, %v5389_v30 }
 0x2a8   :  { %v5421_v37 = vpack.c.bf16 %v5388_v35, %v5387_v33 }
 0x2a9   :  { %5477 = vrot.lane.b32.xlu1 %v9439_v9, %s7428_s2 }
 0x2aa   :  { %5501 = vrot.lane.b32.xlu0 %v5421_v37, %s7428_s2 }
 0x2ad   :  { %5479 = vrot.lane.b32.xlu1 %v9437_v8, %s7428_s2 }
 0x2ae   :  { %5503 = vrot.lane.b32.xlu0 %v5422_v36, %s7428_s2 }
 0x303   :  { %v5492_v38 = vpop.permute.xlu1 %5491 }
 0x304   :  { %v5490_v57 = vpop.permute.xlu0 %5489  ;;  %v5544_v9 = vsel %vm5505_vm2, %v9441_v28, %v5492_v38 }
 0x305   :  { %v5540_v56 = vsel %vm5505_vm2, %v9443_v29, %v5490_v57 }
 0x306   :  { %5698 = vmatprep.mubr.bf16.mxu0 %v5540_v56 }
 0x307   :  { %v5468_v45 = vpop.permute.xlu1 %5467 }
 0x308   :  { %v5466_v39 = vpop.permute.xlu0 %5465  ;;  %v5512_v48 = vsel %vm5505_vm2, %v9388_v25, %v5468_v45 }
 0x309   :  { %v5508_v42 = vsel %vm5505_vm2, %v9390_v26, %v5466_v39 }
 0x30a   :  { %5699 = vmatmul.mubr.bf16.vlgmr.msra.gmra.mrb[64].mxu0 %v5508_v42 }
 0x30b   :  { %5706 = vmatprep.mubr.bf16.mxu0 %v5544_v9  ;;  %v5470_v49 = vpop.permute.xlu1 %5469 }
 0x30c   :  { %v5494_v8 = vpop.permute.xlu0 %5493  ;;  %v5516_v26 = vsel %vm5505_vm2, %v9406_v44, %v5470_v49 }
 0x30d   :  { %v5548_v29 = vsel %vm5505_vm2, %v9447_v47, %v5494_v8 }
 0x30f   :  { %v5472_v51 = vpop.permute.xlu1 %5471 }
 0x310   :  { %v5496_v50 = vpop.permute.xlu0 %5495  ;;  %v5520_v25 = vsel %vm5505_vm2, %v9404_v43, %v5472_v51 }
 0x311   :  { %v5552_v28 = vsel %vm5505_vm2, %v9445_v46, %v5496_v50 }
 0x312   :  { %5707 = vmatmul.mubr.bf16.gmra.mrb[68].mxu0 %v5512_v48 }
 0x313   :  { %5714 = vmatprep.mubr.bf16.mxu0 %v5548_v29  ;;  %v5474_v53 = vpop.permute.xlu1 %5473 }
 0x314   :  { %v5498_v52 = vpop.permute.xlu0 %5497  ;;  %v5524_v44 = vsel %vm5505_vm2, %v9419_v61, %v5474_v53 }
 0x315   :  { %v5556_v47 = vsel %vm5505_vm2, %v9451_v1, %v5498_v52 }
 0x317   :  { %v5476_v55 = vpop.permute.xlu1 %5475 }
 0x318   :  { %v5500_v54 = vpop.permute.xlu0 %5499  ;;  %v5528_v43 = vsel %vm5505_vm2, %v9417_v60, %v5476_v55 }
 0x319   :  { %v5560_v46 = vsel %vm5505_vm2, %v9449_v0, %v5500_v54 }
 0x31a   :  { %5715 = vmatmul.mubr.bf16.gmra.mrb[72].mxu0 %v5516_v26 }
 0x31b   :  { %5722 = vmatprep.mubr.bf16.mxu0 %v5552_v28  ;;  %v5478_v59 = vpop.permute.xlu1 %5477 }
 0x31c   :  { %v5502_v58 = vpop.permute.xlu0 %5501  ;;  %v5532_v61 = vsel %vm5505_vm2, %v9423_v11, %v5478_v59 }
 0x31d   :  { %v5564_v1 = vsel %vm5505_vm2, %v9455_v19, %v5502_v58 }
 0x31f   :  { %v5480_v63 = vpop.permute.xlu1 %5479 }
 0x320   :  { %v5504_v62 = vpop.permute.xlu0 %5503  ;;  %v5536_v2 = vsel %vm5505_vm2, %v9421_v10, %v5480_v63 }
 0x321   :  { %v5568_v0 = vsel %vm5505_vm2, %v9453_v18, %v5504_v62 }
 0x322   :  { %5723 = vmatmul.mubr.bf16.gmra.mrb[76].mxu0 %v5520_v25 }
 0x323   :  { %5730 = vmatprep.mubr.bf16.mxu0 %v5556_v47 }
 0x32a   :  { %5731 = vmatmul.mubr.bf16.gmra.mrb[80].mxu0 %v5524_v44 }
 0x32b   :  { %5738 = vmatprep.mubr.bf16.mxu0 %v5560_v46 }
 0x332   :  { %5739 = vmatmul.mubr.bf16.gmra.mrb[84].mxu0 %v5528_v43 }
 0x333   :  { %5746 = vmatprep.mubr.bf16.mxu0 %v5564_v1 }
 0x33a   :  { %5747 = vmatmul.mubr.bf16.gmra.mrb[88].mxu0 %v5532_v61 }
 0x33b   :  { %5754 = vmatprep.mubr.bf16.mxu0 %v5568_v0 }
 0x342   :  { %5755 = vmatmul.mubr.bf16.gmra.mrb[92].mxu0 %v5536_v2 }
 0x3dd   :  { %v7239_v60 = vpop.f32.mrb[64].mxu0 }
 0x3de   :  { %v7240_v3 = vpop.f32.mrb[65].mxu0 }
 0x3df   :  { %v9513_v4 = vadd.f32 %v7240_v3, %v7239_v60  ;;  %v7242_v19 = vpop.f32.mrb[66].mxu0 }
 0x3e0   :  { %v7243_v5 = vpop.f32.mrb[67].mxu0 }
 0x3e1   :  { %v9515_v6 = vadd.f32 %v7243_v5, %v7242_v19  ;;  %v5785_v10 = vmul.f32 %v9513_v4, %v9513_v4 }
 0x3e3   :  { %v5786_v12 = vmul.f32 %v9515_v6, %v9515_v6  ;;  %v5763_v14 = vadd.f32 %v9515_v6, %v9513_v4 }
 0x3e5   :  { %v7245_v7 = vpop.f32.mrb[68].mxu0  ;;  %v5801_v16 = vadd.f32 %v5786_v12, %v5785_v10 }
 0x3e6   :  { %v7246_v11 = vpop.f32.mrb[69].mxu0 }
 0x3e7   :  { %v9519_v18 = vadd.f32 %v7246_v11, %v7245_v7  ;;  %v7248_v13 = vpop.f32.mrb[70].mxu0 }
 0x3e8   :  { %v7249_v24 = vpop.f32.mrb[71].mxu0 }
 0x3e9   :  { %v5787_v15 = vmul.f32 %v9519_v18, %v9519_v18  ;;  %v9527_v27 = vadd.f32 %v7249_v24, %v7248_v13  ;;  %v5764_v17 = vadd.f32 %v9519_v18, %v5763_v14 }
 0x3eb   :  { %v5802_v41 = vadd.f32 %v5801_v16, %v5787_v15  ;;  %v5788_v20 = vmul.f32 %v9527_v27, %v9527_v27  ;;  %v5765_v23 = vadd.f32 %v9527_v27, %v5764_v17 }
 0x3ed   :  { %v7251_v21 = vpop.f32.mrb[72].mxu0  ;;  %v5803_v33 = vadd.f32 %v5802_v41, %v5788_v20 }
 0x3ee   :  { %v7252_v22 = vpop.f32.mrb[73].mxu0 }
 0x3ef   :  { %v9533_v30 = vadd.f32 %v7252_v22, %v7251_v21  ;;  %v7254_v31 = vpop.f32.mrb[74].mxu0 }
 0x3f0   :  { %v7255_v32 = vpop.f32.mrb[75].mxu0 }
 0x3f1   :  { %v5766_v40 = vadd.f32 %v9533_v30, %v5765_v23  ;;  %v5789_v34 = vmul.f32 %v9533_v30, %v9533_v30  ;;  %v9538_v35 = vadd.f32 %v7255_v32, %v7254_v31 }
 0x3f3   :  { %v5804_v36 = vadd.f32 %v5803_v33, %v5789_v34  ;;  %v5767_v37 = vadd.f32 %v9538_v35, %v5766_v40  ;;  %v5790_v57 = vmul.f32 %v9538_v35, %v9538_v35 }
 0x3f5   :  { %v5805_v56 = vadd.f32 %v5804_v36, %v5790_v57  ;;  %v7257_v38 = vpop.f32.mrb[76].mxu0 }
 0x3f6   :  { %v7258_v39 = vpop.f32.mrb[77].mxu0 }
 0x3f7   :  { %v9543_v42 = vadd.f32 %v7258_v39, %v7257_v38  ;;  %v7260_v9 = vpop.f32.mrb[78].mxu0 }
 0x3f8   :  { %v7261_v45 = vpop.f32.mrb[79].mxu0 }
 0x3f9   :  { %v5768_v8 = vadd.f32 %v9543_v42, %v5767_v37  ;;  %v5791_v48 = vmul.f32 %v9543_v42, %v9543_v42  ;;  %v9548_v29 = vadd.f32 %v7261_v45, %v7260_v9 }
 0x3fb   :  { %v5806_v49 = vadd.f32 %v5805_v56, %v5791_v48  ;;  %v5769_v50 = vadd.f32 %v9548_v29, %v5768_v8  ;;  %v5792_v26 = vmul.f32 %v9548_v29, %v9548_v29 }
 0x3fd   :  { %v5807_v28 = vadd.f32 %v5806_v49, %v5792_v26  ;;  %v7263_v51 = vpop.f32.mrb[80].mxu0 }
 0x3fe   :  { %v7264_v52 = vpop.f32.mrb[81].mxu0 }
 0x3ff   :  { %v9553_v25 = vadd.f32 %v7264_v52, %v7263_v51  ;;  %v7266_v47 = vpop.f32.mrb[82].mxu0 }
 0x400   :  { %v7267_v53 = vpop.f32.mrb[83].mxu0 }
 0x401   :  { %v5770_v54 = vadd.f32 %v9553_v25, %v5769_v50  ;;  %v5793_v44 = vmul.f32 %v9553_v25, %v9553_v25  ;;  %v9558_v46 = vadd.f32 %v7267_v53, %v7266_v47 }
 0x403   :  { %v5808_v55 = vadd.f32 %v5807_v28, %v5793_v44  ;;  %v5771_v58 = vadd.f32 %v9558_v46, %v5770_v54  ;;  %v5794_v43 = vmul.f32 %v9558_v46, %v9558_v46 }
 0x405   :  { %v5809_v1 = vadd.f32 %v5808_v55, %v5794_v43  ;;  %v7269_v59 = vpop.f32.mrb[84].mxu0 }
 0x406   :  { %v7270_v62 = vpop.f32.mrb[85].mxu0 }
 0x407   :  { %v9563_v61 = vadd.f32 %v7270_v62, %v7269_v59  ;;  %v7272_v0 = vpop.f32.mrb[86].mxu0  ;;  %v5455_v62 = vld [vmem:[%s9951_s3] sm:$0x1] }
 0x408   :  { %v7273_v63 = vpop.f32.mrb[87].mxu0 }
 0x409   :  { %v5772_v2 = vadd.f32 %v9563_v61, %v5771_v58  ;;  %v5795_v60 = vmul.f32 %v9563_v61, %v9563_v61  ;;  %v9568_v3 = vadd.f32 %v7273_v63, %v7272_v0 }
 0x40b   :  { %v5810_v19 = vadd.f32 %v5809_v1, %v5795_v60  ;;  %v5773_v5 = vadd.f32 %v9568_v3, %v5772_v2  ;;  %v5796_v7 = vmul.f32 %v9568_v3, %v9568_v3  ;;  %v5830_v1 = vlaneseq  ;;  %v5456_v60 = vld [vmem:[%s9952_s4] sm:$0x1] }
 0x40d   :  { %v5811_v11 = vadd.f32 %v5810_v19, %v5796_v7  ;;  %v7275_v12 = vpop.f32.mrb[88].mxu0  ;;  %v9573_v59 = vshrl.u32 %v5830_v1, 7 }
 0x40e   :  { %v7276_v13 = vpop.f32.mrb[89].mxu0 }
 0x40f   :  { %v7277_v24 = vadd.f32 %v7276_v13, %v7275_v12  ;;  %v7278_v10 = vpop.f32.mrb[90].mxu0  ;;  %v9579_v0 = vsub.s32 0, %v9573_v59 }
 0x410   :  { %v7279_v14 = vpop.f32.mrb[91].mxu0 }
 0x411   :  { %v5774_v15 = vadd.f32 %v7277_v24, %v5773_v5  ;;  %v5797_v16 = vmul.f32 %v7277_v24, %v7277_v24  ;;  %v7280_v17 = vadd.f32 %v7279_v14, %v7278_v10 }
 0x413   :  { %v5812_v41 = vadd.f32 %v5811_v11, %v5797_v16  ;;  %v5775_v20 = vadd.f32 %v7280_v17, %v5774_v15  ;;  %v5798_v21 = vmul.f32 %v7280_v17, %v7280_v17 }
 0x415   :  { %v5813_v22 = vadd.f32 %v5812_v41, %v5798_v21  ;;  %v7281_v23 = vpop.f32.mrb[92].mxu0 }
 0x416   :  { %v7282_v31 = vpop.f32.mrb[93].mxu0 }
 0x417   :  { %v7283_v32 = vadd.f32 %v7282_v31, %v7281_v23  ;;  %v7284_v33 = vpop.f32.mrb[94].mxu0 }
 0x418   :  { %v7285_v40 = vpop.f32.mrb[95].mxu0 }
 0x419   :  { %v5776_v34 = vadd.f32 %v7283_v32, %v5775_v20  ;;  %v5799_v36 = vmul.f32 %v7283_v32, %v7283_v32  ;;  %v7286_v37 = vadd.f32 %v7285_v40, %v7284_v33 }
 0x41b   :  { %v5814_v57 = vadd.f32 %v5813_v22, %v5799_v36  ;;  %v5777_v56 = vadd.f32 %v7286_v37, %v5776_v34  ;;  %v5800_v38 = vmul.f32 %v7286_v37, %v7286_v37 }
 0x41d   :  { %v5778_v39 = vrot.slane %v5777_v56, 4  ;;  %v5815_v9 = vadd.f32 %v5814_v57, %v5800_v38 }
 0x41f   :  { %v5779_v45 = vadd.f32 %v5778_v39, %v5777_v56  ;;  %v5816_v8 = vrot.slane %v5815_v9, 4 }
 0x421   :  { %v5780_v48 = vrot.slane %v5779_v45, 2  ;;  %v5817_v49 = vadd.f32 %v5816_v8, %v5815_v9 }
 0x423   :  { %v5781_v50 = vadd.f32 %v5780_v48, %v5779_v45  ;;  %v5818_v26 = vrot.slane %v5817_v49, 2 }
 0x425   :  { %v5782_v28 = vrot.slane %v5781_v50, 1  ;;  %v5819_v51 = vadd.f32 %v5818_v26, %v5817_v49 }
 0x427   :  { %v5783_v52 = vadd.f32 %v5782_v28, %v5781_v50  ;;  %v5820_v47 = vrot.slane %v5819_v51, 1 }
 0x429   :  { %v5784_v53 = vmul.f32 0.0078125, %v5783_v52  ;;  %v5821_v54 = vadd.f32 %v5820_v47, %v5819_v51 }
 0x42b   :  { %v5822_v44 = vmul.f32 0.0078125, %v5821_v54  ;;  %v5823_v55 = vmul.f32 %v5784_v53, %v5784_v53 }
 0x42d   :  { %v5824_v58 = vsub.f32 %v5822_v44, %v5823_v55 }
 0x42f   :  { %v5825_v43 = vadd.f32 1e-05, %v5824_v58 }
 0x431   :  { %7405 = vrsqrt.f32 %v5825_v43 }
 0x43b   :  { %v7406_v63 = vpop.eup %7405 }
 0x43c   :  { %v5827_v2 = vmul.f32 %v7406_v63, %v5455_v62 }
 0x43e   :  { %v5828_v19 = vmul.f32 %v5827_v2, %v5784_v53  ;;  %v5833_v5 = vrot.slane %v5827_v2, %v9579_v0 }
 0x440   :  { %v5829_v7 = vsub.f32 %v5456_v60, %v5828_v19  ;;  %v5834_v11 = vmul.f32 %v9513_v4, %v5833_v5  ;;  %v5837_v12 = vmul.f32 %v9527_v27, %v5833_v5  ;;  %v5838_v13 = vmul.f32 %v9533_v30, %v5833_v5 }
 0x441   :  { %v5839_v10 = vmul.f32 %v9538_v35, %v5833_v5  ;;  %v5840_v14 = vmul.f32 %v9543_v42, %v5833_v5  ;;  %v5841_v15 = vmul.f32 %v9548_v29, %v5833_v5  ;;  %v5842_v16 = vmul.f32 %v9553_v25, %v5833_v5 }
 0x442   :  { %v5843_v41 = vmul.f32 %v9558_v46, %v5833_v5  ;;  %v5844_v20 = vmul.f32 %v9563_v61, %v5833_v5  ;;  %v5845_v21 = vmul.f32 %v9568_v3, %v5833_v5  ;;  %v5846_v22 = vmul.f32 %v7277_v24, %v5833_v5 }
 0x443   :  { %v5847_v4 = vmul.f32 %v7280_v17, %v5833_v5  ;;  %v5848_v23 = vmul.f32 %v7283_v32, %v5833_v5  ;;  %v5835_v27 = vmul.f32 %v9515_v6, %v5833_v5  ;;  %v5836_v30 = vmul.f32 %v9519_v18, %v5833_v5 }
 0x444   :  { %v5849_v35 = vmul.f32 %v7286_v37, %v5833_v5  ;;  %v5854_v42 = vrot.slane %v5829_v7, %v9579_v0 }
 0x446   :  { %v9598_v31 = vadd.f32 %v5854_v42, %v5834_v11  ;;  %v9600_v29 = vadd.f32 %v5854_v42, %v5835_v27  ;;  %v9602_v25 = vadd.f32 %v5854_v42, %v5836_v30  ;;  %v9604_v46 = vadd.f32 %v5854_v42, %v5837_v12 }
 0x447   :  { %v5860_v61 = vadd.f32 %v5854_v42, %v5838_v13  ;;  %v5861_v3 = vadd.f32 %v5854_v42, %v5839_v10  ;;  %v9606_v24 = vadd.f32 %v5854_v42, %v5840_v14  ;;  %v9608_v17 = vadd.f32 %v5854_v42, %v5841_v15 }
 0x448   :  { %v9610_v6 = vadd.f32 %v5854_v42, %v5842_v16  ;;  %v9612_v18 = vadd.f32 %v5854_v42, %v5843_v41  ;;  %v9614_v32 = vadd.f32 %v5854_v42, %v5844_v20  ;;  %v9616_v33 = vadd.f32 %v5854_v42, %v5845_v21 }
 0x449   :  { %v9618_v40 = vadd.f32 %v5854_v42, %v5846_v22  ;;  %v9620_v34 = vadd.f32 %v5854_v42, %v5847_v4  ;;  %v9622_v36 = vadd.f32 %v5854_v42, %v5848_v23  ;;  %v9624_v37 = vadd.f32 %v5854_v42, %v5849_v35 }
 0x44a   :  { %v9627_v57 = vmul.f32 0.2, %v9598_v31  ;;  %v9630_v56 = vmul.f32 0.2, %v9600_v29  ;;  %v9633_v38 = vmul.f32 0.2, %v9602_v25 }
 0x44b   :  { %v9636_v39 = vmul.f32 0.2, %v9604_v46  ;;  %v5876_v9 = vmul.f32 0.2, %v5860_v61  ;;  %v5877_v45 = vmul.f32 0.2, %v5861_v3 }
 0x44c   :  { %v9639_v8 = vmul.f32 0.2, %v9606_v24  ;;  %v9642_v48 = vmul.f32 0.2, %v9608_v17  ;;  %v9645_v49 = vmul.f32 0.2, %v9610_v6  ;;  %v5888_v50 = vmax.f32 %v9598_v31, %v9627_v57 }
 0x44d   :  { %v9650_v26 = vmul.f32 0.2, %v9612_v18  ;;  %v9653_v28 = vmul.f32 0.2, %v9614_v32  ;;  %v9656_v51 = vmul.f32 0.2, %v9616_v33  ;;  %v5889_v52 = vmax.f32 %v9600_v29, %v9630_v56 }
 0x44e   :  { %v9661_v47 = vmul.f32 0.2, %v9618_v40  ;;  %v9664_v53 = vmul.f32 0.2, %v9620_v34  ;;  %v9667_v54 = vmul.f32 0.2, %v9622_v36  ;;  %v5890_v44 = vmax.f32 %v9602_v25, %v9633_v38 }
 0x44f   :  { %v9672_v55 = vmul.f32 0.2, %v9624_v37  ;;  %v5891_v58 = vmax.f32 %v9604_v46, %v9636_v39  ;;  %v5892_v43 = vmax.f32 %v5860_v61, %v5876_v9  ;;  %v5893_v1 = vmax.f32 %v5861_v3, %v5877_v45 }
 0x450   :  { %v5894_v62 = vmax.f32 %v9606_v24, %v9639_v8  ;;  %v5895_v63 = vmax.f32 %v9608_v17, %v9642_v48  ;;  %v5896_v2 = vmax.f32 %v9610_v6, %v9645_v49  ;;  %v5897_v60 = vmax.f32 %v9612_v18, %v9650_v26 }
 0x451   :  { %v5898_v19 = vmax.f32 %v9614_v32, %v9653_v28  ;;  %v5899_v5 = vmax.f32 %v9616_v33, %v9656_v51  ;;  %v5900_v7 = vmax.f32 %v9618_v40, %v9661_v47  ;;  %v5901_v11 = vmax.f32 %v9620_v34, %v9664_v53 }
 0x452   :  { %v5902_v12 = vmax.f32 %v9622_v36, %v9667_v54  ;;  %v5903_v13 = vmax.f32 %v9624_v37, %v9672_v55 }
 0x453   :  { %7424 = dma.done.wait [#allocation4], 8192 }
 0x454   :  { %7425 = vsyncadd [#allocation4], 4294959104  ;;  %v5910_v10 = vpack.c.bf16 %v5893_v1, %v5892_v43  ;;  %v5917_v14 = vld [vmem:[#allocation2 + $0x8] sm:$0xff]  ;;  %v5916_v15 = vld [vmem:[#allocation2] sm:$0xff]  ;;  %v5909_v29 = vpack.c.bf16 %v5891_v58, %v5890_v44  ;;  %v5914_v24 = vpack.c.bf16 %v5901_v11, %v5900_v7  ;;  %v5913_v6 = vpack.c.bf16 %v5899_v5, %v5898_v19 }
 0x455   :  { %v5919_v16 = vld [vmem:[#allocation2 + $0x18] sm:$0xff]  ;;  %5982 = vmatprep.subr.bf16.mxu1 %v5917_v14  ;;  %v5918_v41 = vld [vmem:[#allocation2 + $0x10] sm:$0xff]  ;;  %v5921_v20 = vld [vmem:[#allocation2 + $0x28] sm:$0xff] }
 0x456   :  { %6014 = vmatprep.mubr.bf16.mxu1 %v5910_v10  ;;  %5983 = vmatpush1.bf16.msra.mxu1 %v5916_v15  ;;  %v5920_v21 = vld [vmem:[#allocation2 + $0x20] sm:$0xff]  ;;  %v5923_v22 = vld [vmem:[#allocation2 + $0x38] sm:$0xff]  ;;  %v5922_v4 = vld [vmem:[#allocation2 + $0x30] sm:$0xff] }
 0x457   :  { %5984 = vmatprep.subr.bf16.mxu1 %v5919_v16  ;;  %v5925_v23 = vld [vmem:[#allocation2 + $0x48] sm:$0xff]  ;;  %v5924_v27 = vld [vmem:[#allocation2 + $0x40] sm:$0xff]  ;;  %v5927_v30 = vld [vmem:[#allocation2 + $0x58] sm:$0xff] }
 0x458   :  { %v5926_v35 = vld [vmem:[#allocation2 + $0x50] sm:$0xff]  ;;  %v5929_v42 = vld [vmem:[#allocation2 + $0x68] sm:$0xff]  ;;  %v5928_v61 = vld [vmem:[#allocation2 + $0x60] sm:$0xff] }
 0x459   :  { %v5931_v3 = vld [vmem:[#allocation2 + $0x78] sm:$0xff]  ;;  %v5930_v9 = vld [vmem:[#allocation2 + $0x70] sm:$0xff]  ;;  %v5933_v45 = vld [vmem:[#allocation2 + $0x88] sm:$0xff] }
 0x45a   :  { %5985 = vmatpush1.bf16.msra.mxu1 %v5918_v41  ;;  %v5932_v43 = vld [vmem:[#allocation2 + $0x80] sm:$0xff]  ;;  %v5935_v1 = vld [vmem:[#allocation2 + $0x98] sm:$0xff]  ;;  %v5934_v10 = vld [vmem:[#allocation2 + $0x90] sm:$0xff] }
 0x45b   :  { %5986 = vmatprep.subr.bf16.mxu1 %v5921_v20  ;;  %v5937_v14 = vld [vmem:[#allocation2 + $0xa8] sm:$0xff]  ;;  %v5936_v15 = vld [vmem:[#allocation2 + $0xa0] sm:$0xff]  ;;  %v5939_v16 = vld [vmem:[#allocation2 + $0xb8] sm:$0xff] }
 0x45c   :  { %v5938_v41 = vld [vmem:[#allocation2 + $0xb0] sm:$0xff]  ;;  %v5941_v20 = vld [vmem:[#allocation2 + $0xc8] sm:$0xff]  ;;  %v5952_v17 = vld [vmem:[#allocation2 + $0x120] sm:$0xff] }
 0x45d   :  { %v5950_v31 = vld [vmem:[#allocation2 + $0x110] sm:$0xff]  ;;  %v5953_v57 = vld [vmem:[#allocation2 + $0x128] sm:$0xff]  ;;  %v5955_v56 = vld [vmem:[#allocation2 + $0x138] sm:$0xff] }
 0x45e   :  { %5987 = vmatpush1.bf16.msra.mxu1 %v5920_v21  ;;  %v5940_v21 = vld [vmem:[#allocation2 + $0xc0] sm:$0xff]  ;;  %v5954_v25 = vld [vmem:[#allocation2 + $0x130] sm:$0xff]  ;;  %v5957_v38 = vld [vmem:[#allocation2 + $0x148] sm:$0xff] }
 0x45f   :  { %5988 = vmatprep.subr.bf16.mxu1 %v5923_v22  ;;  %v5943_v22 = vld [vmem:[#allocation2 + $0xd8] sm:$0xff]  ;;  %v5956_v46 = vld [vmem:[#allocation2 + $0x140] sm:$0xff]  ;;  %v5958_v40 = vld [vmem:[#allocation2 + $0x150] sm:$0xff] }
 0x460   :  { %v5959_v39 = vld [vmem:[#allocation2 + $0x158] sm:$0xff]  ;;  %v5961_v8 = vld [vmem:[#allocation2 + $0x168] sm:$0xff]  ;;  %v5960_v34 = vld [vmem:[#allocation2 + $0x160] sm:$0xff] }
 0x461   :  { %v5963_v48 = vld [vmem:[#allocation2 + $0x178] sm:$0xff]  ;;  %v5964_v47 = vld [vmem:[#allocation2 + $0x180] sm:$0xff]  ;;  %v5966_v44 = vld [vmem:[#allocation2 + $0x190] sm:$0xff] }
 0x462   :  { %5989 = vmatpush1.bf16.msra.mxu1 %v5922_v4  ;;  %v5942_v4 = vld [vmem:[#allocation2 + $0xd0] sm:$0xff]  ;;  %v5967_v53 = vld [vmem:[#allocation2 + $0x198] sm:$0xff]  ;;  %v5969_v58 = vld [vmem:[#allocation2 + $0x1a8] sm:$0xff] }
 0x463   :  { %5990 = vmatprep.subr.bf16.mxu1 %v5925_v23  ;;  %v5945_v23 = vld [vmem:[#allocation2 + $0xe8] sm:$0xff]  ;;  %v5970_v7 = vld [vmem:[#allocation2 + $0x1b0] sm:$0xff] }
 0x464   :  { %v5973_v11 = vld [vmem:[#allocation2 + $0x1c8] sm:$0xff] }
 0x466   :  { %5991 = vmatpush1.bf16.msra.mxu1 %v5924_v27  ;;  %v5944_v27 = vld [vmem:[#allocation2 + $0xe0] sm:$0xff] }
 0x467   :  { %5992 = vmatprep.subr.bf16.mxu1 %v5927_v30  ;;  %v5947_v30 = vld [vmem:[#allocation2 + $0xf8] sm:$0xff] }
 0x46a   :  { %5993 = vmatpush1.bf16.msra.mxu1 %v5926_v35  ;;  %v5946_v35 = vld [vmem:[#allocation2 + $0xf0] sm:$0xff] }
 0x46b   :  { %5994 = vmatprep.subr.bf16.mxu1 %v5929_v42  ;;  %v5949_v42 = vld [vmem:[#allocation2 + $0x108] sm:$0xff] }
 0x46e   :  { %5995 = vmatpush1.bf16.msra.mxu1 %v5928_v61  ;;  %v5908_v61 = vpack.c.bf16 %v5889_v52, %v5888_v50  ;;  %v5962_v50 = vld [vmem:[#allocation2 + $0x170] sm:$0xff]  ;;  %v5965_v52 = vld [vmem:[#allocation2 + $0x188] sm:$0xff] }
 0x46f   :  { %5996 = vmatprep.subr.bf16.mxu1 %v5931_v3  ;;  %v5911_v3 = vpack.c.bf16 %v5895_v63, %v5894_v62  ;;  %v5968_v62 = vld [vmem:[#allocation2 + $0x1a0] sm:$0xff]  ;;  %v5971_v63 = vld [vmem:[#allocation2 + $0x1b8] sm:$0xff] }
 0x472   :  { %5997 = vmatpush1.bf16.msra.mxu1 %v5930_v9  ;;  %v5948_v9 = vld [vmem:[#allocation2 + $0x100] sm:$0xff] }
 0x473   :  { %5998 = vmatprep.subr.bf16.mxu1 %v5933_v45  ;;  %v5951_v45 = vld [vmem:[#allocation2 + $0x118] sm:$0xff] }
 0x476   :  { %5999 = vmatpush1.bf16.msra.mxu1 %v5932_v43  ;;  %v5972_v43 = vld [vmem:[#allocation2 + $0x1c0] sm:$0xff] }
 0x477   :  { %6000 = vmatprep.subr.bf16.mxu1 %v5935_v1  ;;  %v5975_v1 = vld [vmem:[#allocation2 + $0x1d8] sm:$0xff] }
 0x47a   :  { %6001 = vmatpush1.bf16.msra.mxu1 %v5934_v10  ;;  %v5974_v10 = vld [vmem:[#allocation2 + $0x1d0] sm:$0xff] }
 0x47b   :  { %6002 = vmatprep.subr.bf16.mxu1 %v5937_v14  ;;  %v5977_v14 = vld [vmem:[#allocation2 + $0x1e8] sm:$0xff] }
 0x47e   :  { %6003 = vmatpush1.bf16.msra.mxu1 %v5936_v15  ;;  %v5976_v15 = vld [vmem:[#allocation2 + $0x1e0] sm:$0xff] }
 0x47f   :  { %6004 = vmatprep.subr.bf16.mxu1 %v5939_v16  ;;  %v5979_v16 = vld [vmem:[#allocation2 + $0x1f8] sm:$0xff] }
 0x482   :  { %6005 = vmatpush1.bf16.msra.mxu1 %v5938_v41  ;;  %v5978_v41 = vld [vmem:[#allocation2 + $0x1f0] sm:$0xff] }
 0x483   :  { %6006 = vmatprep.subr.bf16.mxu1 %v5941_v20  ;;  %v5912_v20 = vpack.c.bf16 %v5897_v60, %v5896_v2 }
 0x486   :  { %6007 = vmatpush1.bf16.msra.mxu1 %v5940_v21  ;;  %v5915_v21 = vpack.c.bf16 %v5903_v13, %v5902_v12 }
 0x487   :  { %6008 = vmatprep.subr.bf16.mxu1 %v5943_v22 }
 0x48a   :  { %6009 = vmatpush1.bf16.msra.mxu1 %v5942_v4 }
 0x48b   :  { %6010 = vmatprep.subr.bf16.mxu1 %v5945_v23 }
 0x48e   :  { %6011 = vmatpush1.bf16.msra.mxu1 %v5944_v27 }
 0x48f   :  { %6012 = vmatprep.subr.bf16.mxu1 %v5947_v30 }
 0x492   :  { %6013 = vmatpush1.bf16.msra.mxu1 %v5946_v35 }
 0x493   :  { %6035 = vmatprep.subr.bf16.mxu1 %v5949_v42 }
 0x495   :  { %6015 = vmatmul.mubr.bf16.vlgmr.msra.gmra.mrb[0].mxu1 %v5908_v61 }
 0x496   :  { %6036 = vmatpush1.bf16.msra.mxu1 %v5948_v9  ;;  %6024 = vmatprep.mubr.bf16.mxu1 %v5911_v3 }
 0x497   :  { %6037 = vmatprep.subr.bf16.mxu1 %v5951_v45 }
 0x49a   :  { %6038 = vmatpush1.bf16.msra.mxu1 %v5950_v31 }
 0x49b   :  { %6039 = vmatprep.subr.bf16.mxu1 %v5953_v57 }
 0x49d   :  { %6025 = vmatmul.mubr.bf16.gmra.mrb[4].mxu1 %v5909_v29 }
 0x49e   :  { %6040 = vmatpush1.bf16.msra.mxu1 %v5952_v17  ;;  %6067 = vmatprep.mubr.bf16.mxu1 %v5914_v24 }
 0x49f   :  { %6041 = vmatprep.subr.bf16.mxu1 %v5955_v56 }
 0x4a2   :  { %6042 = vmatpush1.bf16.msra.mxu1 %v5954_v25 }
 0x4a3   :  { %6043 = vmatprep.subr.bf16.mxu1 %v5957_v38 }
 0x4a6   :  { %6044 = vmatpush1.bf16.msra.mxu1 %v5956_v46 }
 0x4a7   :  { %6045 = vmatprep.subr.bf16.mxu1 %v5959_v39 }
 0x4aa   :  { %6046 = vmatpush1.bf16.msra.mxu1 %v5958_v40 }
 0x4ab   :  { %6047 = vmatprep.subr.bf16.mxu1 %v5961_v8 }
 0x4ae   :  { %6048 = vmatpush1.bf16.msra.mxu1 %v5960_v34 }
 0x4af   :  { %6049 = vmatprep.subr.bf16.mxu1 %v5963_v48 }
 0x4b2   :  { %6050 = vmatpush1.bf16.msra.mxu1 %v5962_v50 }
 0x4b3   :  { %6051 = vmatprep.subr.bf16.mxu1 %v5965_v52 }
 0x4b6   :  { %6052 = vmatpush1.bf16.msra.mxu1 %v5964_v47 }
 0x4b7   :  { %6053 = vmatprep.subr.bf16.mxu1 %v5967_v53 }
 0x4ba   :  { %6054 = vmatpush1.bf16.msra.mxu1 %v5966_v44 }
 0x4bb   :  { %6055 = vmatprep.subr.bf16.mxu1 %v5969_v58 }
 0x4be   :  { %6056 = vmatpush1.bf16.msra.mxu1 %v5968_v62 }
 0x4bf   :  { %6057 = vmatprep.subr.bf16.mxu1 %v5971_v63 }
 0x4c2   :  { %6058 = vmatpush1.bf16.msra.mxu1 %v5970_v7 }
 0x4c3   :  { %6059 = vmatprep.subr.bf16.mxu1 %v5973_v11 }
 0x4c6   :  { %6060 = vmatpush1.bf16.msra.mxu1 %v5972_v43 }
 0x4c7   :  { %6061 = vmatprep.subr.bf16.mxu1 %v5975_v1 }
 0x4ca   :  { %6062 = vmatpush1.bf16.msra.mxu1 %v5974_v10 }
 0x4cb   :  { %6063 = vmatprep.subr.bf16.mxu1 %v5977_v14 }
 0x4ce   :  { %6064 = vmatpush1.bf16.msra.mxu1 %v5976_v15 }
 0x4cf   :  { %6065 = vmatprep.subr.bf16.mxu1 %v5979_v16 }
 0x4d2   :  { %6066 = vmatpush1.bf16.msra.mxu1 %v5978_v41 }
 0x4d5   :  { %6068 = vmatmul.mubr.bf16.vlgmr.msra.gmra.mrb[0].mxu1 %v5912_v20 }
 0x4d6   :  { %6077 = vmatprep.mubr.bf16.mxu1 %v5915_v21 }
 0x4dd   :  { %6078 = vmatmul.mubr.bf16.gmra.mrb[4].mxu1 %v5913_v6 }
 0x5a8   :  { %v9738_v18 = vpop.f32.mrb[0].mxu1 }
 0x5a9   :  { %v9740_v49 = vpop.f32.mrb[1].mxu1  ;;  %v6108_v36 = vmul.f32 %v9738_v18, %v9738_v18 }
 0x5aa   :  { %v9742_v26 = vpop.f32.mrb[2].mxu1  ;;  %v6109_v33 = vmul.f32 %v9740_v49, %v9740_v49 }
 0x5ab   :  { %v6088_v37 = vadd.f32 %v9742_v26, %v9738_v18  ;;  %v6110_v32 = vmul.f32 %v9742_v26, %v9742_v26  ;;  %v9750_v28 = vpop.f32.mrb[3].mxu1 }
 0x5ac   :  { %v6097_v51 = vadd.f32 %v9750_v28, %v9740_v49  ;;  %v6111_v54 = vmul.f32 %v9750_v28, %v9750_v28 }
 0x5ad   :  { %v6116_v55 = vadd.f32 %v6110_v32, %v6108_v36  ;;  %v5980_v36 = vld [vmem:[%s9954_s6] sm:$0x3]  ;;  %v7429_v32 = vmov 1966171168  }
 0x5ae   :  { %v6125_v2 = vadd.f32 %v6111_v54, %v6109_v33  ;;  %v6163_v33 = vunpack.c.l.s4 %v7429_v32 }
 0x5b0   :  { %v9758_v60 = vpop.f32.mrb[4].mxu1 }
 0x5b1   :  { %v6089_v19 = vadd.f32 %v6088_v37, %v9758_v60  ;;  %v6112_v5 = vmul.f32 %v9758_v60, %v9758_v60  ;;  %v9763_v12 = vpop.f32.mrb[5].mxu1  ;;  %v9782_v37 = vsub.s32 1, %v9573_v59 }
 0x5b2   :  { %v6098_v13 = vadd.f32 %v6097_v51, %v9763_v12  ;;  %v6113_v22 = vmul.f32 %v9763_v12, %v9763_v12  ;;  %v9768_v4 = vpop.f32.mrb[6].mxu1  ;;  %v6148_v51 = vrot.slane %v5980_v36, %v9579_v0 }
 0x5b3   :  { %v6117_v23 = vadd.f32 %v6116_v55, %v6112_v5  ;;  %v6090_v27 = vadd.f32 %v6089_v19, %v9768_v4  ;;  %v6114_v30 = vmul.f32 %v9768_v4, %v9768_v4  ;;  %v9773_v35 = vpop.f32.mrb[7].mxu1  ;;  %v6152_v54 = vrot.slane %v5980_v36, %v9782_v37 }
 0x5b4   :  { %v6126_v42 = vadd.f32 %v6125_v2, %v6113_v22  ;;  %v6099_v61 = vadd.f32 %v6098_v13, %v9773_v35  ;;  %v6115_v3 = vmul.f32 %v9773_v35, %v9773_v35  ;;  %v6164_v2 = vunpack.c.0.s8 %v6163_v33 }
 0x5b5   :  { %v6091_v9 = vrot.slane %v6090_v27, 4  ;;  %v6118_v45 = vadd.f32 %v6117_v23, %v6114_v30 }
 0x5b6   :  { %v6100_v31 = vrot.slane %v6099_v61, 4  ;;  %v6127_v57 = vadd.f32 %v6126_v42, %v6115_v3  ;;  %v9788_v30 = vsub.s32 %v6164_v2, %v9573_v59 }
 0x5b7   :  { %v6092_v29 = vadd.f32 %v6091_v9, %v6090_v27  ;;  %v6119_v24 = vrot.slane %v6118_v45, 4 }
 0x5b8   :  { %v6101_v17 = vadd.f32 %v6100_v31, %v6099_v61  ;;  %v6128_v56 = vrot.slane %v6127_v57, 4 }
 0x5b9   :  { %v6093_v25 = vrot.slane %v6092_v29, 2  ;;  %v6120_v38 = vadd.f32 %v6119_v24, %v6118_v45 }
 0x5ba   :  { %v6102_v46 = vrot.slane %v6101_v17, 2  ;;  %v6129_v39 = vadd.f32 %v6128_v56, %v6127_v57 }
 0x5bb   :  { %v6094_v40 = vadd.f32 %v6093_v25, %v6092_v29  ;;  %v6121_v8 = vrot.slane %v6120_v38, 2 }
 0x5bc   :  { %v6103_v34 = vadd.f32 %v6102_v46, %v6101_v17  ;;  %v6130_v48 = vrot.slane %v6129_v39, 2 }
 0x5bd   :  { %v6095_v50 = vrot.slane %v6094_v40, 1  ;;  %v6122_v52 = vadd.f32 %v6121_v8, %v6120_v38 }
 0x5be   :  { %v6104_v47 = vrot.slane %v6103_v34, 1  ;;  %v6131_v53 = vadd.f32 %v6130_v48, %v6129_v39 }
 0x5bf   :  { %v6096_v44 = vadd.f32 %v6095_v50, %v6094_v40  ;;  %v6123_v58 = vrot.slane %v6122_v52, 1 }
 0x5c0   :  { %v6105_v62 = vadd.f32 %v6104_v47, %v6103_v34  ;;  %v6132_v63 = vrot.slane %v6131_v53, 1 }
 0x5c1   :  { %v6106_v7 = vmul.f32 0.03125, %v6096_v44  ;;  %v6124_v11 = vadd.f32 %v6123_v58, %v6122_v52 }
 0x5c2   :  { %v6107_v43 = vmul.f32 0.03125, %v6105_v62  ;;  %v6133_v1 = vadd.f32 %v6132_v63, %v6131_v53 }
 0x5c3   :  { %v6134_v10 = vmul.f32 0.03125, %v6124_v11  ;;  %v6136_v14 = vmul.f32 %v6106_v7, %v6106_v7 }
 0x5c4   :  { %v6135_v15 = vmul.f32 0.03125, %v6133_v1  ;;  %v6137_v16 = vmul.f32 %v6107_v43, %v6107_v43 }
 0x5c5   :  { %v6138_v41 = vsub.f32 %v6134_v10, %v6136_v14 }
 0x5c6   :  { %v6139_v20 = vsub.f32 %v6135_v15, %v6137_v16 }
 0x5c7   :  { %v6140_v21 = vadd.f32 1e-05, %v6138_v41 }
 0x5c8   :  { %v6141_v6 = vadd.f32 1e-05, %v6139_v20 }
 0x5c9   :  { %7407 = vrsqrt.f32 %v6140_v21 }
 0x5ca   :  { %7409 = vrsqrt.f32 %v6141_v6 }
 0x5d3   :  { %v7408_v55 = vpop.eup %7407 }
 0x5d4   :  { %v7410_v19 = vpop.eup %7409  ;;  %v6155_v5 = vmul.f32 %v7408_v55, %v6148_v51 }
 0x5d5   :  { %v6156_v13 = vmul.f32 %v7410_v19, %v6152_v54 }
 0x5d6   :  { %v6157_v22 = vmul.f32 %v6155_v5, %v6106_v7  ;;  %v6181_v23 = vrot.slane %v6155_v5, %v9579_v0 }
 0x5d7   :  { %v6158_v27 = vmul.f32 %v6156_v13, %v6107_v43  ;;  %v6185_v42 = vrot.slane %v6156_v13, %v9579_v0 }
 0x5d8   :  { %v6186_v61 = vmul.f32 %v6181_v23, %v9738_v18  ;;  %v6188_v3 = vmul.f32 %v6181_v23, %v9742_v26  ;;  %v6190_v9 = vmul.f32 %v6181_v23, %v9758_v60  ;;  %v6192_v45 = vmul.f32 %v6181_v23, %v9768_v4  ;;  %v5981_v18 = vld [vmem:[%s9955_s7] sm:$0x3] }
 0x5d9   :  { %v6161_v31 = vcombine.low %v6157_v22, %v6158_v27  ;;  %v6187_v57 = vmul.f32 %v6185_v42, %v9740_v49  ;;  %v6189_v29 = vmul.f32 %v6185_v42, %v9750_v28  ;;  %v6191_v24 = vmul.f32 %v6185_v42, %v9763_v12 }
 0x5da   :  { %v6193_v17 = vmul.f32 %v6185_v42, %v9773_v35 }
 0x5db   :  { %v6168_v56 = vrot.slane %v6161_v31, %v9788_v30 }
 0x5dd   :  { %v6175_v26 = vrot.slane %v6168_v56, %v9788_v30 }
 0x5df   :  { %v6177_v60 = vsub.f32 %v5981_v18, %v6175_v26 }
 0x5e1   :  { %v6198_v4 = vrot.slane %v6177_v60, %v9579_v0  ;;  %v6202_v25 = vrot.slane %v6177_v60, %v9782_v37 }
 0x5e3   :  { %v9806_v49 = vadd.f32 %v6198_v4, %v6186_v61  ;;  %v6206_v28 = vadd.f32 %v6202_v25, %v6187_v57  ;;  %v9808_v38 = vadd.f32 %v6198_v4, %v6188_v3  ;;  %v6208_v12 = vadd.f32 %v6202_v25, %v6189_v29 }
 0x5e4   :  { %v9810_v35 = vadd.f32 %v6198_v4, %v6190_v9  ;;  %v9812_v46 = vadd.f32 %v6202_v25, %v6191_v24  ;;  %v9814_v39 = vadd.f32 %v6198_v4, %v6192_v45  ;;  %v9816_v40 = vadd.f32 %v6202_v25, %v6193_v17 }
 0x5e5   :  { %v9819_v8 = vmul.f32 0.2, %v9806_v49  ;;  %v6214_v34 = vmul.f32 0.2, %v6206_v28  ;;  %v9822_v48 = vmul.f32 0.2, %v9808_v38 }
 0x5e6   :  { %v6216_v50 = vmul.f32 0.2, %v6208_v12  ;;  %v9825_v52 = vmul.f32 0.2, %v9810_v35  ;;  %v9828_v47 = vmul.f32 0.2, %v9812_v46 }
 0x5e7   :  { %v9831_v53 = vmul.f32 0.2, %v9814_v39  ;;  %v9834_v44 = vmul.f32 0.2, %v9816_v40  ;;  %v6221_v58 = vmax.f32 %v9806_v49, %v9819_v8  ;;  %v6222_v62 = vmax.f32 %v6206_v28, %v6214_v34 }
 0x5e8   :  { %v6223_v63 = vmax.f32 %v9808_v38, %v9822_v48  ;;  %v6224_v7 = vmax.f32 %v6208_v12, %v6216_v50  ;;  %v6225_v11 = vmax.f32 %v9810_v35, %v9825_v52  ;;  %v6226_v43 = vmax.f32 %v9812_v46, %v9828_v47 }
 0x5e9   :  { %v6227_v1 = vmax.f32 %v9814_v39, %v9831_v53  ;;  %v6228_v10 = vmax.f32 %v9816_v40, %v9834_v44 }
 0x5ea   :  { %7426 = dma.done.wait [#allocation4 + $0x1], 32768 }
 0x5eb   :  { %7427 = vsyncadd [#allocation4 + $0x1], 4294934528  ;;  %v9848_v14 = vpack.c.bf16 %v6224_v7, %v6222_v62  ;;  %v6238_v15 = vld [vmem:[#allocation3 + $0x8] sm:$0xff]  ;;  %v6240_v16 = vld [vmem:[#allocation3 + $0x18] sm:$0xff] }
 0x5ec   :  { %v6237_v41 = vld [vmem:[#allocation3] sm:$0xff]  ;;  %6507 = vmatprep.subr.bf16.mxu0 %v6238_v15  ;;  %6671 = vmatprep.subr.bf16.mxu1 %v6240_v16  ;;  %v6239_v20 = vld [vmem:[#allocation3 + $0x10] sm:$0xff]  ;;  %v6242_v21 = vld [vmem:[#allocation3 + $0x28] sm:$0xff] }
 0x5ed   :  { %6539 = vmatprep.mubr.bf16.mxu0 %v9848_v14  ;;  %6703 = vmatprep.mubr.bf16.mxu1 %v9848_v14  ;;  %v6244_v6 = vld [vmem:[#allocation3 + $0x38] sm:$0xff]  ;;  %v6241_v36 = vld [vmem:[#allocation3 + $0x20] sm:$0xff]  ;;  %v6243_v32 = vld [vmem:[#allocation3 + $0x30] sm:$0xff] }
 0x5ee   :  { %6508 = vmatpush1.bf16.msra.mxu0 %v6237_v41  ;;  %6672 = vmatpush1.bf16.msra.mxu1 %v6239_v20  ;;  %v6246_v33 = vld [vmem:[#allocation3 + $0x48] sm:$0xff]  ;;  %v6248_v51 = vld [vmem:[#allocation3 + $0x58] sm:$0xff]  ;;  %v6245_v54 = vld [vmem:[#allocation3 + $0x40] sm:$0xff] }
 0x5ef   :  { %6509 = vmatprep.subr.bf16.mxu0 %v6242_v21  ;;  %6673 = vmatprep.subr.bf16.mxu1 %v6244_v6  ;;  %v6247_v55 = vld [vmem:[#allocation3 + $0x50] sm:$0xff]  ;;  %v6250_v2 = vld [vmem:[#allocation3 + $0x68] sm:$0xff]  ;;  %v6252_v19 = vld [vmem:[#allocation3 + $0x78] sm:$0xff] }
 0x5f0   :  { %v6249_v5 = vld [vmem:[#allocation3 + $0x60] sm:$0xff]  ;;  %v6251_v13 = vld [vmem:[#allocation3 + $0x70] sm:$0xff]  ;;  %v6254_v22 = vld [vmem:[#allocation3 + $0x88] sm:$0xff] }
 0x5f1   :  { %v6256_v23 = vld [vmem:[#allocation3 + $0x98] sm:$0xff]  ;;  %v6253_v27 = vld [vmem:[#allocation3 + $0x80] sm:$0xff]  ;;  %v6255_v42 = vld [vmem:[#allocation3 + $0x90] sm:$0xff] }
 0x5f2   :  { %6510 = vmatpush1.bf16.msra.mxu0 %v6241_v36  ;;  %6674 = vmatpush1.bf16.msra.mxu1 %v6243_v32  ;;  %v6258_v61 = vld [vmem:[#allocation3 + $0xa8] sm:$0xff]  ;;  %v6260_v3 = vld [vmem:[#allocation3 + $0xb8] sm:$0xff]  ;;  %v6257_v9 = vld [vmem:[#allocation3 + $0xa0] sm:$0xff] }
 0x5f3   :  { %6511 = vmatprep.subr.bf16.mxu0 %v6246_v33  ;;  %6675 = vmatprep.subr.bf16.mxu1 %v6248_v51  ;;  %v6259_v45 = vld [vmem:[#allocation3 + $0xb0] sm:$0xff]  ;;  %v6262_v31 = vld [vmem:[#allocation3 + $0xc8] sm:$0xff]  ;;  %v6264_v57 = vld [vmem:[#allocation3 + $0xd8] sm:$0xff] }
 0x5f4   :  { %v6261_v29 = vld [vmem:[#allocation3 + $0xc0] sm:$0xff]  ;;  %v6263_v24 = vld [vmem:[#allocation3 + $0xd0] sm:$0xff]  ;;  %v6266_v17 = vld [vmem:[#allocation3 + $0xe8] sm:$0xff] }
 0x5f5   :  { %v6268_v56 = vld [vmem:[#allocation3 + $0xf8] sm:$0xff]  ;;  %v6265_v18 = vld [vmem:[#allocation3 + $0xe0] sm:$0xff]  ;;  %v6267_v26 = vld [vmem:[#allocation3 + $0xf0] sm:$0xff] }
 0x5f6   :  { %6512 = vmatpush1.bf16.msra.mxu0 %v6245_v54  ;;  %6676 = vmatpush1.bf16.msra.mxu1 %v6247_v55  ;;  %v6270_v60 = vld [vmem:[#allocation3 + $0x108] sm:$0xff]  ;;  %v6272_v4 = vld [vmem:[#allocation3 + $0x118] sm:$0xff]  ;;  %v6269_v25 = vld [vmem:[#allocation3 + $0x100] sm:$0xff] }
 0x5f7   :  { %6513 = vmatprep.subr.bf16.mxu0 %v6250_v2  ;;  %6677 = vmatprep.subr.bf16.mxu1 %v6252_v19  ;;  %v6271_v28 = vld [vmem:[#allocation3 + $0x110] sm:$0xff]  ;;  %v6274_v12 = vld [vmem:[#allocation3 + $0x128] sm:$0xff]  ;;  %v6276_v34 = vld [vmem:[#allocation3 + $0x138] sm:$0xff] }
 0x5f8   :  { %v6273_v50 = vld [vmem:[#allocation3 + $0x120] sm:$0xff]  ;;  %v6275_v62 = vld [vmem:[#allocation3 + $0x130] sm:$0xff]  ;;  %v6278_v7 = vld [vmem:[#allocation3 + $0x148] sm:$0xff] }
 0x5f9   :  { %v6280_v15 = vld [vmem:[#allocation3 + $0x158] sm:$0xff]  ;;  %v6277_v16 = vld [vmem:[#allocation3 + $0x140] sm:$0xff]  ;;  %v6279_v41 = vld [vmem:[#allocation3 + $0x150] sm:$0xff] }
 0x5fa   :  { %6514 = vmatpush1.bf16.msra.mxu0 %v6249_v5  ;;  %6678 = vmatpush1.bf16.msra.mxu1 %v6251_v13  ;;  %v6282_v20 = vld [vmem:[#allocation3 + $0x168] sm:$0xff]  ;;  %v6284_v21 = vld [vmem:[#allocation3 + $0x178] sm:$0xff]  ;;  %v6281_v6 = vld [vmem:[#allocation3 + $0x160] sm:$0xff] }
 0x5fb   :  { %6515 = vmatprep.subr.bf16.mxu0 %v6254_v22  ;;  %6679 = vmatprep.subr.bf16.mxu1 %v6256_v23  ;;  %v6283_v36 = vld [vmem:[#allocation3 + $0x170] sm:$0xff]  ;;  %v6286_v32 = vld [vmem:[#allocation3 + $0x188] sm:$0xff]  ;;  %v6288_v33 = vld [vmem:[#allocation3 + $0x198] sm:$0xff] }
 0x5fc   :  { %v6285_v51 = vld [vmem:[#allocation3 + $0x180] sm:$0xff]  ;;  %v6287_v54 = vld [vmem:[#allocation3 + $0x190] sm:$0xff]  ;;  %v6290_v55 = vld [vmem:[#allocation3 + $0x1a8] sm:$0xff] }
 0x5fd   :  { %v6292_v2 = vld [vmem:[#allocation3 + $0x1b8] sm:$0xff]  ;;  %v6289_v19 = vld [vmem:[#allocation3 + $0x1a0] sm:$0xff]  ;;  %v6291_v5 = vld [vmem:[#allocation3 + $0x1b0] sm:$0xff] }
 0x5fe   :  { %6516 = vmatpush1.bf16.msra.mxu0 %v6253_v27  ;;  %6680 = vmatpush1.bf16.msra.mxu1 %v6255_v42  ;;  %v6294_v13 = vld [vmem:[#allocation3 + $0x1c8] sm:$0xff]  ;;  %v6296_v22 = vld [vmem:[#allocation3 + $0x1d8] sm:$0xff]  ;;  %v6293_v23 = vld [vmem:[#allocation3 + $0x1c0] sm:$0xff] }
 0x5ff   :  { %6517 = vmatprep.subr.bf16.mxu0 %v6258_v61  ;;  %6681 = vmatprep.subr.bf16.mxu1 %v6260_v3  ;;  %v6295_v27 = vld [vmem:[#allocation3 + $0x1d0] sm:$0xff]  ;;  %v6298_v42 = vld [vmem:[#allocation3 + $0x1e8] sm:$0xff]  ;;  %v6300_v61 = vld [vmem:[#allocation3 + $0x1f8] sm:$0xff] }
 0x600   :  { %v6297_v3 = vld [vmem:[#allocation3 + $0x1e0] sm:$0xff]  ;;  %v6307_v38 = vld [vmem:[#allocation3 + $0x230] sm:$0xff]  ;;  %v6310_v8 = vld [vmem:[#allocation3 + $0x248] sm:$0xff] }
 0x601   :  { %v6305_v49 = vld [vmem:[#allocation3 + $0x220] sm:$0xff]  ;;  %v6312_v48 = vld [vmem:[#allocation3 + $0x258] sm:$0xff]  ;;  %v6375_v40 = vld [vmem:[#allocation3 + $0x450] sm:$0xff] }
 0x602   :  { %6518 = vmatpush1.bf16.msra.mxu0 %v6257_v9  ;;  %6682 = vmatpush1.bf16.msra.mxu1 %v6259_v45  ;;  %v6299_v9 = vld [vmem:[#allocation3 + $0x1f0] sm:$0xff]  ;;  %v6302_v45 = vld [vmem:[#allocation3 + $0x208] sm:$0xff]  ;;  %v6373_v46 = vld [vmem:[#allocation3 + $0x440] sm:$0xff] }
 0x603   :  { %6519 = vmatprep.subr.bf16.mxu0 %v6262_v31  ;;  %6683 = vmatprep.subr.bf16.mxu1 %v6264_v57  ;;  %v6304_v31 = vld [vmem:[#allocation3 + $0x218] sm:$0xff]  ;;  %v9858_v57 = vpack.c.bf16 %v6223_v63, %v6221_v58  ;;  %v6309_v58 = vld [vmem:[#allocation3 + $0x240] sm:$0xff]  ;;  %v6311_v63 = vld [vmem:[#allocation3 + $0x250] sm:$0xff] }
 0x604   :  { %v6378_v47 = vld [vmem:[#allocation3 + $0x468] sm:$0xff]  ;;  %v6380_v44 = vld [vmem:[#allocation3 + $0x478] sm:$0xff]  ;;  %v6433_v35 = vld [vmem:[#allocation3 + $0x620] sm:$0xff] }
 0x605   :  { %v6435_v39 = vld [vmem:[#allocation3 + $0x630] sm:$0xff]  ;;  %v6438_v52 = vld [vmem:[#allocation3 + $0x648] sm:$0xff]  ;;  %v6440_v53 = vld [vmem:[#allocation3 + $0x658] sm:$0xff] }
 0x606   :  { %6520 = vmatpush1.bf16.msra.mxu0 %v6261_v29  ;;  %6684 = vmatpush1.bf16.msra.mxu1 %v6263_v24  ;;  %v6301_v29 = vld [vmem:[#allocation3 + $0x200] sm:$0xff]  ;;  %v6303_v24 = vld [vmem:[#allocation3 + $0x210] sm:$0xff] }
 0x607   :  { %6521 = vmatprep.subr.bf16.mxu0 %v6266_v17  ;;  %6685 = vmatprep.subr.bf16.mxu1 %v6268_v56  ;;  %v6306_v17 = vld [vmem:[#allocation3 + $0x228] sm:$0xff]  ;;  %v6308_v56 = vld [vmem:[#allocation3 + $0x238] sm:$0xff] }
 0x60a   :  { %6522 = vmatpush1.bf16.msra.mxu0 %v6265_v18  ;;  %6686 = vmatpush1.bf16.msra.mxu1 %v6267_v26  ;;  %v6498_v18 = vrot.slane %v9848_v14, 4  ;;  %v6314_v14 = vld [vmem:[#allocation3 + $0x268] sm:$0xff]  ;;  %v6316_v26 = vld [vmem:[#allocation3 + $0x278] sm:$0xff] }
 0x60b   :  { %6523 = vmatprep.subr.bf16.mxu0 %v6270_v60  ;;  %6687 = vmatprep.subr.bf16.mxu1 %v6272_v4  ;;  %v6313_v60 = vld [vmem:[#allocation3 + $0x260] sm:$0xff]  ;;  %v6315_v4 = vld [vmem:[#allocation3 + $0x270] sm:$0xff] }
 0x60e   :  { %6524 = vmatpush1.bf16.msra.mxu0 %v6269_v25  ;;  %6688 = vmatpush1.bf16.msra.mxu1 %v6271_v28  ;;  %v6318_v25 = vld [vmem:[#allocation3 + $0x288] sm:$0xff]  ;;  %v6320_v28 = vld [vmem:[#allocation3 + $0x298] sm:$0xff] }
 0x60f   :  { %6525 = vmatprep.subr.bf16.mxu0 %v6274_v12  ;;  %6689 = vmatprep.subr.bf16.mxu1 %v6276_v34  ;;  %v6317_v12 = vld [vmem:[#allocation3 + $0x280] sm:$0xff]  ;;  %v6319_v34 = vld [vmem:[#allocation3 + $0x290] sm:$0xff] }
 0x612   :  { %6526 = vmatpush1.bf16.msra.mxu0 %v6273_v50  ;;  %6690 = vmatpush1.bf16.msra.mxu1 %v6275_v62  ;;  %v6322_v50 = vld [vmem:[#allocation3 + $0x2a8] sm:$0xff]  ;;  %v6324_v62 = vld [vmem:[#allocation3 + $0x2b8] sm:$0xff] }
 0x613   :  { %6527 = vmatprep.subr.bf16.mxu0 %v6278_v7  ;;  %6691 = vmatprep.subr.bf16.mxu1 %v6280_v15  ;;  %v6321_v7 = vld [vmem:[#allocation3 + $0x2a0] sm:$0xff]  ;;  %v6323_v15 = vld [vmem:[#allocation3 + $0x2b0] sm:$0xff] }
 0x616   :  { %6528 = vmatpush1.bf16.msra.mxu0 %v6277_v16  ;;  %6692 = vmatpush1.bf16.msra.mxu1 %v6279_v41  ;;  %v6326_v16 = vld [vmem:[#allocation3 + $0x2c8] sm:$0xff]  ;;  %v6328_v41 = vld [vmem:[#allocation3 + $0x2d8] sm:$0xff] }
 0x617   :  { %6529 = vmatprep.subr.bf16.mxu0 %v6282_v20  ;;  %6693 = vmatprep.subr.bf16.mxu1 %v6284_v21  ;;  %v6325_v20 = vld [vmem:[#allocation3 + $0x2c0] sm:$0xff]  ;;  %v6327_v21 = vld [vmem:[#allocation3 + $0x2d0] sm:$0xff] }
 0x61a   :  { %6530 = vmatpush1.bf16.msra.mxu0 %v6281_v6  ;;  %6694 = vmatpush1.bf16.msra.mxu1 %v6283_v36  ;;  %v6330_v6 = vld [vmem:[#allocation3 + $0x2e8] sm:$0xff]  ;;  %v6332_v36 = vld [vmem:[#allocation3 + $0x2f8] sm:$0xff] }
 0x61b   :  { %6531 = vmatprep.subr.bf16.mxu0 %v6286_v32  ;;  %6695 = vmatprep.subr.bf16.mxu1 %v6288_v33  ;;  %v6329_v32 = vld [vmem:[#allocation3 + $0x2e0] sm:$0xff]  ;;  %v6331_v33 = vld [vmem:[#allocation3 + $0x2f0] sm:$0xff] }
 0x61e   :  { %6532 = vmatpush1.bf16.msra.mxu0 %v6285_v51  ;;  %6696 = vmatpush1.bf16.msra.mxu1 %v6287_v54  ;;  %v6334_v51 = vld [vmem:[#allocation3 + $0x308] sm:$0xff]  ;;  %v6336_v54 = vld [vmem:[#allocation3 + $0x318] sm:$0xff] }
 0x61f   :  { %6533 = vmatprep.subr.bf16.mxu0 %v6290_v55  ;;  %6697 = vmatprep.subr.bf16.mxu1 %v6292_v2  ;;  %v6333_v55 = vld [vmem:[#allocation3 + $0x300] sm:$0xff]  ;;  %v6335_v2 = vld [vmem:[#allocation3 + $0x310] sm:$0xff] }
 0x622   :  { %6534 = vmatpush1.bf16.msra.mxu0 %v6289_v19  ;;  %6698 = vmatpush1.bf16.msra.mxu1 %v6291_v5  ;;  %v6338_v19 = vld [vmem:[#allocation3 + $0x328] sm:$0xff]  ;;  %v6340_v5 = vld [vmem:[#allocation3 + $0x338] sm:$0xff] }
 0x623   :  { %6535 = vmatprep.subr.bf16.mxu0 %v6294_v13  ;;  %6699 = vmatprep.subr.bf16.mxu1 %v6296_v22  ;;  %v6337_v13 = vld [vmem:[#allocation3 + $0x320] sm:$0xff]  ;;  %v6339_v22 = vld [vmem:[#allocation3 + $0x330] sm:$0xff] }
 0x626   :  { %6536 = vmatpush1.bf16.msra.mxu0 %v6293_v23  ;;  %6700 = vmatpush1.bf16.msra.mxu1 %v6295_v27  ;;  %v6342_v23 = vld [vmem:[#allocation3 + $0x348] sm:$0xff]  ;;  %v6344_v27 = vld [vmem:[#allocation3 + $0x358] sm:$0xff] }
 0x627   :  { %6537 = vmatprep.subr.bf16.mxu0 %v6298_v42  ;;  %6701 = vmatprep.subr.bf16.mxu1 %v6300_v61  ;;  %v6341_v42 = vld [vmem:[#allocation3 + $0x340] sm:$0xff]  ;;  %v6343_v61 = vld [vmem:[#allocation3 + $0x350] sm:$0xff] }
 0x62a   :  { %6538 = vmatpush1.bf16.msra.mxu0 %v6297_v3  ;;  %6702 = vmatpush1.bf16.msra.mxu1 %v6299_v9  ;;  %v6346_v3 = vld [vmem:[#allocation3 + $0x368] sm:$0xff]  ;;  %v6348_v9 = vld [vmem:[#allocation3 + $0x378] sm:$0xff] }
 0x62b   :  { %6548 = vmatprep.subr.bf16.mxu0 %v6302_v45  ;;  %6712 = vmatprep.subr.bf16.mxu1 %v6304_v31  ;;  %v6345_v45 = vld [vmem:[#allocation3 + $0x360] sm:$0xff]  ;;  %v6347_v31 = vld [vmem:[#allocation3 + $0x370] sm:$0xff] }
 0x62d   :  { %6540 = vmatmul.mubr.bf16.vlgmr.msra.gmra.mrb[96].mxu0 %v9858_v57  ;;  %6704 = vmatmul.mubr.bf16.vlgmr.msra.gmra.mrb[8].mxu1 %v9858_v57 }
 0x62e   :  { %6549 = vmatpush1.bf16.msra.mxu0 %v6301_v29  ;;  %6713 = vmatpush1.bf16.msra.mxu1 %v6303_v24  ;;  %v6350_v29 = vld [vmem:[#allocation3 + $0x388] sm:$0xff]  ;;  %v6352_v24 = vld [vmem:[#allocation3 + $0x398] sm:$0xff] }
 0x62f   :  { %6550 = vmatprep.subr.bf16.mxu0 %v6306_v17  ;;  %6714 = vmatprep.subr.bf16.mxu1 %v6308_v56  ;;  %v6349_v17 = vld [vmem:[#allocation3 + $0x380] sm:$0xff]  ;;  %v6351_v56 = vld [vmem:[#allocation3 + $0x390] sm:$0xff] }
 0x630   :  { %6580 = vmatprep.mubr.bf16.mxu0 %v6498_v18  ;;  %6744 = vmatprep.mubr.bf16.mxu1 %v6498_v18  ;;  %v6354_v18 = vld [vmem:[#allocation3 + $0x3a8] sm:$0xff] }
 0x632   :  { %6551 = vmatpush1.bf16.msra.mxu0 %v6305_v49  ;;  %6715 = vmatpush1.bf16.msra.mxu1 %v6307_v38  ;;  %v6356_v49 = vld [vmem:[#allocation3 + $0x3b8] sm:$0xff]  ;;  %v6353_v38 = vld [vmem:[#allocation3 + $0x3a0] sm:$0xff] }
 0x633   :  { %6552 = vmatprep.subr.bf16.mxu0 %v6310_v8  ;;  %6716 = vmatprep.subr.bf16.mxu1 %v6312_v48  ;;  %v6355_v8 = vld [vmem:[#allocation3 + $0x3b0] sm:$0xff]  ;;  %v6358_v48 = vld [vmem:[#allocation3 + $0x3c8] sm:$0xff] }
 0x636   :  { %6553 = vmatpush1.bf16.msra.mxu0 %v6309_v58  ;;  %6717 = vmatpush1.bf16.msra.mxu1 %v6311_v63  ;;  %v6360_v58 = vld [vmem:[#allocation3 + $0x3d8] sm:$0xff]  ;;  %v6357_v63 = vld [vmem:[#allocation3 + $0x3c0] sm:$0xff] }
 0x637   :  { %6554 = vmatprep.subr.bf16.mxu0 %v6314_v14  ;;  %6718 = vmatprep.subr.bf16.mxu1 %v6316_v26  ;;  %v6359_v14 = vld [vmem:[#allocation3 + $0x3d0] sm:$0xff]  ;;  %v6362_v26 = vld [vmem:[#allocation3 + $0x3e8] sm:$0xff] }
 0x63a   :  { %6555 = vmatpush1.bf16.msra.mxu0 %v6313_v60  ;;  %6719 = vmatpush1.bf16.msra.mxu1 %v6315_v4  ;;  %v6364_v60 = vld [vmem:[#allocation3 + $0x3f8] sm:$0xff]  ;;  %v6361_v4 = vld [vmem:[#allocation3 + $0x3e0] sm:$0xff] }
 0x63b   :  { %6556 = vmatprep.subr.bf16.mxu0 %v6318_v25  ;;  %6720 = vmatprep.subr.bf16.mxu1 %v6320_v28  ;;  %v6363_v25 = vld [vmem:[#allocation3 + $0x3f0] sm:$0xff]  ;;  %v6366_v28 = vld [vmem:[#allocation3 + $0x408] sm:$0xff] }
 0x63e   :  { %6557 = vmatpush1.bf16.msra.mxu0 %v6317_v12  ;;  %6721 = vmatpush1.bf16.msra.mxu1 %v6319_v34  ;;  %v6368_v12 = vld [vmem:[#allocation3 + $0x418] sm:$0xff]  ;;  %v6497_v34 = vrot.slane %v9858_v57, 4  ;;  %v6369_v57 = vld [vmem:[#allocation3 + $0x420] sm:$0xff] }
 0x63f   :  { %6558 = vmatprep.subr.bf16.mxu0 %v6322_v50  ;;  %6722 = vmatprep.subr.bf16.mxu1 %v6324_v62  ;;  %v6365_v50 = vld [vmem:[#allocation3 + $0x400] sm:$0xff]  ;;  %v6367_v62 = vld [vmem:[#allocation3 + $0x410] sm:$0xff] }
 0x642   :  { %6559 = vmatpush1.bf16.msra.mxu0 %v6321_v7  ;;  %6723 = vmatpush1.bf16.msra.mxu1 %v6323_v15  ;;  %v6370_v7 = vld [vmem:[#allocation3 + $0x428] sm:$0xff]  ;;  %v6372_v15 = vld [vmem:[#allocation3 + $0x438] sm:$0xff] }
 0x643   :  { %6560 = vmatprep.subr.bf16.mxu0 %v6326_v16  ;;  %6724 = vmatprep.subr.bf16.mxu1 %v6328_v41  ;;  %v9870_v16 = vpack.c.bf16 %v6228_v10, %v6226_v43  ;;  %v6371_v41 = vld [vmem:[#allocation3 + $0x430] sm:$0xff]  ;;  %v6377_v43 = vld [vmem:[#allocation3 + $0x460] sm:$0xff] }
 0x644   :  { %v6379_v10 = vld [vmem:[#allocation3 + $0x470] sm:$0xff] }
 0x646   :  { %6561 = vmatpush1.bf16.msra.mxu0 %v6325_v20  ;;  %6725 = vmatpush1.bf16.msra.mxu1 %v6327_v21  ;;  %v6374_v20 = vld [vmem:[#allocation3 + $0x448] sm:$0xff]  ;;  %v6376_v21 = vld [vmem:[#allocation3 + $0x458] sm:$0xff] }
 0x647   :  { %6562 = vmatprep.subr.bf16.mxu0 %v6330_v6  ;;  %6726 = vmatprep.subr.bf16.mxu1 %v6332_v36  ;;  %v6382_v6 = vld [vmem:[#allocation3 + $0x488] sm:$0xff]  ;;  %v6384_v36 = vld [vmem:[#allocation3 + $0x498] sm:$0xff] }
 0x64a   :  { %6563 = vmatpush1.bf16.msra.mxu0 %v6329_v32  ;;  %6727 = vmatpush1.bf16.msra.mxu1 %v6331_v33  ;;  %v6381_v32 = vld [vmem:[#allocation3 + $0x480] sm:$0xff]  ;;  %v6383_v33 = vld [vmem:[#allocation3 + $0x490] sm:$0xff] }
 0x64b   :  { %6564 = vmatprep.subr.bf16.mxu0 %v6334_v51  ;;  %6728 = vmatprep.subr.bf16.mxu1 %v6336_v54  ;;  %v6386_v51 = vld [vmem:[#allocation3 + $0x4a8] sm:$0xff]  ;;  %v6388_v54 = vld [vmem:[#allocation3 + $0x4b8] sm:$0xff] }
 0x64e   :  { %6565 = vmatpush1.bf16.msra.mxu0 %v6333_v55  ;;  %6729 = vmatpush1.bf16.msra.mxu1 %v6335_v2  ;;  %v6385_v55 = vld [vmem:[#allocation3 + $0x4a0] sm:$0xff]  ;;  %v6387_v2 = vld [vmem:[#allocation3 + $0x4b0] sm:$0xff] }
 0x64f   :  { %6566 = vmatprep.subr.bf16.mxu0 %v6338_v19  ;;  %6730 = vmatprep.subr.bf16.mxu1 %v6340_v5  ;;  %v6390_v19 = vld [vmem:[#allocation3 + $0x4c8] sm:$0xff]  ;;  %v6392_v5 = vld [vmem:[#allocation3 + $0x4d8] sm:$0xff] }
 0x652   :  { %6567 = vmatpush1.bf16.msra.mxu0 %v6337_v13  ;;  %6731 = vmatpush1.bf16.msra.mxu1 %v6339_v22  ;;  %v6389_v13 = vld [vmem:[#allocation3 + $0x4c0] sm:$0xff]  ;;  %v6391_v22 = vld [vmem:[#allocation3 + $0x4d0] sm:$0xff] }
 0x653   :  { %6568 = vmatprep.subr.bf16.mxu0 %v6342_v23  ;;  %6732 = vmatprep.subr.bf16.mxu1 %v6344_v27  ;;  %v6394_v23 = vld [vmem:[#allocation3 + $0x4e8] sm:$0xff]  ;;  %v6396_v27 = vld [vmem:[#allocation3 + $0x4f8] sm:$0xff] }
 0x656   :  { %6569 = vmatpush1.bf16.msra.mxu0 %v6341_v42  ;;  %6733 = vmatpush1.bf16.msra.mxu1 %v6343_v61  ;;  %v6393_v42 = vld [vmem:[#allocation3 + $0x4e0] sm:$0xff]  ;;  %v6395_v61 = vld [vmem:[#allocation3 + $0x4f0] sm:$0xff] }
 0x657   :  { %6570 = vmatprep.subr.bf16.mxu0 %v6346_v3  ;;  %6734 = vmatprep.subr.bf16.mxu1 %v6348_v9  ;;  %v6398_v3 = vld [vmem:[#allocation3 + $0x508] sm:$0xff]  ;;  %v6400_v9 = vld [vmem:[#allocation3 + $0x518] sm:$0xff] }
 0x65a   :  { %6571 = vmatpush1.bf16.msra.mxu0 %v6345_v45  ;;  %6735 = vmatpush1.bf16.msra.mxu1 %v6347_v31  ;;  %v6397_v45 = vld [vmem:[#allocation3 + $0x500] sm:$0xff]  ;;  %v6399_v31 = vld [vmem:[#allocation3 + $0x510] sm:$0xff] }
 0x65b   :  { %6572 = vmatprep.subr.bf16.mxu0 %v6350_v29  ;;  %6736 = vmatprep.subr.bf16.mxu1 %v6352_v24  ;;  %v6402_v29 = vld [vmem:[#allocation3 + $0x528] sm:$0xff]  ;;  %v6404_v24 = vld [vmem:[#allocation3 + $0x538] sm:$0xff] }
 0x65e   :  { %6573 = vmatpush1.bf16.msra.mxu0 %v6349_v17  ;;  %6737 = vmatpush1.bf16.msra.mxu1 %v6351_v56  ;;  %v6401_v17 = vld [vmem:[#allocation3 + $0x520] sm:$0xff]  ;;  %v6403_v56 = vld [vmem:[#allocation3 + $0x530] sm:$0xff] }
 0x65f   :  { %6574 = vmatprep.subr.bf16.mxu0 %v6354_v18  ;;  %6738 = vmatprep.subr.bf16.mxu1 %v6356_v49  ;;  %v6406_v18 = vld [vmem:[#allocation3 + $0x548] sm:$0xff]  ;;  %v6408_v49 = vld [vmem:[#allocation3 + $0x558] sm:$0xff] }
 0x662   :  { %6575 = vmatpush1.bf16.msra.mxu0 %v6353_v38  ;;  %6739 = vmatpush1.bf16.msra.mxu1 %v6355_v8  ;;  %v6405_v38 = vld [vmem:[#allocation3 + $0x540] sm:$0xff]  ;;  %v6407_v8 = vld [vmem:[#allocation3 + $0x550] sm:$0xff] }
 0x663   :  { %6576 = vmatprep.subr.bf16.mxu0 %v6358_v48  ;;  %6740 = vmatprep.subr.bf16.mxu1 %v6360_v58  ;;  %v6410_v48 = vld [vmem:[#allocation3 + $0x568] sm:$0xff]  ;;  %v6412_v58 = vld [vmem:[#allocation3 + $0x578] sm:$0xff] }
 0x666   :  { %6577 = vmatpush1.bf16.msra.mxu0 %v6357_v63  ;;  %6741 = vmatpush1.bf16.msra.mxu1 %v6359_v14  ;;  %v6409_v63 = vld [vmem:[#allocation3 + $0x560] sm:$0xff]  ;;  %v6411_v14 = vld [vmem:[#allocation3 + $0x570] sm:$0xff] }
 0x667   :  { %6578 = vmatprep.subr.bf16.mxu0 %v6362_v26  ;;  %6742 = vmatprep.subr.bf16.mxu1 %v6364_v60  ;;  %v6414_v26 = vld [vmem:[#allocation3 + $0x588] sm:$0xff]  ;;  %v6416_v60 = vld [vmem:[#allocation3 + $0x598] sm:$0xff] }
 0x66a   :  { %6579 = vmatpush1.bf16.msra.mxu0 %v6361_v4  ;;  %6743 = vmatpush1.bf16.msra.mxu1 %v6363_v25  ;;  %v6413_v4 = vld [vmem:[#allocation3 + $0x580] sm:$0xff]  ;;  %v6415_v25 = vld [vmem:[#allocation3 + $0x590] sm:$0xff] }
 0x66b   :  { %6589 = vmatprep.subr.bf16.mxu0 %v6366_v28  ;;  %6753 = vmatprep.subr.bf16.mxu1 %v6368_v12  ;;  %v6418_v28 = vld [vmem:[#allocation3 + $0x5a8] sm:$0xff]  ;;  %v6420_v12 = vld [vmem:[#allocation3 + $0x5b8] sm:$0xff] }
 0x66d   :  { %6581 = vmatmul.mubr.bf16.vlgmr.msra.gmra.mrb[96].mxu0 %v6497_v34  ;;  %6745 = vmatmul.mubr.bf16.vlgmr.msra.gmra.mrb[8].mxu1 %v6497_v34  ;;  %v6417_v34 = vld [vmem:[#allocation3 + $0x5a0] sm:$0xff] }
 0x66e   :  { %6590 = vmatpush1.bf16.msra.mxu0 %v6365_v50  ;;  %6754 = vmatpush1.bf16.msra.mxu1 %v6367_v62  ;;  %v6419_v50 = vld [vmem:[#allocation3 + $0x5b0] sm:$0xff]  ;;  %v6422_v62 = vld [vmem:[#allocation3 + $0x5c8] sm:$0xff] }
 0x66f   :  { %6591 = vmatprep.subr.bf16.mxu0 %v6370_v7  ;;  %6755 = vmatprep.subr.bf16.mxu1 %v6372_v15  ;;  %v6424_v7 = vld [vmem:[#allocation3 + $0x5d8] sm:$0xff]  ;;  %v6421_v15 = vld [vmem:[#allocation3 + $0x5c0] sm:$0xff] }
 0x670   :  { %6621 = vmatprep.mubr.bf16.mxu0 %v9870_v16  ;;  %6785 = vmatprep.mubr.bf16.mxu1 %v9870_v16 }
 0x672   :  { %6592 = vmatpush1.bf16.msra.mxu0 %v6369_v57  ;;  %6756 = vmatpush1.bf16.msra.mxu1 %v6371_v41  ;;  %v6423_v57 = vld [vmem:[#allocation3 + $0x5d0] sm:$0xff]  ;;  %v6426_v41 = vld [vmem:[#allocation3 + $0x5e8] sm:$0xff] }
 0x673   :  { %6593 = vmatprep.subr.bf16.mxu0 %v6374_v20  ;;  %6757 = vmatprep.subr.bf16.mxu1 %v6376_v21  ;;  %v6428_v20 = vld [vmem:[#allocation3 + $0x5f8] sm:$0xff]  ;;  %v6425_v21 = vld [vmem:[#allocation3 + $0x5e0] sm:$0xff] }
 0x676   :  { %6594 = vmatpush1.bf16.msra.mxu0 %v6373_v46  ;;  %6758 = vmatpush1.bf16.msra.mxu1 %v6375_v40  ;;  %v6427_v46 = vld [vmem:[#allocation3 + $0x5f0] sm:$0xff]  ;;  %v6430_v40 = vld [vmem:[#allocation3 + $0x608] sm:$0xff] }
 0x677   :  { %6595 = vmatprep.subr.bf16.mxu0 %v6378_v47  ;;  %6759 = vmatprep.subr.bf16.mxu1 %v6380_v44  ;;  %v6432_v47 = vld [vmem:[#allocation3 + $0x618] sm:$0xff]  ;;  %v9880_v44 = vpack.c.bf16 %v6227_v1, %v6225_v11  ;;  %v6437_v11 = vld [vmem:[#allocation3 + $0x640] sm:$0xff]  ;;  %v6439_v1 = vld [vmem:[#allocation3 + $0x650] sm:$0xff] }
 0x67a   :  { %6596 = vmatpush1.bf16.msra.mxu0 %v6377_v43  ;;  %6760 = vmatpush1.bf16.msra.mxu1 %v6379_v10  ;;  %v6429_v43 = vld [vmem:[#allocation3 + $0x600] sm:$0xff]  ;;  %v6431_v10 = vld [vmem:[#allocation3 + $0x610] sm:$0xff] }
 0x67b   :  { %6597 = vmatprep.subr.bf16.mxu0 %v6382_v6  ;;  %6761 = vmatprep.subr.bf16.mxu1 %v6384_v36  ;;  %v6434_v6 = vld [vmem:[#allocation3 + $0x628] sm:$0xff]  ;;  %v6436_v36 = vld [vmem:[#allocation3 + $0x638] sm:$0xff] }
 0x67e   :  { %6598 = vmatpush1.bf16.msra.mxu0 %v6381_v32  ;;  %6762 = vmatpush1.bf16.msra.mxu1 %v6383_v33  ;;  %v6504_v32 = vrot.slane %v9870_v16, 4  ;;  %v6442_v16 = vld [vmem:[#allocation3 + $0x668] sm:$0xff]  ;;  %v6444_v33 = vld [vmem:[#allocation3 + $0x678] sm:$0xff] }
 0x67f   :  { %6599 = vmatprep.subr.bf16.mxu0 %v6386_v51  ;;  %6763 = vmatprep.subr.bf16.mxu1 %v6388_v54  ;;  %v6441_v51 = vld [vmem:[#allocation3 + $0x660] sm:$0xff]  ;;  %v6443_v54 = vld [vmem:[#allocation3 + $0x670] sm:$0xff] }
 0x682   :  { %6600 = vmatpush1.bf16.msra.mxu0 %v6385_v55  ;;  %6764 = vmatpush1.bf16.msra.mxu1 %v6387_v2  ;;  %v6446_v55 = vld [vmem:[#allocation3 + $0x688] sm:$0xff]  ;;  %v6448_v2 = vld [vmem:[#allocation3 + $0x698] sm:$0xff] }
 0x683   :  { %6601 = vmatprep.subr.bf16.mxu0 %v6390_v19  ;;  %6765 = vmatprep.subr.bf16.mxu1 %v6392_v5  ;;  %v6445_v19 = vld [vmem:[#allocation3 + $0x680] sm:$0xff]  ;;  %v6447_v5 = vld [vmem:[#allocation3 + $0x690] sm:$0xff] }
 0x686   :  { %6602 = vmatpush1.bf16.msra.mxu0 %v6389_v13  ;;  %6766 = vmatpush1.bf16.msra.mxu1 %v6391_v22  ;;  %v6450_v13 = vld [vmem:[#allocation3 + $0x6a8] sm:$0xff]  ;;  %v6452_v22 = vld [vmem:[#allocation3 + $0x6b8] sm:$0xff] }
 0x687   :  { %6603 = vmatprep.subr.bf16.mxu0 %v6394_v23  ;;  %6767 = vmatprep.subr.bf16.mxu1 %v6396_v27  ;;  %v6449_v23 = vld [vmem:[#allocation3 + $0x6a0] sm:$0xff]  ;;  %v6451_v27 = vld [vmem:[#allocation3 + $0x6b0] sm:$0xff] }
 0x68a   :  { %6604 = vmatpush1.bf16.msra.mxu0 %v6393_v42  ;;  %6768 = vmatpush1.bf16.msra.mxu1 %v6395_v61  ;;  %v6454_v42 = vld [vmem:[#allocation3 + $0x6c8] sm:$0xff]  ;;  %v6456_v61 = vld [vmem:[#allocation3 + $0x6d8] sm:$0xff] }
 0x68b   :  { %6605 = vmatprep.subr.bf16.mxu0 %v6398_v3  ;;  %6769 = vmatprep.subr.bf16.mxu1 %v6400_v9  ;;  %v6453_v3 = vld [vmem:[#allocation3 + $0x6c0] sm:$0xff]  ;;  %v6455_v9 = vld [vmem:[#allocation3 + $0x6d0] sm:$0xff] }
 0x68e   :  { %6606 = vmatpush1.bf16.msra.mxu0 %v6397_v45  ;;  %6770 = vmatpush1.bf16.msra.mxu1 %v6399_v31  ;;  %v6458_v45 = vld [vmem:[#allocation3 + $0x6e8] sm:$0xff]  ;;  %v6460_v31 = vld [vmem:[#allocation3 + $0x6f8] sm:$0xff] }
 0x68f   :  { %6607 = vmatprep.subr.bf16.mxu0 %v6402_v29  ;;  %6771 = vmatprep.subr.bf16.mxu1 %v6404_v24  ;;  %v6457_v29 = vld [vmem:[#allocation3 + $0x6e0] sm:$0xff]  ;;  %v6459_v24 = vld [vmem:[#allocation3 + $0x6f0] sm:$0xff] }
 0x692   :  { %6608 = vmatpush1.bf16.msra.mxu0 %v6401_v17  ;;  %6772 = vmatpush1.bf16.msra.mxu1 %v6403_v56  ;;  %v6462_v17 = vld [vmem:[#allocation3 + $0x708] sm:$0xff]  ;;  %v6464_v56 = vld [vmem:[#allocation3 + $0x718] sm:$0xff] }
 0x693   :  { %6609 = vmatprep.subr.bf16.mxu0 %v6406_v18  ;;  %6773 = vmatprep.subr.bf16.mxu1 %v6408_v49  ;;  %v6461_v18 = vld [vmem:[#allocation3 + $0x700] sm:$0xff]  ;;  %v6463_v49 = vld [vmem:[#allocation3 + $0x710] sm:$0xff] }
 0x696   :  { %6610 = vmatpush1.bf16.msra.mxu0 %v6405_v38  ;;  %6774 = vmatpush1.bf16.msra.mxu1 %v6407_v8  ;;  %v6466_v38 = vld [vmem:[#allocation3 + $0x728] sm:$0xff]  ;;  %v6468_v8 = vld [vmem:[#allocation3 + $0x738] sm:$0xff] }
 0x697   :  { %6611 = vmatprep.subr.bf16.mxu0 %v6410_v48  ;;  %6775 = vmatprep.subr.bf16.mxu1 %v6412_v58  ;;  %v6465_v48 = vld [vmem:[#allocation3 + $0x720] sm:$0xff]  ;;  %v6467_v58 = vld [vmem:[#allocation3 + $0x730] sm:$0xff] }
 0x69a   :  { %6612 = vmatpush1.bf16.msra.mxu0 %v6409_v63  ;;  %6776 = vmatpush1.bf16.msra.mxu1 %v6411_v14  ;;  %v6470_v63 = vld [vmem:[#allocation3 + $0x748] sm:$0xff]  ;;  %v6472_v14 = vld [vmem:[#allocation3 + $0x758] sm:$0xff] }
 0x69b   :  { %6613 = vmatprep.subr.bf16.mxu0 %v6414_v26  ;;  %6777 = vmatprep.subr.bf16.mxu1 %v6416_v60  ;;  %v6469_v26 = vld [vmem:[#allocation3 + $0x740] sm:$0xff]  ;;  %v6471_v60 = vld [vmem:[#allocation3 + $0x750] sm:$0xff] }
 0x69e   :  { %6614 = vmatpush1.bf16.msra.mxu0 %v6413_v4  ;;  %6778 = vmatpush1.bf16.msra.mxu1 %v6415_v25  ;;  %v6474_v4 = vld [vmem:[#allocation3 + $0x768] sm:$0xff]  ;;  %v6476_v25 = vld [vmem:[#allocation3 + $0x778] sm:$0xff] }
 0x69f   :  { %6615 = vmatprep.subr.bf16.mxu0 %v6418_v28  ;;  %6779 = vmatprep.subr.bf16.mxu1 %v6420_v12  ;;  %v6473_v28 = vld [vmem:[#allocation3 + $0x760] sm:$0xff]  ;;  %v6475_v12 = vld [vmem:[#allocation3 + $0x770] sm:$0xff] }
 0x6a2   :  { %6616 = vmatpush1.bf16.msra.mxu0 %v6417_v34  ;;  %6780 = vmatpush1.bf16.msra.mxu1 %v6419_v50  ;;  %v6478_v34 = vld [vmem:[#allocation3 + $0x788] sm:$0xff]  ;;  %v6480_v50 = vld [vmem:[#allocation3 + $0x798] sm:$0xff] }
 0x6a3   :  { %6617 = vmatprep.subr.bf16.mxu0 %v6422_v62  ;;  %6781 = vmatprep.subr.bf16.mxu1 %v6424_v7  ;;  %v6477_v62 = vld [vmem:[#allocation3 + $0x780] sm:$0xff]  ;;  %v6479_v7 = vld [vmem:[#allocation3 + $0x790] sm:$0xff] }
 0x6a6   :  { %6618 = vmatpush1.bf16.msra.mxu0 %v6421_v15  ;;  %6782 = vmatpush1.bf16.msra.mxu1 %v6423_v57  ;;  %v6482_v15 = vld [vmem:[#allocation3 + $0x7a8] sm:$0xff]  ;;  %v6484_v57 = vld [vmem:[#allocation3 + $0x7b8] sm:$0xff] }
 0x6a7   :  { %6619 = vmatprep.subr.bf16.mxu0 %v6426_v41  ;;  %6783 = vmatprep.subr.bf16.mxu1 %v6428_v20  ;;  %v6481_v41 = vld [vmem:[#allocation3 + $0x7a0] sm:$0xff]  ;;  %v6483_v20 = vld [vmem:[#allocation3 + $0x7b0] sm:$0xff] }
 0x6aa   :  { %6620 = vmatpush1.bf16.msra.mxu0 %v6425_v21  ;;  %6784 = vmatpush1.bf16.msra.mxu1 %v6427_v46  ;;  %v6486_v21 = vld [vmem:[#allocation3 + $0x7c8] sm:$0xff]  ;;  %v6488_v46 = vld [vmem:[#allocation3 + $0x7d8] sm:$0xff] }
 0x6ab   :  { %6630 = vmatprep.subr.bf16.mxu0 %v6430_v40  ;;  %6794 = vmatprep.subr.bf16.mxu1 %v6432_v47  ;;  %v6485_v40 = vld [vmem:[#allocation3 + $0x7c0] sm:$0xff]  ;;  %v6487_v47 = vld [vmem:[#allocation3 + $0x7d0] sm:$0xff] }
 0x6ad   :  { %6622 = vmatmul.mubr.bf16.vlgmr.msra.gmra.mrb[96].mxu0 %v9880_v44  ;;  %6786 = vmatmul.mubr.bf16.vlgmr.msra.gmra.mrb[8].mxu1 %v9880_v44 }
 0x6ae   :  { %6631 = vmatpush1.bf16.msra.mxu0 %v6429_v43  ;;  %6795 = vmatpush1.bf16.msra.mxu1 %v6431_v10  ;;  %v6490_v43 = vld [vmem:[#allocation3 + $0x7e8] sm:$0xff]  ;;  %v6492_v10 = vld [vmem:[#allocation3 + $0x7f8] sm:$0xff] }
 0x6af   :  { %6632 = vmatprep.subr.bf16.mxu0 %v6434_v6  ;;  %6796 = vmatprep.subr.bf16.mxu1 %v6436_v36  ;;  %v6489_v6 = vld [vmem:[#allocation3 + $0x7e0] sm:$0xff]  ;;  %v6491_v36 = vld [vmem:[#allocation3 + $0x7f0] sm:$0xff] }
 0x6b0   :  { %6662 = vmatprep.mubr.bf16.mxu0 %v6504_v32  ;;  %6826 = vmatprep.mubr.bf16.mxu1 %v6504_v32  ;;  %v6503_v32 = vrot.slane %v9880_v44, 4 }
 0x6b2   :  { %6633 = vmatpush1.bf16.msra.mxu0 %v6433_v35  ;;  %6797 = vmatpush1.bf16.msra.mxu1 %v6435_v39 }
 0x6b3   :  { %6634 = vmatprep.subr.bf16.mxu0 %v6438_v52  ;;  %6798 = vmatprep.subr.bf16.mxu1 %v6440_v53 }
 0x6b6   :  { %6635 = vmatpush1.bf16.msra.mxu0 %v6437_v11  ;;  %6799 = vmatpush1.bf16.msra.mxu1 %v6439_v1 }
 0x6b7   :  { %6636 = vmatprep.subr.bf16.mxu0 %v6442_v16  ;;  %6800 = vmatprep.subr.bf16.mxu1 %v6444_v33 }
 0x6ba   :  { %6637 = vmatpush1.bf16.msra.mxu0 %v6441_v51  ;;  %6801 = vmatpush1.bf16.msra.mxu1 %v6443_v54 }
 0x6bb   :  { %6638 = vmatprep.subr.bf16.mxu0 %v6446_v55  ;;  %6802 = vmatprep.subr.bf16.mxu1 %v6448_v2 }
 0x6be   :  { %6639 = vmatpush1.bf16.msra.mxu0 %v6445_v19  ;;  %6803 = vmatpush1.bf16.msra.mxu1 %v6447_v5 }
 0x6bf   :  { %6640 = vmatprep.subr.bf16.mxu0 %v6450_v13  ;;  %6804 = vmatprep.subr.bf16.mxu1 %v6452_v22 }
 0x6c2   :  { %6641 = vmatpush1.bf16.msra.mxu0 %v6449_v23  ;;  %6805 = vmatpush1.bf16.msra.mxu1 %v6451_v27 }
 0x6c3   :  { %6642 = vmatprep.subr.bf16.mxu0 %v6454_v42  ;;  %6806 = vmatprep.subr.bf16.mxu1 %v6456_v61 }
 0x6c6   :  { %6643 = vmatpush1.bf16.msra.mxu0 %v6453_v3  ;;  %6807 = vmatpush1.bf16.msra.mxu1 %v6455_v9 }
 0x6c7   :  { %6644 = vmatprep.subr.bf16.mxu0 %v6458_v45  ;;  %6808 = vmatprep.subr.bf16.mxu1 %v6460_v31 }
 0x6ca   :  { %6645 = vmatpush1.bf16.msra.mxu0 %v6457_v29  ;;  %6809 = vmatpush1.bf16.msra.mxu1 %v6459_v24 }
 0x6cb   :  { %6646 = vmatprep.subr.bf16.mxu0 %v6462_v17  ;;  %6810 = vmatprep.subr.bf16.mxu1 %v6464_v56 }
 0x6ce   :  { %6647 = vmatpush1.bf16.msra.mxu0 %v6461_v18  ;;  %6811 = vmatpush1.bf16.msra.mxu1 %v6463_v49 }
 0x6cf   :  { %6648 = vmatprep.subr.bf16.mxu0 %v6466_v38  ;;  %6812 = vmatprep.subr.bf16.mxu1 %v6468_v8 }
 0x6d2   :  { %6649 = vmatpush1.bf16.msra.mxu0 %v6465_v48  ;;  %6813 = vmatpush1.bf16.msra.mxu1 %v6467_v58 }
 0x6d3   :  { %6650 = vmatprep.subr.bf16.mxu0 %v6470_v63  ;;  %6814 = vmatprep.subr.bf16.mxu1 %v6472_v14 }
 0x6d6   :  { %6651 = vmatpush1.bf16.msra.mxu0 %v6469_v26  ;;  %6815 = vmatpush1.bf16.msra.mxu1 %v6471_v60 }
 0x6d7   :  { %6652 = vmatprep.subr.bf16.mxu0 %v6474_v4  ;;  %6816 = vmatprep.subr.bf16.mxu1 %v6476_v25 }
 0x6da   :  { %6653 = vmatpush1.bf16.msra.mxu0 %v6473_v28  ;;  %6817 = vmatpush1.bf16.msra.mxu1 %v6475_v12 }
 0x6db   :  { %6654 = vmatprep.subr.bf16.mxu0 %v6478_v34  ;;  %6818 = vmatprep.subr.bf16.mxu1 %v6480_v50 }
 0x6de   :  { %6655 = vmatpush1.bf16.msra.mxu0 %v6477_v62  ;;  %6819 = vmatpush1.bf16.msra.mxu1 %v6479_v7 }
 0x6df   :  { %6656 = vmatprep.subr.bf16.mxu0 %v6482_v15  ;;  %6820 = vmatprep.subr.bf16.mxu1 %v6484_v57 }
 0x6e2   :  { %6657 = vmatpush1.bf16.msra.mxu0 %v6481_v41  ;;  %6821 = vmatpush1.bf16.msra.mxu1 %v6483_v20 }
 0x6e3   :  { %6658 = vmatprep.subr.bf16.mxu0 %v6486_v21  ;;  %6822 = vmatprep.subr.bf16.mxu1 %v6488_v46 }
 0x6e6   :  { %6659 = vmatpush1.bf16.msra.mxu0 %v6485_v40  ;;  %6823 = vmatpush1.bf16.msra.mxu1 %v6487_v47 }
 0x6e7   :  { %6660 = vmatprep.subr.bf16.mxu0 %v6490_v43  ;;  %6824 = vmatprep.subr.bf16.mxu1 %v6492_v10 }
 0x6ea   :  { %6661 = vmatpush1.bf16.msra.mxu0 %v6489_v6  ;;  %6825 = vmatpush1.bf16.msra.mxu1 %v6491_v36 }
 0x6ed   :  { %6663 = vmatmul.mubr.bf16.vlgmr.msra.gmra.mrb[96].mxu0 %v6503_v32  ;;  %6827 = vmatmul.mubr.bf16.vlgmr.msra.gmra.mrb[8].mxu1 %v6503_v32 }
 0x7c0   :  { %v9886_v35 = vpop.f32.mrb[96].mxu0  ;;  %v9888_v39 = vpop.f32.mrb[8].mxu1 }
 0x7c1   :  { %v6835_v52 = vrot.slane %v9886_v35, 4  ;;  %v6863_v53 = vmul.f32 %v9886_v35, %v9886_v35  ;;  %v6847_v11 = vrot.slane %v9888_v39, 4  ;;  %v6865_v1 = vmul.f32 %v9888_v39, %v9888_v39  ;;  %v9896_v16 = vpop.f32.mrb[97].mxu0  ;;  %v9898_v44 = vpop.f32.mrb[9].mxu1 }
 0x7c2   :  { %v6841_v33 = vrot.slane %v9896_v16, 4  ;;  %v6864_v51 = vmul.f32 %v9896_v16, %v9896_v16  ;;  %v6853_v54 = vrot.slane %v9898_v44, 4  ;;  %v6866_v55 = vmul.f32 %v9898_v44, %v9898_v44  ;;  %v6668_v2 = vpop.f32.mrb[98].mxu0  ;;  %v6832_v19 = vpop.f32.mrb[10].mxu1 }
 0x7c3   :  { %v6836_v5 = vadd.f32 %v6835_v52, %v9886_v35  ;;  %v6867_v13 = vrot.slane %v6863_v53, 4  ;;  %v6848_v22 = vadd.f32 %v6847_v11, %v9888_v39  ;;  %v6879_v23 = vrot.slane %v6865_v1, 4  ;;  %v6669_v27 = vpop.f32.mrb[99].mxu0  ;;  %v6833_v42 = vpop.f32.mrb[11].mxu1 }
 0x7c4   :  { %v6842_v61 = vadd.f32 %v6841_v33, %v9896_v16  ;;  %v6873_v3 = vrot.slane %v6864_v51, 4  ;;  %v6854_v9 = vadd.f32 %v6853_v54, %v9898_v44  ;;  %v6885_v45 = vrot.slane %v6866_v55, 4 }
 0x7c5   :  { %v6837_v31 = vrot.slane %v6836_v5, 2  ;;  %v6868_v29 = vadd.f32 %v6867_v13, %v6863_v53  ;;  %v6849_v24 = vrot.slane %v6848_v22, 2  ;;  %v6880_v17 = vadd.f32 %v6879_v23, %v6865_v1 }
 0x7c6   :  { %v6843_v56 = vrot.slane %v6842_v61, 2  ;;  %v6874_v18 = vadd.f32 %v6873_v3, %v6864_v51  ;;  %v6855_v49 = vrot.slane %v6854_v9, 2  ;;  %v6886_v38 = vadd.f32 %v6885_v45, %v6866_v55 }
 0x7c7   :  { %v6838_v8 = vadd.f32 %v6837_v31, %v6836_v5  ;;  %v6869_v48 = vrot.slane %v6868_v29, 2  ;;  %v6850_v58 = vadd.f32 %v6849_v24, %v6848_v22  ;;  %v6881_v63 = vrot.slane %v6880_v17, 2  ;;  %v6493_v31 = vld [vmem:[%s9957_s9] sm:$0xf] }
 0x7c8   :  { %v6844_v14 = vadd.f32 %v6843_v56, %v6842_v61  ;;  %v6875_v26 = vrot.slane %v6874_v18, 2  ;;  %v6856_v60 = vadd.f32 %v6855_v49, %v6854_v9  ;;  %v6887_v4 = vrot.slane %v6886_v38, 2 }
 0x7c9   :  { %v6839_v25 = vrot.slane %v6838_v8, 1  ;;  %v6870_v28 = vadd.f32 %v6869_v48, %v6868_v29  ;;  %v6851_v12 = vrot.slane %v6850_v58, 1  ;;  %v6882_v34 = vadd.f32 %v6881_v63, %v6880_v17 }
 0x7ca   :  { %v6845_v50 = vrot.slane %v6844_v14, 1  ;;  %v6876_v62 = vadd.f32 %v6875_v26, %v6874_v18  ;;  %v6857_v7 = vrot.slane %v6856_v60, 1  ;;  %v6888_v15 = vadd.f32 %v6887_v4, %v6886_v38 }
 0x7cb   :  { %v6840_v57 = vadd.f32 %v6839_v25, %v6838_v8  ;;  %v6871_v41 = vrot.slane %v6870_v28, 1  ;;  %v6852_v20 = vadd.f32 %v6851_v12, %v6850_v58  ;;  %v6883_v21 = vrot.slane %v6882_v34, 1 }
 0x7cc   :  { %v6846_v46 = vadd.f32 %v6845_v50, %v6844_v14  ;;  %v6877_v40 = vrot.slane %v6876_v62, 1  ;;  %v6858_v47 = vadd.f32 %v6857_v7, %v6856_v60  ;;  %v6889_v43 = vrot.slane %v6888_v15, 1 }
 0x7cd   :  { %v6859_v10 = vmul.f32 0.125, %v6840_v57  ;;  %v6872_v6 = vadd.f32 %v6871_v41, %v6870_v28  ;;  %v6861_v36 = vmul.f32 0.125, %v6852_v20  ;;  %v6884_v32 = vadd.f32 %v6883_v21, %v6882_v34  ;;  %v6494_v21 = vld [vmem:[%s9958_s10] sm:$0xf] }
 0x7ce   :  { %v6860_v52 = vmul.f32 0.125, %v6846_v46  ;;  %v6878_v53 = vadd.f32 %v6877_v40, %v6876_v62  ;;  %v6862_v11 = vmul.f32 0.125, %v6858_v47  ;;  %v6890_v1 = vadd.f32 %v6889_v43, %v6888_v15 }
 0x7cf   :  { %v6891_v33 = vmul.f32 0.125, %v6872_v6  ;;  %v6895_v51 = vmul.f32 %v6859_v10, %v6859_v10  ;;  %v6893_v54 = vmul.f32 0.125, %v6884_v32  ;;  %v6897_v55 = vmul.f32 %v6861_v36, %v6861_v36 }
 0x7d0   :  { %v6892_v2 = vmul.f32 0.125, %v6878_v53  ;;  %v6896_v19 = vmul.f32 %v6860_v52, %v6860_v52  ;;  %v6894_v5 = vmul.f32 0.125, %v6890_v1  ;;  %v6898_v13 = vmul.f32 %v6862_v11, %v6862_v11 }
 0x7d1   :  { %v6899_v22 = vsub.f32 %v6891_v33, %v6895_v51  ;;  %v6901_v23 = vsub.f32 %v6893_v54, %v6897_v55  ;;  %v6922_v29 = vsub.s32 2, %v9573_v59  ;;  %v6926_v24 = vsub.s32 3, %v9573_v59 }
 0x7d2   :  { %v6900_v27 = vsub.f32 %v6892_v2, %v6896_v19  ;;  %v6902_v42 = vsub.f32 %v6894_v5, %v6898_v13  ;;  %v6915_v17 = vrot.slane %v6493_v31, %v9579_v0  ;;  %v6919_v18 = vrot.slane %v6493_v31, %v9782_v37  ;;  %v7025_v2 = vld [vmem:[%s9959_s11 + $0x10] sm:$0xff] }
 0x7d3   :  { %v6903_v61 = vadd.f32 1e-05, %v6899_v22  ;;  %v6905_v3 = vadd.f32 1e-05, %v6901_v23  ;;  %v6923_v56 = vrot.slane %v6493_v31, %v6922_v29  ;;  %v6927_v38 = vrot.slane %v6493_v31, %v6926_v24  ;;  %v7026_v22 = vld [vmem:[%s9959_s11 + $0x18] sm:$0xff] }
 0x7d4   :  { %v6904_v9 = vadd.f32 1e-05, %v6900_v27  ;;  %v6906_v45 = vadd.f32 1e-05, %v6902_v42 }
 0x7d5   :  { %7412 = vrsqrt.f32 %v6903_v61 }
 0x7d6   :  { %7414 = vrsqrt.f32 %v6905_v3 }
 0x7d7   :  { %7416 = vrsqrt.f32 %v6904_v9  ;;  %v7430_v9 = vmov 0  }
 0x7d8   :  { %7418 = vrsqrt.f32 %v6906_v45  ;;  %7411 = vset.pattern.permute.xlu0 %v7430_v9 }
 0x7df   :  { %v7413_v49 = vpop.eup %7412 }
 0x7e0   :  { %v7415_v8 = vpop.eup %7414  ;;  %v6932_v48 = vmul.f32 %v7413_v49, %v6915_v17 }
 0x7e1   :  { %v7417_v58 = vpop.eup %7416  ;;  %v6934_v63 = vmul.f32 %v7415_v8, %v6923_v56 }
 0x7e2   :  { %v7419_v14 = vpop.eup %7418  ;;  %v6936_v26 = vmul.f32 %v6932_v48, %v6859_v10  ;;  %v6933_v60 = vmul.f32 %v7417_v58, %v6919_v18  ;;  %v6973_v15 = vrot.slane %v6932_v48, %v9579_v0 }
 0x7e3   :  { %v6938_v4 = vmul.f32 %v6934_v63, %v6861_v36  ;;  %v6935_v25 = vmul.f32 %v7419_v14, %v6927_v38  ;;  %v6981_v57 = vrot.slane %v6934_v63, %v9579_v0 }
 0x7e4   :  { %v6937_v28 = vmul.f32 %v6933_v60, %v6860_v52  ;;  %v6977_v41 = vrot.slane %v6933_v60, %v9579_v0  ;;  %v6986_v47 = vmul.f32 %v6973_v15, %v9886_v35 }
 0x7e5   :  { %v6939_v12 = vmul.f32 %v6935_v25, %v6862_v11  ;;  %v6985_v20 = vrot.slane %v6935_v25, %v9579_v0  ;;  %v6988_v43 = vmul.f32 %v6981_v57, %v9888_v39  ;;  %v7023_v39 = vld [vmem:[%s9959_s11] sm:$0xff] }
 0x7e6   :  { %v6944_v34 = vcombine.low %v6936_v26, %v6937_v28  ;;  %v6987_v10 = vmul.f32 %v6977_v41, %v9896_v16 }
 0x7e7   :  { %v6945_v59 = vcombine.low %v6938_v4, %v6939_v12  ;;  %v6989_v6 = vmul.f32 %v6985_v20, %v9898_v44 }
 0x7e8   :  { %v6952_v50 = vrot.slane %v6944_v34, %v9788_v30 }
 0x7e9   :  { %v6959_v62 = vrot.slane %v6945_v59, %v9788_v30 }
 0x7eb   :  { %v6960_v7 = vcombine.low %v6952_v50, %v6959_v62 }
 0x7ed   :  { %v6967_v46 = vrot.slane %v6960_v7, %v9788_v30 }
 0x7ef   :  { %v6969_v40 = vsub.f32 %v6494_v21, %v6967_v46 }
 0x7f1   :  { %v6994_v36 = vrot.slane %v6969_v40, %v9579_v0  ;;  %v6998_v32 = vrot.slane %v6969_v40, %v9782_v37  ;;  %v7002_v52 = vrot.slane %v6969_v40, %v6922_v29  ;;  %v7006_v53 = vrot.slane %v6969_v40, %v6926_v24  ;;  %v7024_v0 = vld [vmem:[%s9959_s11 + $0x8] sm:$0xff] }
 0x7f3   :  { %v7011_v11 = vadd.f32 %v6994_v36, %v6986_v47  ;;  %v7012_v1 = vadd.f32 %v6998_v32, %v6987_v10  ;;  %v7013_v33 = vadd.f32 %v7002_v52, %v6988_v43  ;;  %v7014_v51 = vadd.f32 %v7006_v53, %v6989_v6 }
 0x7f5   :  { %v7015_v30 = vmul.f32 0.2, %v7011_v11  ;;  %v7016_v54 = vmul.f32 0.2, %v7012_v1  ;;  %v7017_v55 = vmul.f32 0.2, %v7013_v33 }
 0x7f6   :  { %v7018_v35 = vmul.f32 0.2, %v7014_v51 }
 0x7f7   :  { %v7019_v16 = vmax.f32 %v7011_v11, %v7015_v30  ;;  %v7020_v37 = vmax.f32 %v7012_v1, %v7016_v54  ;;  %v7021_v44 = vmax.f32 %v7013_v33, %v7017_v55 }
 0x7f8   :  { %v7022_v19 = vmax.f32 %v7014_v51, %v7018_v35 }
 0x7f9   :  { %v7027_v5 = vmul.f32 %v7023_v39, %v7019_v16  ;;  %v7028_v13 = vmul.f32 %v7024_v0, %v7020_v37  ;;  %v7029_v23 = vmul.f32 %v7025_v2, %v7021_v44 }
 0x7fa   :  { %v7030_v42 = vmul.f32 %v7026_v22, %v7022_v19 }
 0x7fb   :  { %v7031_v27 = vadd.f32 %v7028_v13, %v7027_v5 }
 0x7fd   :  { %v7032_v61 = vadd.f32 %v7031_v27, %v7029_v23 }
 0x7ff   :  { %v7033_v3 = vadd.f32 %v7032_v61, %v7030_v42 }
 0x801   :  { %7034 = vadd.xlane.f32.xlu0 %v7033_v3 }
 0x88e   :  { %v7035_v45 = vpop.xlane.xlu0 %7034 }
 0x88f   :  { %v7037_v31 = vrot.slane %v7035_v45, 2  ;;  %v7040_v24 = vrot.slane %v7035_v45, 4  ;;  %v7043_v56 = vrot.slane %v7035_v45, 6 }
 0x891   :  { %v7039_v29 = vadd.f32 %v7037_v31, %v7035_v45 }
 0x893   :  { %v7042_v17 = vadd.f32 %v7040_v24, %v7039_v29 }
 0x895   :  { %v7045_v18 = vadd.f32 %v7043_v56, %v7042_v17 }
 0x897   :  { %v7187_v49 = vmul.f32 -1.442695, %v7045_v18 }
 0x899   :  { %7420 = vpow2.f32 %v7187_v49 }
 0x8a3   :  { %v7421_v38 = vpop.eup %7420 }
 0x8a4   :  { %v7049_v8 = vadd.f32 1.0, %v7421_v38 }
 0x8a6   :  { %7422 = vrcp.f32 %v7049_v8 }
 0x8b0   :  { %v7423_v48 = vpop.eup %7422 }
 0x8b1   :  { %7054 = vperm.xlu0 %7411, %v7423_v48  }
 0x930   :  { %v7055_v58 = vpop.permute.xlu0 %7054 }
 0x931   :  { %7057 = vst [vmem:[%s9960_s12] sm:$0x3] %v7055_v58 }
 0x932   :  { %7062 = vsyncmov [#allocation4] }
 0x935   :  { %s7063_s27 = vpop.sfrf %7062 }
 0x936   :  { %p7188_p0 = scmp.ne.s32.totalorder %s7063_s27, 0 }
 0x938   :  { %7067 = shalt.err (%p7188_p0)  }
 0x939   :  { %7069 = vsyncmov [#allocation4 + $0x1] }
 0x93c   :  { %s7070_s28 = vpop.sfrf %7069 }
 0x93d   :  { %p7189_p1 = scmp.ne.s32.totalorder %s7070_s28, 0 }
 0x93f   :  { %7074 = shalt.err (%p7189_p1)  }

</bundles_post_ra>
